<compile_context>
chip_gen: v6e
topology: v6e:2x2x1
jax: 0.10.0
libtpu: 0.0.40
codegen_flags: <defaults>
</compile_context>

<pallas_src>
import functools

import numpy as np
import jax
import jax.numpy as jnp
from jax.experimental import pallas as pl
from jax.experimental.pallas import tpu as pltpu


C1 = 6      # real conv1 output channels
C1P = 8     # conv1 channel interleave group (padded 6 -> 8)
C2 = 16     # conv2 output channels (interleave group, no padding needed)
NP = 128    # FC lane width (all FC outputs padded to 128 lanes)


# ---------------------------------------------------------------------------
# The fused kernel: `imgs` images per grid step, everything VMEM-resident.
# ---------------------------------------------------------------------------
def _lenet5_kernel(imgs,
                   x_ref, w1_ref, b1_ref, p1r_ref, p1c_ref,
                   w2_ref, b2_ref, p2r_ref, p2c_ref,
                   fw1_ref, fb1_ref, fw2_ref, fb2_ref, fw3_ref, fb3_ref,
                   o_ref, p1s_ref, p2s_ref):
    f32 = jnp.float32

    for n in range(imgs):
        # ---- conv1: 5 banded MXU matmuls -> (28, 28*8) interleaved [ow*8+c] --
        a1 = jnp.zeros((28, 28 * C1P), f32)
        for i in range(5):
            xs = x_ref[n, pl.ds(i, 28), :]                       # (28, 32)
            a1 = a1 + jnp.dot(xs, w1_ref[i], preferred_element_type=f32)

        # ---- max-pool 2x2 #1 via selection matmuls, then bias+ReLU ----------
        hp = jnp.maximum(
            jnp.dot(p1r_ref[0], a1, preferred_element_type=f32),
            jnp.dot(p1r_ref[1], a1, preferred_element_type=f32))  # (14, 224)
        wp = jnp.maximum(
            jnp.dot(hp, p1c_ref[0], preferred_element_type=f32),
            jnp.dot(hp, p1c_ref[1], preferred_element_type=f32))  # (14, 112)
        p1s_ref[n] = jnp.maximum(wp + b1_ref[...], 0.0)           # [ph, pw*8+c]

        # ---- conv2: 5 banded MXU matmuls -> (10, 10*16) interleaved ----------
        a2 = jnp.zeros((10, 10 * C2), f32)
        for i in range(5):
            rows = p1s_ref[n, pl.ds(i, 10), :]                    # (10, 112)
            a2 = a2 + jnp.dot(rows, w2_ref[i], preferred_element_type=f32)

        # ---- max-pool 2x2 #2 via selection matmuls, then bias+ReLU ----------
        hp2 = jnp.maximum(
            jnp.dot(p2r_ref[0], a2, preferred_element_type=f32),
            jnp.dot(p2r_ref[1], a2, preferred_element_type=f32))  # (5, 160)
        wp2 = jnp.maximum(
            jnp.dot(hp2, p2c_ref[0], preferred_element_type=f32),
            jnp.dot(hp2, p2c_ref[1], preferred_element_type=f32))  # (5, 80)
        p2s_ref[n] = jnp.maximum(wp2 + b2_ref[...], 0.0)          # [ph2, pw2*16+c2]

        # ---- fc1 (+ReLU): contraction over the 5 pooled rows, K=80 each -----
        h = fb1_ref[...]                                          # (1, 128)
        for r in range(5):
            h = h + jnp.dot(p2s_ref[n, pl.ds(r, 1), :], fw1_ref[r],
                            preferred_element_type=f32)
        h1 = jnp.maximum(h, 0.0)

        # ---- fc2 (+ReLU), fc3; single lane-dense (1,128) store --------------
        h2 = jnp.maximum(
            jnp.dot(h1, fw2_ref[...], preferred_element_type=f32) + fb2_ref[...],
            0.0)
        o_ref[n] = (jnp.dot(h2, fw3_ref[...], preferred_element_type=f32)
                    + fb3_ref[...])


# ---------------------------------------------------------------------------
# Torch-layout parameters
# ---------------------------------------------------------------------------
def init_params(key):
    ks = jax.random.split(key, 10)
    s = 0.1
    return {
        "conv1_w": s * jax.random.normal(ks[0], (6, 1, 5, 5), jnp.float32),
        "conv1_b": s * jax.random.normal(ks[1], (6,), jnp.float32),
        "conv2_w": s * jax.random.normal(ks[2], (16, 6, 5, 5), jnp.float32),
        "conv2_b": s * jax.random.normal(ks[3], (16,), jnp.float32),
        "fc1_w": s * jax.random.normal(ks[4], (120, 400), jnp.float32),
        "fc1_b": s * jax.random.normal(ks[5], (120,), jnp.float32),
        "fc2_w": s * jax.random.normal(ks[6], (84, 120), jnp.float32),
        "fc2_b": s * jax.random.normal(ks[7], (84,), jnp.float32),
        "fc3_w": s * jax.random.normal(ks[8], (26, 84), jnp.float32),
        "fc3_b": s * jax.random.normal(ks[9], (26,), jnp.float32),
    }


# ---------------------------------------------------------------------------
# One-time weight preparation: banded conv matrices, pool selection matrices,
# interleaved biases, flatten-order folded into fc1. Done in numpy, once.
# ---------------------------------------------------------------------------
def prepare_params(p):
    w1 = np.asarray(p["conv1_w"], np.float32)   # (6,1,5,5)   [c,1,i,j]
    b1 = np.asarray(p["conv1_b"], np.float32)
    w2 = np.asarray(p["conv2_w"], np.float32)   # (16,6,5,5)  [c2,c,i,j]
    b2 = np.asarray(p["conv2_b"], np.float32)
    f1w = np.asarray(p["fc1_w"], np.float32)    # (120,400)
    f1b = np.asarray(p["fc1_b"], np.float32)
    f2w = np.asarray(p["fc2_w"], np.float32)    # (84,120)
    f2b = np.asarray(p["fc2_b"], np.float32)
    f3w = np.asarray(p["fc3_w"], np.float32)    # (26,84)
    f3b = np.asarray(p["fc3_b"], np.float32)

    # conv1 banded weights: W1[i, wcol, ow*8+c] = w1[c,0,i,wcol-ow]
    k1 = np.transpose(w1[:, 0], (1, 2, 0))      # (i,j,c) = (5,5,6)
    W1 = np.zeros((5, 32, 28, C1P), np.float32)
    for j in range(5):
        for ow in range(28):
            W1[:, ow + j, ow, :C1] = k1[:, j, :]
    W1 = W1.reshape(5, 32, 28 * C1P)
    b1f = np.tile(np.pad(b1, (0, C1P - C1)), 14).reshape(1, 14 * C1P)  # (1,112)

    # pool1 selection matrices (rows: even/odd output rows; cols: even/odd
    # width groups of 8 interleaved channels)
    P1R = np.zeros((2, 14, 28), np.float32)
    for ph in range(14):
        P1R[0, ph, 2 * ph] = 1.0
        P1R[1, ph, 2 * ph + 1] = 1.0
    P1C = np.zeros((2, 28 * C1P, 14 * C1P), np.float32)
    for pw in range(14):
        for c in range(C1P):
            P1C[0, (2 * pw) * C1P + c, pw * C1P + c] = 1.0
            P1C[1, (2 * pw + 1) * C1P + c, pw * C1P + c] = 1.0

    # conv2 banded weights: W2[i, pw*8+c, ow2*16+c2] = w2[c2,c,i,pw-ow2]
    k2 = np.transpose(w2, (2, 3, 1, 0))         # (i,j,c,c2) = (5,5,6,16)
    W2 = np.zeros((5, 14, C1P, 10, C2), np.float32)
    for j in range(5):
        for ow in range(10):
            W2[:, ow + j, :C1, ow, :] = k2[:, j, :, :]
    W2 = W2.reshape(5, 14 * C1P, 10 * C2)
    b2f = np.tile(b2, 5).reshape(1, 5 * C2)     # (1,80)

    # pool2 selection matrices
    P2R = np.zeros((2, 5, 10), np.float32)
    for ph in range(5):
        P2R[0, ph, 2 * ph] = 1.0
        P2R[1, ph, 2 * ph + 1] = 1.0
    P2C = np.zeros((2, 10 * C2, 5 * C2), np.float32)
    for pw in range(5):
        for c in range(C2):
            P2C[0, (2 * pw) * C2 + c, pw * C2 + c] = 1.0
            P2C[1, (2 * pw + 1) * C2 + c, pw * C2 + c] = 1.0

    # fc1: torch flatten index = c2*25 + ph2*5 + pw2 folded into interleaved
    # row layout: FW1[ph2, pw2*16+c2, n]
    FW1 = np.zeros((5, 5, C2, NP), np.float32)
    FW1[:, :, :, :120] = np.transpose(f1w.reshape(120, 16, 5, 5), (2, 3, 1, 0))
    FW1 = FW1.reshape(5, 5 * C2, NP)
    fb1 = np.zeros((1, NP), np.float32); fb1[0, :120] = f1b

    FW2 = np.zeros((NP, NP), np.float32); FW2[:120, :84] = f2w.T
    fb2 = np.zeros((1, NP), np.float32); fb2[0, :84] = f2b
    FW3 = np.zeros((NP, NP), np.float32); FW3[:84, :26] = f3w.T
    fb3 = np.zeros((1, NP), np.float32); fb3[0, :26] = f3b

    j = jnp.asarray
    return {"w1": j(W1), "b1f": j(b1f), "p1r": j(P1R), "p1c": j(P1C),
            "w2": j(W2), "b2f": j(b2f), "p2r": j(P2R), "p2c": j(P2C),
            "fw1": j(FW1), "fb1": j(fb1), "fw2": j(FW2), "fb2": j(fb2),
            "fw3": j(FW3), "fb3": j(fb3)}


# ---------------------------------------------------------------------------
# Forward wrapper: one pallas_call for the whole network
# ---------------------------------------------------------------------------
def lenet5_forward(x_nchw, kp):
    B = x_nchw.shape[0]
    # NCHW with C=1 -> (B,32,32) is a pure reshape (same element order).
    x = x_nchw.astype(jnp.float32).reshape(B, 32, 32)

    # Process several images per grid step to amortize per-step overhead.
    imgs = 1
    for cand in (8, 4, 2):
        if B % cand == 0:
            imgs = cand
            break

    def full(shape):
        return pl.BlockSpec(shape, lambda b, _n=len(shape): (0,) * _n)

    out = pl.pallas_call(
        functools.partial(_lenet5_kernel, imgs),
        out_shape=jax.ShapeDtypeStruct((B, 1, NP), jnp.float32),
        grid=(B // imgs,),
        in_specs=[
            pl.BlockSpec((imgs, 32, 32), lambda b: (b, 0, 0)),   # x
            full((5, 32, 28 * C1P)),                             # conv1 banded
            full((1, 14 * C1P)),                                 # conv1 bias
            full((2, 14, 28)),                                   # pool1 rows
            full((2, 28 * C1P, 14 * C1P)),                       # pool1 cols
            full((5, 14 * C1P, 10 * C2)),                        # conv2 banded
            full((1, 5 * C2)),                                   # conv2 bias
            full((2, 5, 10)),                                    # pool2 rows
            full((2, 10 * C2, 5 * C2)),                          # pool2 cols
            full((5, 5 * C2, NP)),                               # fc1 w
            full((1, NP)),                                       # fc1 b
            full((NP, NP)),                                      # fc2 w
            full((1, NP)),                                       # fc2 b
            full((NP, NP)),                                      # fc3 w
            full((1, NP)),                                       # fc3 b
        ],
        out_specs=pl.BlockSpec((imgs, 1, NP), lambda b: (b, 0, 0)),
        scratch_shapes=[
            pltpu.VMEM((imgs, 14, 14 * C1P), jnp.float32),   # pooled conv1
            pltpu.VMEM((imgs, 5, 5 * C2), jnp.float32),      # pooled conv2
        ],
        compiler_params=pltpu.CompilerParams(
            dimension_semantics=("parallel",)),
    )(x, kp["w1"], kp["b1f"], kp["p1r"], kp["p1c"],
      kp["w2"], kp["b2f"], kp["p2r"], kp["p2c"],
      kp["fw1"], kp["fb1"], kp["fw2"], kp["fb2"], kp["fw3"], kp["fb3"])

    return out[:, 0, :26]   # drop lane padding -> (B, 26) logits


if __name__ == "__main__":
    key = jax.random.PRNGKey(0)
    k_x, k_p = jax.random.split(key)

    # LeNet-5 geometry requires 32x32 single-channel input for the 16*5*5 flatten.
    x = jax.random.normal(k_x, (2, 1, 32, 32), jnp.float32)
    params = init_params(k_p)
    kparams = prepare_params(params)          # one-time layout prep, outside jit

    out = jax.jit(lenet5_forward)(x, kparams)
    out = jax.block_until_ready(out)
    assert out.shape == (2, 26), out.shape
    print("KERNEL_OK")
</pallas_src>

<mosaic_0001>
module attributes {stable_mosaic.version = 11 : i64} {
  func.func @_lenet5_kernel(%arg0: i32, %arg1: memref<2x32x32xf32, #tpu.memory_space<vmem>>, %arg2: memref<5x32x224xf32, #tpu.memory_space<vmem>>, %arg3: memref<1x112xf32, #tpu.memory_space<vmem>>, %arg4: memref<2x14x28xf32, #tpu.memory_space<vmem>>, %arg5: memref<2x224x112xf32, #tpu.memory_space<vmem>>, %arg6: memref<5x112x160xf32, #tpu.memory_space<vmem>>, %arg7: memref<1x80xf32, #tpu.memory_space<vmem>>, %arg8: memref<2x5x10xf32, #tpu.memory_space<vmem>>, %arg9: memref<2x160x80xf32, #tpu.memory_space<vmem>>, %arg10: memref<5x80x128xf32, #tpu.memory_space<vmem>>, %arg11: memref<1x128xf32, #tpu.memory_space<vmem>>, %arg12: memref<128x128xf32, #tpu.memory_space<vmem>>, %arg13: memref<1x128xf32, #tpu.memory_space<vmem>>, %arg14: memref<128x128xf32, #tpu.memory_space<vmem>>, %arg15: memref<1x128xf32, #tpu.memory_space<vmem>>, %arg16: memref<2x1x128xf32, #tpu.memory_space<vmem>>, %arg17: memref<2x14x112xf32, #tpu.memory_space<vmem>>, %arg18: memref<2x5x80xf32, #tpu.memory_space<vmem>>) attributes {dimension_semantics = [#tpu.dimension_semantics<parallel>], iteration_bounds = array<i64: 1>, scalar_prefetch = 0 : i64, scratch_operands = 2 : i64, tpu.core_type = #tpu.core_type<tc>, window_params = [{transform_indices = @transform_0, window_bounds = array<i64: 2, 32, 32>}, {pipeline_mode = #tpu.pipeline_mode<synchronous>, transform_indices = @transform_1, window_bounds = array<i64: 5, 32, 224>}, {pipeline_mode = #tpu.pipeline_mode<synchronous>, transform_indices = @transform_2, window_bounds = array<i64: 1, 112>}, {pipeline_mode = #tpu.pipeline_mode<synchronous>, transform_indices = @transform_3, window_bounds = array<i64: 2, 14, 28>}, {pipeline_mode = #tpu.pipeline_mode<synchronous>, transform_indices = @transform_4, window_bounds = array<i64: 2, 224, 112>}, {pipeline_mode = #tpu.pipeline_mode<synchronous>, transform_indices = @transform_5, window_bounds = array<i64: 5, 112, 160>}, {pipeline_mode = #tpu.pipeline_mode<synchronous>, transform_indices = @transform_6, window_bounds = array<i64: 1, 80>}, {pipeline_mode = #tpu.pipeline_mode<synchronous>, transform_indices = @transform_7, window_bounds = array<i64: 2, 5, 10>}, {pipeline_mode = #tpu.pipeline_mode<synchronous>, transform_indices = @transform_8, window_bounds = array<i64: 2, 160, 80>}, {pipeline_mode = #tpu.pipeline_mode<synchronous>, transform_indices = @transform_9, window_bounds = array<i64: 5, 80, 128>}, {pipeline_mode = #tpu.pipeline_mode<synchronous>, transform_indices = @transform_10, window_bounds = array<i64: 1, 128>}, {pipeline_mode = #tpu.pipeline_mode<synchronous>, transform_indices = @transform_11, window_bounds = array<i64: 128, 128>}, {pipeline_mode = #tpu.pipeline_mode<synchronous>, transform_indices = @transform_12, window_bounds = array<i64: 1, 128>}, {pipeline_mode = #tpu.pipeline_mode<synchronous>, transform_indices = @transform_13, window_bounds = array<i64: 128, 128>}, {pipeline_mode = #tpu.pipeline_mode<synchronous>, transform_indices = @transform_14, window_bounds = array<i64: 1, 128>}, {transform_indices = @transform_15, window_bounds = array<i64: 2, 1, 128>}]} {
    %cst = arith.constant 0.000000e+00 : f32
    %0 = vector.broadcast %cst : f32 to vector<28x224xf32>
    %c0 = arith.constant 0 : index
    %c0_0 = arith.constant 0 : index
    %c0_1 = arith.constant 0 : index
    %1 = vector.load %arg1[%c0, %c0_0, %c0_1] : memref<2x32x32xf32, #tpu.memory_space<vmem>>, vector<1x28x32xf32>
    %2 = vector.shape_cast %1 : vector<1x28x32xf32> to vector<28x32xf32>
    %c0_2 = arith.constant 0 : index
    %c0_3 = arith.constant 0 : index
    %c0_4 = arith.constant 0 : index
    %3 = vector.load %arg2[%c0_2, %c0_3, %c0_4] : memref<5x32x224xf32, #tpu.memory_space<vmem>>, vector<1x32x224xf32>
    %4 = vector.shape_cast %3 : vector<1x32x224xf32> to vector<32x224xf32>
    %cst_5 = arith.constant dense<0.000000e+00> : vector<28x224xf32>
    %5 = tpu.matmul %2, %4, %cst_5 {dimension_numbers = #tpu.dot_dimension_numbers<[1], [0], [0], [1], [0, 0, 1, 1], [], []>} : vector<28x32xf32>, vector<32x224xf32>, vector<28x224xf32> -> vector<28x224xf32>
    %6 = arith.addf %0, %5 : vector<28x224xf32>
    %c0_6 = arith.constant 0 : index
    %c1 = arith.constant 1 : index
    %c0_7 = arith.constant 0 : index
    %7 = vector.load %arg1[%c0_6, %c1, %c0_7] : memref<2x32x32xf32, #tpu.memory_space<vmem>>, vector<1x28x32xf32>
    %8 = vector.shape_cast %7 : vector<1x28x32xf32> to vector<28x32xf32>
    %c1_8 = arith.constant 1 : index
    %c0_9 = arith.constant 0 : index
    %c0_10 = arith.constant 0 : index
    %9 = vector.load %arg2[%c1_8, %c0_9, %c0_10] : memref<5x32x224xf32, #tpu.memory_space<vmem>>, vector<1x32x224xf32>
    %10 = vector.shape_cast %9 : vector<1x32x224xf32> to vector<32x224xf32>
    %cst_11 = arith.constant dense<0.000000e+00> : vector<28x224xf32>
    %11 = tpu.matmul %8, %10, %cst_11 {dimension_numbers = #tpu.dot_dimension_numbers<[1], [0], [0], [1], [0, 0, 1, 1], [], []>} : vector<28x32xf32>, vector<32x224xf32>, vector<28x224xf32> -> vector<28x224xf32>
    %12 = arith.addf %6, %11 : vector<28x224xf32>
    %c0_12 = arith.constant 0 : index
    %c2 = arith.constant 2 : index
    %c0_13 = arith.constant 0 : index
    %13 = vector.load %arg1[%c0_12, %c2, %c0_13] : memref<2x32x32xf32, #tpu.memory_space<vmem>>, vector<1x28x32xf32>
    %14 = vector.shape_cast %13 : vector<1x28x32xf32> to vector<28x32xf32>
    %c2_14 = arith.constant 2 : index
    %c0_15 = arith.constant 0 : index
    %c0_16 = arith.constant 0 : index
    %15 = vector.load %arg2[%c2_14, %c0_15, %c0_16] : memref<5x32x224xf32, #tpu.memory_space<vmem>>, vector<1x32x224xf32>
    %16 = vector.shape_cast %15 : vector<1x32x224xf32> to vector<32x224xf32>
    %cst_17 = arith.constant dense<0.000000e+00> : vector<28x224xf32>
    %17 = tpu.matmul %14, %16, %cst_17 {dimension_numbers = #tpu.dot_dimension_numbers<[1], [0], [0], [1], [0, 0, 1, 1], [], []>} : vector<28x32xf32>, vector<32x224xf32>, vector<28x224xf32> -> vector<28x224xf32>
    %18 = arith.addf %12, %17 : vector<28x224xf32>
    %c0_18 = arith.constant 0 : index
    %c3 = arith.constant 3 : index
    %c0_19 = arith.constant 0 : index
    %19 = vector.load %arg1[%c0_18, %c3, %c0_19] : memref<2x32x32xf32, #tpu.memory_space<vmem>>, vector<1x28x32xf32>
    %20 = vector.shape_cast %19 : vector<1x28x32xf32> to vector<28x32xf32>
    %c3_20 = arith.constant 3 : index
    %c0_21 = arith.constant 0 : index
    %c0_22 = arith.constant 0 : index
    %21 = vector.load %arg2[%c3_20, %c0_21, %c0_22] : memref<5x32x224xf32, #tpu.memory_space<vmem>>, vector<1x32x224xf32>
    %22 = vector.shape_cast %21 : vector<1x32x224xf32> to vector<32x224xf32>
    %cst_23 = arith.constant dense<0.000000e+00> : vector<28x224xf32>
    %23 = tpu.matmul %20, %22, %cst_23 {dimension_numbers = #tpu.dot_dimension_numbers<[1], [0], [0], [1], [0, 0, 1, 1], [], []>} : vector<28x32xf32>, vector<32x224xf32>, vector<28x224xf32> -> vector<28x224xf32>
    %24 = arith.addf %18, %23 : vector<28x224xf32>
    %c0_24 = arith.constant 0 : index
    %c4 = arith.constant 4 : index
    %c0_25 = arith.constant 0 : index
    %25 = vector.load %arg1[%c0_24, %c4, %c0_25] : memref<2x32x32xf32, #tpu.memory_space<vmem>>, vector<1x28x32xf32>
    %26 = vector.shape_cast %25 : vector<1x28x32xf32> to vector<28x32xf32>
    %c4_26 = arith.constant 4 : index
    %c0_27 = arith.constant 0 : index
    %c0_28 = arith.constant 0 : index
    %27 = vector.load %arg2[%c4_26, %c0_27, %c0_28] : memref<5x32x224xf32, #tpu.memory_space<vmem>>, vector<1x32x224xf32>
    %28 = vector.shape_cast %27 : vector<1x32x224xf32> to vector<32x224xf32>
    %cst_29 = arith.constant dense<0.000000e+00> : vector<28x224xf32>
    %29 = tpu.matmul %26, %28, %cst_29 {dimension_numbers = #tpu.dot_dimension_numbers<[1], [0], [0], [1], [0, 0, 1, 1], [], []>} : vector<28x32xf32>, vector<32x224xf32>, vector<28x224xf32> -> vector<28x224xf32>
    %30 = arith.addf %24, %29 : vector<28x224xf32>
    %c0_30 = arith.constant 0 : index
    %c0_31 = arith.constant 0 : index
    %c0_32 = arith.constant 0 : index
    %31 = vector.load %arg4[%c0_30, %c0_31, %c0_32] : memref<2x14x28xf32, #tpu.memory_space<vmem>>, vector<1x14x28xf32>
    %32 = vector.shape_cast %31 : vector<1x14x28xf32> to vector<14x28xf32>
    %cst_33 = arith.constant dense<0.000000e+00> : vector<14x224xf32>
    %33 = tpu.matmul %32, %30, %cst_33 {dimension_numbers = #tpu.dot_dimension_numbers<[1], [0], [0], [1], [0, 0, 1, 1], [], []>} : vector<14x28xf32>, vector<28x224xf32>, vector<14x224xf32> -> vector<14x224xf32>
    %c1_34 = arith.constant 1 : index
    %c0_35 = arith.constant 0 : index
    %c0_36 = arith.constant 0 : index
    %34 = vector.load %arg4[%c1_34, %c0_35, %c0_36] : memref<2x14x28xf32, #tpu.memory_space<vmem>>, vector<1x14x28xf32>
    %35 = vector.shape_cast %34 : vector<1x14x28xf32> to vector<14x28xf32>
    %cst_37 = arith.constant dense<0.000000e+00> : vector<14x224xf32>
    %36 = tpu.matmul %35, %30, %cst_37 {dimension_numbers = #tpu.dot_dimension_numbers<[1], [0], [0], [1], [0, 0, 1, 1], [], []>} : vector<14x28xf32>, vector<28x224xf32>, vector<14x224xf32> -> vector<14x224xf32>
    %37 = arith.maximumf %33, %36 : vector<14x224xf32>
    %c0_38 = arith.constant 0 : index
    %c0_39 = arith.constant 0 : index
    %c0_40 = arith.constant 0 : index
    %38 = vector.load %arg5[%c0_38, %c0_39, %c0_40] : memref<2x224x112xf32, #tpu.memory_space<vmem>>, vector<1x224x112xf32>
    %39 = vector.shape_cast %38 : vector<1x224x112xf32> to vector<224x112xf32>
    %cst_41 = arith.constant dense<0.000000e+00> : vector<14x112xf32>
    %40 = tpu.matmul %37, %39, %cst_41 {dimension_numbers = #tpu.dot_dimension_numbers<[1], [0], [0], [1], [0, 0, 1, 1], [], []>} : vector<14x224xf32>, vector<224x112xf32>, vector<14x112xf32> -> vector<14x112xf32>
    %c1_42 = arith.constant 1 : index
    %c0_43 = arith.constant 0 : index
    %c0_44 = arith.constant 0 : index
    %41 = vector.load %arg5[%c1_42, %c0_43, %c0_44] : memref<2x224x112xf32, #tpu.memory_space<vmem>>, vector<1x224x112xf32>
    %42 = vector.shape_cast %41 : vector<1x224x112xf32> to vector<224x112xf32>
    %cst_45 = arith.constant dense<0.000000e+00> : vector<14x112xf32>
    %43 = tpu.matmul %37, %42, %cst_45 {dimension_numbers = #tpu.dot_dimension_numbers<[1], [0], [0], [1], [0, 0, 1, 1], [], []>} : vector<14x224xf32>, vector<224x112xf32>, vector<14x112xf32> -> vector<14x112xf32>
    %44 = arith.maximumf %40, %43 : vector<14x112xf32>
    %c0_46 = arith.constant 0 : index
    %c0_47 = arith.constant 0 : index
    %45 = vector.load %arg3[%c0_46, %c0_47] : memref<1x112xf32, #tpu.memory_space<vmem>>, vector<1x112xf32>
    %46 = vector.broadcast %45 : vector<1x112xf32> to vector<14x112xf32>
    %47 = arith.addf %44, %46 : vector<14x112xf32>
    %cst_48 = arith.constant 0.000000e+00 : f32
    %48 = vector.broadcast %cst_48 : f32 to vector<14x112xf32>
    %49 = arith.maximumf %47, %48 : vector<14x112xf32>
    %c0_49 = arith.constant 0 : index
    %c0_50 = arith.constant 0 : index
    %c0_51 = arith.constant 0 : index
    %50 = vector.load %arg17[%c0_49, %c0_50, %c0_51] : memref<2x14x112xf32, #tpu.memory_space<vmem>>, vector<1x14x112xf32>
    %51 = vector.shape_cast %50 : vector<1x14x112xf32> to vector<14x112xf32>
    %52 = vector.shape_cast %49 : vector<14x112xf32> to vector<1x14x112xf32>
    tpu.vector_store %arg17[%c0_49, %c0_50, %c0_51], %52 {strides = array<i32>} : memref<2x14x112xf32, #tpu.memory_space<vmem>>, vector<1x14x112xf32>,
    %cst_52 = arith.constant 0.000000e+00 : f32
    %53 = vector.broadcast %cst_52 : f32 to vector<10x160xf32>
    %c0_53 = arith.constant 0 : index
    %c0_54 = arith.constant 0 : index
    %c0_55 = arith.constant 0 : index
    %54 = vector.load %arg17[%c0_53, %c0_54, %c0_55] : memref<2x14x112xf32, #tpu.memory_space<vmem>>, vector<1x10x112xf32>
    %55 = vector.shape_cast %54 : vector<1x10x112xf32> to vector<10x112xf32>
    %c0_56 = arith.constant 0 : index
    %c0_57 = arith.constant 0 : index
    %c0_58 = arith.constant 0 : index
    %56 = vector.load %arg6[%c0_56, %c0_57, %c0_58] : memref<5x112x160xf32, #tpu.memory_space<vmem>>, vector<1x112x160xf32>
    %57 = vector.shape_cast %56 : vector<1x112x160xf32> to vector<112x160xf32>
    %cst_59 = arith.constant dense<0.000000e+00> : vector<10x160xf32>
    %58 = tpu.matmul %55, %57, %cst_59 {dimension_numbers = #tpu.dot_dimension_numbers<[1], [0], [0], [1], [0, 0, 1, 1], [], []>} : vector<10x112xf32>, vector<112x160xf32>, vector<10x160xf32> -> vector<10x160xf32>
    %59 = arith.addf %53, %58 : vector<10x160xf32>
    %c0_60 = arith.constant 0 : index
    %c1_61 = arith.constant 1 : index
    %c0_62 = arith.constant 0 : index
    %60 = vector.load %arg17[%c0_60, %c1_61, %c0_62] : memref<2x14x112xf32, #tpu.memory_space<vmem>>, vector<1x10x112xf32>
    %61 = vector.shape_cast %60 : vector<1x10x112xf32> to vector<10x112xf32>
    %c1_63 = arith.constant 1 : index
    %c0_64 = arith.constant 0 : index
    %c0_65 = arith.constant 0 : index
    %62 = vector.load %arg6[%c1_63, %c0_64, %c0_65] : memref<5x112x160xf32, #tpu.memory_space<vmem>>, vector<1x112x160xf32>
    %63 = vector.shape_cast %62 : vector<1x112x160xf32> to vector<112x160xf32>
    %cst_66 = arith.constant dense<0.000000e+00> : vector<10x160xf32>
    %64 = tpu.matmul %61, %63, %cst_66 {dimension_numbers = #tpu.dot_dimension_numbers<[1], [0], [0], [1], [0, 0, 1, 1], [], []>} : vector<10x112xf32>, vector<112x160xf32>, vector<10x160xf32> -> vector<10x160xf32>
    %65 = arith.addf %59, %64 : vector<10x160xf32>
    %c0_67 = arith.constant 0 : index
    %c2_68 = arith.constant 2 : index
    %c0_69 = arith.constant 0 : index
    %66 = vector.load %arg17[%c0_67, %c2_68, %c0_69] : memref<2x14x112xf32, #tpu.memory_space<vmem>>, vector<1x10x112xf32>
    %67 = vector.shape_cast %66 : vector<1x10x112xf32> to vector<10x112xf32>
    %c2_70 = arith.constant 2 : index
    %c0_71 = arith.constant 0 : index
    %c0_72 = arith.constant 0 : index
    %68 = vector.load %arg6[%c2_70, %c0_71, %c0_72] : memref<5x112x160xf32, #tpu.memory_space<vmem>>, vector<1x112x160xf32>
    %69 = vector.shape_cast %68 : vector<1x112x160xf32> to vector<112x160xf32>
    %cst_73 = arith.constant dense<0.000000e+00> : vector<10x160xf32>
    %70 = tpu.matmul %67, %69, %cst_73 {dimension_numbers = #tpu.dot_dimension_numbers<[1], [0], [0], [1], [0, 0, 1, 1], [], []>} : vector<10x112xf32>, vector<112x160xf32>, vector<10x160xf32> -> vector<10x160xf32>
    %71 = arith.addf %65, %70 : vector<10x160xf32>
    %c0_74 = arith.constant 0 : index
    %c3_75 = arith.constant 3 : index
    %c0_76 = arith.constant 0 : index
    %72 = vector.load %arg17[%c0_74, %c3_75, %c0_76] : memref<2x14x112xf32, #tpu.memory_space<vmem>>, vector<1x10x112xf32>
    %73 = vector.shape_cast %72 : vector<1x10x112xf32> to vector<10x112xf32>
    %c3_77 = arith.constant 3 : index
    %c0_78 = arith.constant 0 : index
    %c0_79 = arith.constant 0 : index
    %74 = vector.load %arg6[%c3_77, %c0_78, %c0_79] : memref<5x112x160xf32, #tpu.memory_space<vmem>>, vector<1x112x160xf32>
    %75 = vector.shape_cast %74 : vector<1x112x160xf32> to vector<112x160xf32>
    %cst_80 = arith.constant dense<0.000000e+00> : vector<10x160xf32>
    %76 = tpu.matmul %73, %75, %cst_80 {dimension_numbers = #tpu.dot_dimension_numbers<[1], [0], [0], [1], [0, 0, 1, 1], [], []>} : vector<10x112xf32>, vector<112x160xf32>, vector<10x160xf32> -> vector<10x160xf32>
    %77 = arith.addf %71, %76 : vector<10x160xf32>
    %c0_81 = arith.constant 0 : index
    %c4_82 = arith.constant 4 : index
    %c0_83 = arith.constant 0 : index
    %78 = vector.load %arg17[%c0_81, %c4_82, %c0_83] : memref<2x14x112xf32, #tpu.memory_space<vmem>>, vector<1x10x112xf32>
    %79 = vector.shape_cast %78 : vector<1x10x112xf32> to vector<10x112xf32>
    %c4_84 = arith.constant 4 : index
    %c0_85 = arith.constant 0 : index
    %c0_86 = arith.constant 0 : index
    %80 = vector.load %arg6[%c4_84, %c0_85, %c0_86] : memref<5x112x160xf32, #tpu.memory_space<vmem>>, vector<1x112x160xf32>
    %81 = vector.shape_cast %80 : vector<1x112x160xf32> to vector<112x160xf32>
    %cst_87 = arith.constant dense<0.000000e+00> : vector<10x160xf32>
    %82 = tpu.matmul %79, %81, %cst_87 {dimension_numbers = #tpu.dot_dimension_numbers<[1], [0], [0], [1], [0, 0, 1, 1], [], []>} : vector<10x112xf32>, vector<112x160xf32>, vector<10x160xf32> -> vector<10x160xf32>
    %83 = arith.addf %77, %82 : vector<10x160xf32>
    %c0_88 = arith.constant 0 : index
    %c0_89 = arith.constant 0 : index
    %c0_90 = arith.constant 0 : index
    %84 = vector.load %arg8[%c0_88, %c0_89, %c0_90] : memref<2x5x10xf32, #tpu.memory_space<vmem>>, vector<1x5x10xf32>
    %85 = vector.shape_cast %84 : vector<1x5x10xf32> to vector<5x10xf32>
    %cst_91 = arith.constant dense<0.000000e+00> : vector<5x160xf32>
    %86 = tpu.matmul %85, %83, %cst_91 {dimension_numbers = #tpu.dot_dimension_numbers<[1], [0], [0], [1], [0, 0, 1, 1], [], []>} : vector<5x10xf32>, vector<10x160xf32>, vector<5x160xf32> -> vector<5x160xf32>
    %c1_92 = arith.constant 1 : index
    %c0_93 = arith.constant 0 : index
    %c0_94 = arith.constant 0 : index
    %87 = vector.load %arg8[%c1_92, %c0_93, %c0_94] : memref<2x5x10xf32, #tpu.memory_space<vmem>>, vector<1x5x10xf32>
    %88 = vector.shape_cast %87 : vector<1x5x10xf32> to vector<5x10xf32>
    %cst_95 = arith.constant dense<0.000000e+00> : vector<5x160xf32>
    %89 = tpu.matmul %88, %83, %cst_95 {dimension_numbers = #tpu.dot_dimension_numbers<[1], [0], [0], [1], [0, 0, 1, 1], [], []>} : vector<5x10xf32>, vector<10x160xf32>, vector<5x160xf32> -> vector<5x160xf32>
    %90 = arith.maximumf %86, %89 : vector<5x160xf32>
    %c0_96 = arith.constant 0 : index
    %c0_97 = arith.constant 0 : index
    %c0_98 = arith.constant 0 : index
    %91 = vector.load %arg9[%c0_96, %c0_97, %c0_98] : memref<2x160x80xf32, #tpu.memory_space<vmem>>, vector<1x160x80xf32>
    %92 = vector.shape_cast %91 : vector<1x160x80xf32> to vector<160x80xf32>
    %cst_99 = arith.constant dense<0.000000e+00> : vector<5x80xf32>
    %93 = tpu.matmul %90, %92, %cst_99 {dimension_numbers = #tpu.dot_dimension_numbers<[1], [0], [0], [1], [0, 0, 1, 1], [], []>} : vector<5x160xf32>, vector<160x80xf32>, vector<5x80xf32> -> vector<5x80xf32>
    %c1_100 = arith.constant 1 : index
    %c0_101 = arith.constant 0 : index
    %c0_102 = arith.constant 0 : index
    %94 = vector.load %arg9[%c1_100, %c0_101, %c0_102] : memref<2x160x80xf32, #tpu.memory_space<vmem>>, vector<1x160x80xf32>
    %95 = vector.shape_cast %94 : vector<1x160x80xf32> to vector<160x80xf32>
    %cst_103 = arith.constant dense<0.000000e+00> : vector<5x80xf32>
    %96 = tpu.matmul %90, %95, %cst_103 {dimension_numbers = #tpu.dot_dimension_numbers<[1], [0], [0], [1], [0, 0, 1, 1], [], []>} : vector<5x160xf32>, vector<160x80xf32>, vector<5x80xf32> -> vector<5x80xf32>
    %97 = arith.maximumf %93, %96 : vector<5x80xf32>
    %c0_104 = arith.constant 0 : index
    %c0_105 = arith.constant 0 : index
    %98 = vector.load %arg7[%c0_104, %c0_105] : memref<1x80xf32, #tpu.memory_space<vmem>>, vector<1x80xf32>
    %99 = vector.broadcast %98 : vector<1x80xf32> to vector<5x80xf32>
    %100 = arith.addf %97, %99 : vector<5x80xf32>
    %cst_106 = arith.constant 0.000000e+00 : f32
    %101 = vector.broadcast %cst_106 : f32 to vector<5x80xf32>
    %102 = arith.maximumf %100, %101 : vector<5x80xf32>
    %c0_107 = arith.constant 0 : index
    %c0_108 = arith.constant 0 : index
    %c0_109 = arith.constant 0 : index
    %103 = vector.load %arg18[%c0_107, %c0_108, %c0_109] : memref<2x5x80xf32, #tpu.memory_space<vmem>>, vector<1x5x80xf32>
    %104 = vector.shape_cast %103 : vector<1x5x80xf32> to vector<5x80xf32>
    %105 = vector.shape_cast %102 : vector<5x80xf32> to vector<1x5x80xf32>
    tpu.vector_store %arg18[%c0_107, %c0_108, %c0_109], %105 {strides = array<i32>} : memref<2x5x80xf32, #tpu.memory_space<vmem>>, vector<1x5x80xf32>,
    %c0_110 = arith.constant 0 : index
    %c0_111 = arith.constant 0 : index
    %106 = vector.load %arg11[%c0_110, %c0_111] : memref<1x128xf32, #tpu.memory_space<vmem>>, vector<1x128xf32>
    %c0_112 = arith.constant 0 : index
    %c0_113 = arith.constant 0 : index
    %c0_114 = arith.constant 0 : index
    %107 = vector.load %arg18[%c0_112, %c0_113, %c0_114] : memref<2x5x80xf32, #tpu.memory_space<vmem>>, vector<1x1x80xf32>
    %108 = vector.shape_cast %107 : vector<1x1x80xf32> to vector<1x80xf32>
    %c0_115 = arith.constant 0 : index
    %c0_116 = arith.constant 0 : index
    %c0_117 = arith.constant 0 : index
    %109 = vector.load %arg10[%c0_115, %c0_116, %c0_117] : memref<5x80x128xf32, #tpu.memory_space<vmem>>, vector<1x80x128xf32>
    %110 = vector.shape_cast %109 : vector<1x80x128xf32> to vector<80x128xf32>
    %cst_118 = arith.constant dense<0.000000e+00> : vector<1x128xf32>
    %111 = tpu.matmul %108, %110, %cst_118 {dimension_numbers = #tpu.dot_dimension_numbers<[1], [0], [0], [1], [0, 0, 1, 1], [], []>} : vector<1x80xf32>, vector<80x128xf32>, vector<1x128xf32> -> vector<1x128xf32>
    %112 = arith.addf %106, %111 : vector<1x128xf32>
    %c0_119 = arith.constant 0 : index
    %c1_120 = arith.constant 1 : index
    %c0_121 = arith.constant 0 : index
    %113 = vector.load %arg18[%c0_119, %c1_120, %c0_121] : memref<2x5x80xf32, #tpu.memory_space<vmem>>, vector<1x1x80xf32>
    %114 = vector.shape_cast %113 : vector<1x1x80xf32> to vector<1x80xf32>
    %c1_122 = arith.constant 1 : index
    %c0_123 = arith.constant 0 : index
    %c0_124 = arith.constant 0 : index
    %115 = vector.load %arg10[%c1_122, %c0_123, %c0_124] : memref<5x80x128xf32, #tpu.memory_space<vmem>>, vector<1x80x128xf32>
    %116 = vector.shape_cast %115 : vector<1x80x128xf32> to vector<80x128xf32>
    %cst_125 = arith.constant dense<0.000000e+00> : vector<1x128xf32>
    %117 = tpu.matmul %114, %116, %cst_125 {dimension_numbers = #tpu.dot_dimension_numbers<[1], [0], [0], [1], [0, 0, 1, 1], [], []>} : vector<1x80xf32>, vector<80x128xf32>, vector<1x128xf32> -> vector<1x128xf32>
    %118 = arith.addf %112, %117 : vector<1x128xf32>
    %c0_126 = arith.constant 0 : index
    %c2_127 = arith.constant 2 : index
    %c0_128 = arith.constant 0 : index
    %119 = vector.load %arg18[%c0_126, %c2_127, %c0_128] : memref<2x5x80xf32, #tpu.memory_space<vmem>>, vector<1x1x80xf32>
    %120 = vector.shape_cast %119 : vector<1x1x80xf32> to vector<1x80xf32>
    %c2_129 = arith.constant 2 : index
    %c0_130 = arith.constant 0 : index
    %c0_131 = arith.constant 0 : index
    %121 = vector.load %arg10[%c2_129, %c0_130, %c0_131] : memref<5x80x128xf32, #tpu.memory_space<vmem>>, vector<1x80x128xf32>
    %122 = vector.shape_cast %121 : vector<1x80x128xf32> to vector<80x128xf32>
    %cst_132 = arith.constant dense<0.000000e+00> : vector<1x128xf32>
    %123 = tpu.matmul %120, %122, %cst_132 {dimension_numbers = #tpu.dot_dimension_numbers<[1], [0], [0], [1], [0, 0, 1, 1], [], []>} : vector<1x80xf32>, vector<80x128xf32>, vector<1x128xf32> -> vector<1x128xf32>
    %124 = arith.addf %118, %123 : vector<1x128xf32>
    %c0_133 = arith.constant 0 : index
    %c3_134 = arith.constant 3 : index
    %c0_135 = arith.constant 0 : index
    %125 = vector.load %arg18[%c0_133, %c3_134, %c0_135] : memref<2x5x80xf32, #tpu.memory_space<vmem>>, vector<1x1x80xf32>
    %126 = vector.shape_cast %125 : vector<1x1x80xf32> to vector<1x80xf32>
    %c3_136 = arith.constant 3 : index
    %c0_137 = arith.constant 0 : index
    %c0_138 = arith.constant 0 : index
    %127 = vector.load %arg10[%c3_136, %c0_137, %c0_138] : memref<5x80x128xf32, #tpu.memory_space<vmem>>, vector<1x80x128xf32>
    %128 = vector.shape_cast %127 : vector<1x80x128xf32> to vector<80x128xf32>
    %cst_139 = arith.constant dense<0.000000e+00> : vector<1x128xf32>
    %129 = tpu.matmul %126, %128, %cst_139 {dimension_numbers = #tpu.dot_dimension_numbers<[1], [0], [0], [1], [0, 0, 1, 1], [], []>} : vector<1x80xf32>, vector<80x128xf32>, vector<1x128xf32> -> vector<1x128xf32>
    %130 = arith.addf %124, %129 : vector<1x128xf32>
    %c0_140 = arith.constant 0 : index
    %c4_141 = arith.constant 4 : index
    %c0_142 = arith.constant 0 : index
    %131 = vector.load %arg18[%c0_140, %c4_141, %c0_142] : memref<2x5x80xf32, #tpu.memory_space<vmem>>, vector<1x1x80xf32>
    %132 = vector.shape_cast %131 : vector<1x1x80xf32> to vector<1x80xf32>
    %c4_143 = arith.constant 4 : index
    %c0_144 = arith.constant 0 : index
    %c0_145 = arith.constant 0 : index
    %133 = vector.load %arg10[%c4_143, %c0_144, %c0_145] : memref<5x80x128xf32, #tpu.memory_space<vmem>>, vector<1x80x128xf32>
    %134 = vector.shape_cast %133 : vector<1x80x128xf32> to vector<80x128xf32>
    %cst_146 = arith.constant dense<0.000000e+00> : vector<1x128xf32>
    %135 = tpu.matmul %132, %134, %cst_146 {dimension_numbers = #tpu.dot_dimension_numbers<[1], [0], [0], [1], [0, 0, 1, 1], [], []>} : vector<1x80xf32>, vector<80x128xf32>, vector<1x128xf32> -> vector<1x128xf32>
    %136 = arith.addf %130, %135 : vector<1x128xf32>
    %cst_147 = arith.constant 0.000000e+00 : f32
    %137 = vector.broadcast %cst_147 : f32 to vector<1x128xf32>
    %138 = arith.maximumf %136, %137 : vector<1x128xf32>
    %c0_148 = arith.constant 0 : index
    %c0_149 = arith.constant 0 : index
    %139 = vector.load %arg12[%c0_148, %c0_149] : memref<128x128xf32, #tpu.memory_space<vmem>>, vector<128x128xf32>
    %cst_150 = arith.constant dense<0.000000e+00> : vector<1x128xf32>
    %140 = tpu.matmul %138, %139, %cst_150 {dimension_numbers = #tpu.dot_dimension_numbers<[1], [0], [0], [1], [0, 0, 1, 1], [], []>} : vector<1x128xf32>, vector<128x128xf32>, vector<1x128xf32> -> vector<1x128xf32>
    %c0_151 = arith.constant 0 : index
    %c0_152 = arith.constant 0 : index
    %141 = vector.load %arg13[%c0_151, %c0_152] : memref<1x128xf32, #tpu.memory_space<vmem>>, vector<1x128xf32>
    %142 = arith.addf %140, %141 : vector<1x128xf32>
    %cst_153 = arith.constant 0.000000e+00 : f32
    %143 = vector.broadcast %cst_153 : f32 to vector<1x128xf32>
    %144 = arith.maximumf %142, %143 : vector<1x128xf32>
    %c0_154 = arith.constant 0 : index
    %c0_155 = arith.constant 0 : index
    %145 = vector.load %arg14[%c0_154, %c0_155] : memref<128x128xf32, #tpu.memory_space<vmem>>, vector<128x128xf32>
    %cst_156 = arith.constant dense<0.000000e+00> : vector<1x128xf32>
    %146 = tpu.matmul %144, %145, %cst_156 {dimension_numbers = #tpu.dot_dimension_numbers<[1], [0], [0], [1], [0, 0, 1, 1], [], []>} : vector<1x128xf32>, vector<128x128xf32>, vector<1x128xf32> -> vector<1x128xf32>
    %c0_157 = arith.constant 0 : index
    %c0_158 = arith.constant 0 : index
    %147 = vector.load %arg15[%c0_157, %c0_158] : memref<1x128xf32, #tpu.memory_space<vmem>>, vector<1x128xf32>
    %148 = arith.addf %146, %147 : vector<1x128xf32>
    %c0_159 = arith.constant 0 : index
    %c0_160 = arith.constant 0 : index
    %c0_161 = arith.constant 0 : index
    %149 = vector.load %arg16[%c0_159, %c0_160, %c0_161] : memref<2x1x128xf32, #tpu.memory_space<vmem>>, vector<1x1x128xf32>
    %150 = vector.shape_cast %149 : vector<1x1x128xf32> to vector<1x128xf32>
    %151 = vector.shape_cast %148 : vector<1x128xf32> to vector<1x1x128xf32>
    tpu.vector_store %arg16[%c0_159, %c0_160, %c0_161], %151 {strides = array<i32>} : memref<2x1x128xf32, #tpu.memory_space<vmem>>, vector<1x1x128xf32>,
    %cst_162 = arith.constant 0.000000e+00 : f32
    %152 = vector.broadcast %cst_162 : f32 to vector<28x224xf32>
    %c1_163 = arith.constant 1 : index
    %c0_164 = arith.constant 0 : index
    %c0_165 = arith.constant 0 : index
    %153 = vector.load %arg1[%c1_163, %c0_164, %c0_165] : memref<2x32x32xf32, #tpu.memory_space<vmem>>, vector<1x28x32xf32>
    %154 = vector.shape_cast %153 : vector<1x28x32xf32> to vector<28x32xf32>
    %c0_166 = arith.constant 0 : index
    %c0_167 = arith.constant 0 : index
    %c0_168 = arith.constant 0 : index
    %155 = vector.load %arg2[%c0_166, %c0_167, %c0_168] : memref<5x32x224xf32, #tpu.memory_space<vmem>>, vector<1x32x224xf32>
    %156 = vector.shape_cast %155 : vector<1x32x224xf32> to vector<32x224xf32>
    %cst_169 = arith.constant dense<0.000000e+00> : vector<28x224xf32>
    %157 = tpu.matmul %154, %156, %cst_169 {dimension_numbers = #tpu.dot_dimension_numbers<[1], [0], [0], [1], [0, 0, 1, 1], [], []>} : vector<28x32xf32>, vector<32x224xf32>, vector<28x224xf32> -> vector<28x224xf32>
    %158 = arith.addf %152, %157 : vector<28x224xf32>
    %c1_170 = arith.constant 1 : index
    %c1_171 = arith.constant 1 : index
    %c0_172 = arith.constant 0 : index
    %159 = vector.load %arg1[%c1_170, %c1_171, %c0_172] : memref<2x32x32xf32, #tpu.memory_space<vmem>>, vector<1x28x32xf32>
    %160 = vector.shape_cast %159 : vector<1x28x32xf32> to vector<28x32xf32>
    %c1_173 = arith.constant 1 : index
    %c0_174 = arith.constant 0 : index
    %c0_175 = arith.constant 0 : index
    %161 = vector.load %arg2[%c1_173, %c0_174, %c0_175] : memref<5x32x224xf32, #tpu.memory_space<vmem>>, vector<1x32x224xf32>
    %162 = vector.shape_cast %161 : vector<1x32x224xf32> to vector<32x224xf32>
    %cst_176 = arith.constant dense<0.000000e+00> : vector<28x224xf32>
    %163 = tpu.matmul %160, %162, %cst_176 {dimension_numbers = #tpu.dot_dimension_numbers<[1], [0], [0], [1], [0, 0, 1, 1], [], []>} : vector<28x32xf32>, vector<32x224xf32>, vector<28x224xf32> -> vector<28x224xf32>
    %164 = arith.addf %158, %163 : vector<28x224xf32>
    %c1_177 = arith.constant 1 : index
    %c2_178 = arith.constant 2 : index
    %c0_179 = arith.constant 0 : index
    %165 = vector.load %arg1[%c1_177, %c2_178, %c0_179] : memref<2x32x32xf32, #tpu.memory_space<vmem>>, vector<1x28x32xf32>
    %166 = vector.shape_cast %165 : vector<1x28x32xf32> to vector<28x32xf32>
    %c2_180 = arith.constant 2 : index
    %c0_181 = arith.constant 0 : index
    %c0_182 = arith.constant 0 : index
    %167 = vector.load %arg2[%c2_180, %c0_181, %c0_182] : memref<5x32x224xf32, #tpu.memory_space<vmem>>, vector<1x32x224xf32>
    %168 = vector.shape_cast %167 : vector<1x32x224xf32> to vector<32x224xf32>
    %cst_183 = arith.constant dense<0.000000e+00> : vector<28x224xf32>
    %169 = tpu.matmul %166, %168, %cst_183 {dimension_numbers = #tpu.dot_dimension_numbers<[1], [0], [0], [1], [0, 0, 1, 1], [], []>} : vector<28x32xf32>, vector<32x224xf32>, vector<28x224xf32> -> vector<28x224xf32>
    %170 = arith.addf %164, %169 : vector<28x224xf32>
    %c1_184 = arith.constant 1 : index
    %c3_185 = arith.constant 3 : index
    %c0_186 = arith.constant 0 : index
    %171 = vector.load %arg1[%c1_184, %c3_185, %c0_186] : memref<2x32x32xf32, #tpu.memory_space<vmem>>, vector<1x28x32xf32>
    %172 = vector.shape_cast %171 : vector<1x28x32xf32> to vector<28x32xf32>
    %c3_187 = arith.constant 3 : index
    %c0_188 = arith.constant 0 : index
    %c0_189 = arith.constant 0 : index
    %173 = vector.load %arg2[%c3_187, %c0_188, %c0_189] : memref<5x32x224xf32, #tpu.memory_space<vmem>>, vector<1x32x224xf32>
    %174 = vector.shape_cast %173 : vector<1x32x224xf32> to vector<32x224xf32>
    %cst_190 = arith.constant dense<0.000000e+00> : vector<28x224xf32>
    %175 = tpu.matmul %172, %174, %cst_190 {dimension_numbers = #tpu.dot_dimension_numbers<[1], [0], [0], [1], [0, 0, 1, 1], [], []>} : vector<28x32xf32>, vector<32x224xf32>, vector<28x224xf32> -> vector<28x224xf32>
    %176 = arith.addf %170, %175 : vector<28x224xf32>
    %c1_191 = arith.constant 1 : index
    %c4_192 = arith.constant 4 : index
    %c0_193 = arith.constant 0 : index
    %177 = vector.load %arg1[%c1_191, %c4_192, %c0_193] : memref<2x32x32xf32, #tpu.memory_space<vmem>>, vector<1x28x32xf32>
    %178 = vector.shape_cast %177 : vector<1x28x32xf32> to vector<28x32xf32>
    %c4_194 = arith.constant 4 : index
    %c0_195 = arith.constant 0 : index
    %c0_196 = arith.constant 0 : index
    %179 = vector.load %arg2[%c4_194, %c0_195, %c0_196] : memref<5x32x224xf32, #tpu.memory_space<vmem>>, vector<1x32x224xf32>
    %180 = vector.shape_cast %179 : vector<1x32x224xf32> to vector<32x224xf32>
    %cst_197 = arith.constant dense<0.000000e+00> : vector<28x224xf32>
    %181 = tpu.matmul %178, %180, %cst_197 {dimension_numbers = #tpu.dot_dimension_numbers<[1], [0], [0], [1], [0, 0, 1, 1], [], []>} : vector<28x32xf32>, vector<32x224xf32>, vector<28x224xf32> -> vector<28x224xf32>
    %182 = arith.addf %176, %181 : vector<28x224xf32>
    %c0_198 = arith.constant 0 : index
    %c0_199 = arith.constant 0 : index
    %c0_200 = arith.constant 0 : index
    %183 = vector.load %arg4[%c0_198, %c0_199, %c0_200] : memref<2x14x28xf32, #tpu.memory_space<vmem>>, vector<1x14x28xf32>
    %184 = vector.shape_cast %183 : vector<1x14x28xf32> to vector<14x28xf32>
    %cst_201 = arith.constant dense<0.000000e+00> : vector<14x224xf32>
    %185 = tpu.matmul %184, %182, %cst_201 {dimension_numbers = #tpu.dot_dimension_numbers<[1], [0], [0], [1], [0, 0, 1, 1], [], []>} : vector<14x28xf32>, vector<28x224xf32>, vector<14x224xf32> -> vector<14x224xf32>
    %c1_202 = arith.constant 1 : index
    %c0_203 = arith.constant 0 : index
    %c0_204 = arith.constant 0 : index
    %186 = vector.load %arg4[%c1_202, %c0_203, %c0_204] : memref<2x14x28xf32, #tpu.memory_space<vmem>>, vector<1x14x28xf32>
    %187 = vector.shape_cast %186 : vector<1x14x28xf32> to vector<14x28xf32>
    %cst_205 = arith.constant dense<0.000000e+00> : vector<14x224xf32>
    %188 = tpu.matmul %187, %182, %cst_205 {dimension_numbers = #tpu.dot_dimension_numbers<[1], [0], [0], [1], [0, 0, 1, 1], [], []>} : vector<14x28xf32>, vector<28x224xf32>, vector<14x224xf32> -> vector<14x224xf32>
    %189 = arith.maximumf %185, %188 : vector<14x224xf32>
    %c0_206 = arith.constant 0 : index
    %c0_207 = arith.constant 0 : index
    %c0_208 = arith.constant 0 : index
    %190 = vector.load %arg5[%c0_206, %c0_207, %c0_208] : memref<2x224x112xf32, #tpu.memory_space<vmem>>, vector<1x224x112xf32>
    %191 = vector.shape_cast %190 : vector<1x224x112xf32> to vector<224x112xf32>
    %cst_209 = arith.constant dense<0.000000e+00> : vector<14x112xf32>
    %192 = tpu.matmul %189, %191, %cst_209 {dimension_numbers = #tpu.dot_dimension_numbers<[1], [0], [0], [1], [0, 0, 1, 1], [], []>} : vector<14x224xf32>, vector<224x112xf32>, vector<14x112xf32> -> vector<14x112xf32>
    %c1_210 = arith.constant 1 : index
    %c0_211 = arith.constant 0 : index
    %c0_212 = arith.constant 0 : index
    %193 = vector.load %arg5[%c1_210, %c0_211, %c0_212] : memref<2x224x112xf32, #tpu.memory_space<vmem>>, vector<1x224x112xf32>
    %194 = vector.shape_cast %193 : vector<1x224x112xf32> to vector<224x112xf32>
    %cst_213 = arith.constant dense<0.000000e+00> : vector<14x112xf32>
    %195 = tpu.matmul %189, %194, %cst_213 {dimension_numbers = #tpu.dot_dimension_numbers<[1], [0], [0], [1], [0, 0, 1, 1], [], []>} : vector<14x224xf32>, vector<224x112xf32>, vector<14x112xf32> -> vector<14x112xf32>
    %196 = arith.maximumf %192, %195 : vector<14x112xf32>
    %c0_214 = arith.constant 0 : index
    %c0_215 = arith.constant 0 : index
    %197 = vector.load %arg3[%c0_214, %c0_215] : memref<1x112xf32, #tpu.memory_space<vmem>>, vector<1x112xf32>
    %198 = vector.broadcast %197 : vector<1x112xf32> to vector<14x112xf32>
    %199 = arith.addf %196, %198 : vector<14x112xf32>
    %cst_216 = arith.constant 0.000000e+00 : f32
    %200 = vector.broadcast %cst_216 : f32 to vector<14x112xf32>
    %201 = arith.maximumf %199, %200 : vector<14x112xf32>
    %c1_217 = arith.constant 1 : index
    %c0_218 = arith.constant 0 : index
    %c0_219 = arith.constant 0 : index
    %202 = vector.load %arg17[%c1_217, %c0_218, %c0_219] : memref<2x14x112xf32, #tpu.memory_space<vmem>>, vector<1x14x112xf32>
    %203 = vector.shape_cast %202 : vector<1x14x112xf32> to vector<14x112xf32>
    %204 = vector.shape_cast %201 : vector<14x112xf32> to vector<1x14x112xf32>
    tpu.vector_store %arg17[%c1_217, %c0_218, %c0_219], %204 {strides = array<i32>} : memref<2x14x112xf32, #tpu.memory_space<vmem>>, vector<1x14x112xf32>,
    %cst_220 = arith.constant 0.000000e+00 : f32
    %205 = vector.broadcast %cst_220 : f32 to vector<10x160xf32>
    %c1_221 = arith.constant 1 : index
    %c0_222 = arith.constant 0 : index
    %c0_223 = arith.constant 0 : index
    %206 = vector.load %arg17[%c1_221, %c0_222, %c0_223] : memref<2x14x112xf32, #tpu.memory_space<vmem>>, vector<1x10x112xf32>
    %207 = vector.shape_cast %206 : vector<1x10x112xf32> to vector<10x112xf32>
    %c0_224 = arith.constant 0 : index
    %c0_225 = arith.constant 0 : index
    %c0_226 = arith.constant 0 : index
    %208 = vector.load %arg6[%c0_224, %c0_225, %c0_226] : memref<5x112x160xf32, #tpu.memory_space<vmem>>, vector<1x112x160xf32>
    %209 = vector.shape_cast %208 : vector<1x112x160xf32> to vector<112x160xf32>
    %cst_227 = arith.constant dense<0.000000e+00> : vector<10x160xf32>
    %210 = tpu.matmul %207, %209, %cst_227 {dimension_numbers = #tpu.dot_dimension_numbers<[1], [0], [0], [1], [0, 0, 1, 1], [], []>} : vector<10x112xf32>, vector<112x160xf32>, vector<10x160xf32> -> vector<10x160xf32>
    %211 = arith.addf %205, %210 : vector<10x160xf32>
    %c1_228 = arith.constant 1 : index
    %c1_229 = arith.constant 1 : index
    %c0_230 = arith.constant 0 : index
    %212 = vector.load %arg17[%c1_228, %c1_229, %c0_230] : memref<2x14x112xf32, #tpu.memory_space<vmem>>, vector<1x10x112xf32>
    %213 = vector.shape_cast %212 : vector<1x10x112xf32> to vector<10x112xf32>
    %c1_231 = arith.constant 1 : index
    %c0_232 = arith.constant 0 : index
    %c0_233 = arith.constant 0 : index
    %214 = vector.load %arg6[%c1_231, %c0_232, %c0_233] : memref<5x112x160xf32, #tpu.memory_space<vmem>>, vector<1x112x160xf32>
    %215 = vector.shape_cast %214 : vector<1x112x160xf32> to vector<112x160xf32>
    %cst_234 = arith.constant dense<0.000000e+00> : vector<10x160xf32>
    %216 = tpu.matmul %213, %215, %cst_234 {dimension_numbers = #tpu.dot_dimension_numbers<[1], [0], [0], [1], [0, 0, 1, 1], [], []>} : vector<10x112xf32>, vector<112x160xf32>, vector<10x160xf32> -> vector<10x160xf32>
    %217 = arith.addf %211, %216 : vector<10x160xf32>
    %c1_235 = arith.constant 1 : index
    %c2_236 = arith.constant 2 : index
    %c0_237 = arith.constant 0 : index
    %218 = vector.load %arg17[%c1_235, %c2_236, %c0_237] : memref<2x14x112xf32, #tpu.memory_space<vmem>>, vector<1x10x112xf32>
    %219 = vector.shape_cast %218 : vector<1x10x112xf32> to vector<10x112xf32>
    %c2_238 = arith.constant 2 : index
    %c0_239 = arith.constant 0 : index
    %c0_240 = arith.constant 0 : index
    %220 = vector.load %arg6[%c2_238, %c0_239, %c0_240] : memref<5x112x160xf32, #tpu.memory_space<vmem>>, vector<1x112x160xf32>
    %221 = vector.shape_cast %220 : vector<1x112x160xf32> to vector<112x160xf32>
    %cst_241 = arith.constant dense<0.000000e+00> : vector<10x160xf32>
    %222 = tpu.matmul %219, %221, %cst_241 {dimension_numbers = #tpu.dot_dimension_numbers<[1], [0], [0], [1], [0, 0, 1, 1], [], []>} : vector<10x112xf32>, vector<112x160xf32>, vector<10x160xf32> -> vector<10x160xf32>
    %223 = arith.addf %217, %222 : vector<10x160xf32>
    %c1_242 = arith.constant 1 : index
    %c3_243 = arith.constant 3 : index
    %c0_244 = arith.constant 0 : index
    %224 = vector.load %arg17[%c1_242, %c3_243, %c0_244] : memref<2x14x112xf32, #tpu.memory_space<vmem>>, vector<1x10x112xf32>
    %225 = vector.shape_cast %224 : vector<1x10x112xf32> to vector<10x112xf32>
    %c3_245 = arith.constant 3 : index
    %c0_246 = arith.constant 0 : index
    %c0_247 = arith.constant 0 : index
    %226 = vector.load %arg6[%c3_245, %c0_246, %c0_247] : memref<5x112x160xf32, #tpu.memory_space<vmem>>, vector<1x112x160xf32>
    %227 = vector.shape_cast %226 : vector<1x112x160xf32> to vector<112x160xf32>
    %cst_248 = arith.constant dense<0.000000e+00> : vector<10x160xf32>
    %228 = tpu.matmul %225, %227, %cst_248 {dimension_numbers = #tpu.dot_dimension_numbers<[1], [0], [0], [1], [0, 0, 1, 1], [], []>} : vector<10x112xf32>, vector<112x160xf32>, vector<10x160xf32> -> vector<10x160xf32>
    %229 = arith.addf %223, %228 : vector<10x160xf32>
    %c1_249 = arith.constant 1 : index
    %c4_250 = arith.constant 4 : index
    %c0_251 = arith.constant 0 : index
    %230 = vector.load %arg17[%c1_249, %c4_250, %c0_251] : memref<2x14x112xf32, #tpu.memory_space<vmem>>, vector<1x10x112xf32>
    %231 = vector.shape_cast %230 : vector<1x10x112xf32> to vector<10x112xf32>
    %c4_252 = arith.constant 4 : index
    %c0_253 = arith.constant 0 : index
    %c0_254 = arith.constant 0 : index
    %232 = vector.load %arg6[%c4_252, %c0_253, %c0_254] : memref<5x112x160xf32, #tpu.memory_space<vmem>>, vector<1x112x160xf32>
    %233 = vector.shape_cast %232 : vector<1x112x160xf32> to vector<112x160xf32>
    %cst_255 = arith.constant dense<0.000000e+00> : vector<10x160xf32>
    %234 = tpu.matmul %231, %233, %cst_255 {dimension_numbers = #tpu.dot_dimension_numbers<[1], [0], [0], [1], [0, 0, 1, 1], [], []>} : vector<10x112xf32>, vector<112x160xf32>, vector<10x160xf32> -> vector<10x160xf32>
    %235 = arith.addf %229, %234 : vector<10x160xf32>
    %c0_256 = arith.constant 0 : index
    %c0_257 = arith.constant 0 : index
    %c0_258 = arith.constant 0 : index
    %236 = vector.load %arg8[%c0_256, %c0_257, %c0_258] : memref<2x5x10xf32, #tpu.memory_space<vmem>>, vector<1x5x10xf32>
    %237 = vector.shape_cast %236 : vector<1x5x10xf32> to vector<5x10xf32>
    %cst_259 = arith.constant dense<0.000000e+00> : vector<5x160xf32>
    %238 = tpu.matmul %237, %235, %cst_259 {dimension_numbers = #tpu.dot_dimension_numbers<[1], [0], [0], [1], [0, 0, 1, 1], [], []>} : vector<5x10xf32>, vector<10x160xf32>, vector<5x160xf32> -> vector<5x160xf32>
    %c1_260 = arith.constant 1 : index
    %c0_261 = arith.constant 0 : index
    %c0_262 = arith.constant 0 : index
    %239 = vector.load %arg8[%c1_260, %c0_261, %c0_262] : memref<2x5x10xf32, #tpu.memory_space<vmem>>, vector<1x5x10xf32>
    %240 = vector.shape_cast %239 : vector<1x5x10xf32> to vector<5x10xf32>
    %cst_263 = arith.constant dense<0.000000e+00> : vector<5x160xf32>
    %241 = tpu.matmul %240, %235, %cst_263 {dimension_numbers = #tpu.dot_dimension_numbers<[1], [0], [0], [1], [0, 0, 1, 1], [], []>} : vector<5x10xf32>, vector<10x160xf32>, vector<5x160xf32> -> vector<5x160xf32>
    %242 = arith.maximumf %238, %241 : vector<5x160xf32>
    %c0_264 = arith.constant 0 : index
    %c0_265 = arith.constant 0 : index
    %c0_266 = arith.constant 0 : index
    %243 = vector.load %arg9[%c0_264, %c0_265, %c0_266] : memref<2x160x80xf32, #tpu.memory_space<vmem>>, vector<1x160x80xf32>
    %244 = vector.shape_cast %243 : vector<1x160x80xf32> to vector<160x80xf32>
    %cst_267 = arith.constant dense<0.000000e+00> : vector<5x80xf32>
    %245 = tpu.matmul %242, %244, %cst_267 {dimension_numbers = #tpu.dot_dimension_numbers<[1], [0], [0], [1], [0, 0, 1, 1], [], []>} : vector<5x160xf32>, vector<160x80xf32>, vector<5x80xf32> -> vector<5x80xf32>
    %c1_268 = arith.constant 1 : index
    %c0_269 = arith.constant 0 : index
    %c0_270 = arith.constant 0 : index
    %246 = vector.load %arg9[%c1_268, %c0_269, %c0_270] : memref<2x160x80xf32, #tpu.memory_space<vmem>>, vector<1x160x80xf32>
    %247 = vector.shape_cast %246 : vector<1x160x80xf32> to vector<160x80xf32>
    %cst_271 = arith.constant dense<0.000000e+00> : vector<5x80xf32>
    %248 = tpu.matmul %242, %247, %cst_271 {dimension_numbers = #tpu.dot_dimension_numbers<[1], [0], [0], [1], [0, 0, 1, 1], [], []>} : vector<5x160xf32>, vector<160x80xf32>, vector<5x80xf32> -> vector<5x80xf32>
    %249 = arith.maximumf %245, %248 : vector<5x80xf32>
    %c0_272 = arith.constant 0 : index
    %c0_273 = arith.constant 0 : index
    %250 = vector.load %arg7[%c0_272, %c0_273] : memref<1x80xf32, #tpu.memory_space<vmem>>, vector<1x80xf32>
    %251 = vector.broadcast %250 : vector<1x80xf32> to vector<5x80xf32>
    %252 = arith.addf %249, %251 : vector<5x80xf32>
    %cst_274 = arith.constant 0.000000e+00 : f32
    %253 = vector.broadcast %cst_274 : f32 to vector<5x80xf32>
    %254 = arith.maximumf %252, %253 : vector<5x80xf32>
    %c1_275 = arith.constant 1 : index
    %c0_276 = arith.constant 0 : index
    %c0_277 = arith.constant 0 : index
    %255 = vector.load %arg18[%c1_275, %c0_276, %c0_277] : memref<2x5x80xf32, #tpu.memory_space<vmem>>, vector<1x5x80xf32>
    %256 = vector.shape_cast %255 : vector<1x5x80xf32> to vector<5x80xf32>
    %257 = vector.shape_cast %254 : vector<5x80xf32> to vector<1x5x80xf32>
    tpu.vector_store %arg18[%c1_275, %c0_276, %c0_277], %257 {strides = array<i32>} : memref<2x5x80xf32, #tpu.memory_space<vmem>>, vector<1x5x80xf32>,
    %c0_278 = arith.constant 0 : index
    %c0_279 = arith.constant 0 : index
    %258 = vector.load %arg11[%c0_278, %c0_279] : memref<1x128xf32, #tpu.memory_space<vmem>>, vector<1x128xf32>
    %c1_280 = arith.constant 1 : index
    %c0_281 = arith.constant 0 : index
    %c0_282 = arith.constant 0 : index
    %259 = vector.load %arg18[%c1_280, %c0_281, %c0_282] : memref<2x5x80xf32, #tpu.memory_space<vmem>>, vector<1x1x80xf32>
    %260 = vector.shape_cast %259 : vector<1x1x80xf32> to vector<1x80xf32>
    %c0_283 = arith.constant 0 : index
    %c0_284 = arith.constant 0 : index
    %c0_285 = arith.constant 0 : index
    %261 = vector.load %arg10[%c0_283, %c0_284, %c0_285] : memref<5x80x128xf32, #tpu.memory_space<vmem>>, vector<1x80x128xf32>
    %262 = vector.shape_cast %261 : vector<1x80x128xf32> to vector<80x128xf32>
    %cst_286 = arith.constant dense<0.000000e+00> : vector<1x128xf32>
    %263 = tpu.matmul %260, %262, %cst_286 {dimension_numbers = #tpu.dot_dimension_numbers<[1], [0], [0], [1], [0, 0, 1, 1], [], []>} : vector<1x80xf32>, vector<80x128xf32>, vector<1x128xf32> -> vector<1x128xf32>
    %264 = arith.addf %258, %263 : vector<1x128xf32>
    %c1_287 = arith.constant 1 : index
    %c1_288 = arith.constant 1 : index
    %c0_289 = arith.constant 0 : index
    %265 = vector.load %arg18[%c1_287, %c1_288, %c0_289] : memref<2x5x80xf32, #tpu.memory_space<vmem>>, vector<1x1x80xf32>
    %266 = vector.shape_cast %265 : vector<1x1x80xf32> to vector<1x80xf32>
    %c1_290 = arith.constant 1 : index
    %c0_291 = arith.constant 0 : index
    %c0_292 = arith.constant 0 : index
    %267 = vector.load %arg10[%c1_290, %c0_291, %c0_292] : memref<5x80x128xf32, #tpu.memory_space<vmem>>, vector<1x80x128xf32>
    %268 = vector.shape_cast %267 : vector<1x80x128xf32> to vector<80x128xf32>
    %cst_293 = arith.constant dense<0.000000e+00> : vector<1x128xf32>
    %269 = tpu.matmul %266, %268, %cst_293 {dimension_numbers = #tpu.dot_dimension_numbers<[1], [0], [0], [1], [0, 0, 1, 1], [], []>} : vector<1x80xf32>, vector<80x128xf32>, vector<1x128xf32> -> vector<1x128xf32>
    %270 = arith.addf %264, %269 : vector<1x128xf32>
    %c1_294 = arith.constant 1 : index
    %c2_295 = arith.constant 2 : index
    %c0_296 = arith.constant 0 : index
    %271 = vector.load %arg18[%c1_294, %c2_295, %c0_296] : memref<2x5x80xf32, #tpu.memory_space<vmem>>, vector<1x1x80xf32>
    %272 = vector.shape_cast %271 : vector<1x1x80xf32> to vector<1x80xf32>
    %c2_297 = arith.constant 2 : index
    %c0_298 = arith.constant 0 : index
    %c0_299 = arith.constant 0 : index
    %273 = vector.load %arg10[%c2_297, %c0_298, %c0_299] : memref<5x80x128xf32, #tpu.memory_space<vmem>>, vector<1x80x128xf32>
    %274 = vector.shape_cast %273 : vector<1x80x128xf32> to vector<80x128xf32>
    %cst_300 = arith.constant dense<0.000000e+00> : vector<1x128xf32>
    %275 = tpu.matmul %272, %274, %cst_300 {dimension_numbers = #tpu.dot_dimension_numbers<[1], [0], [0], [1], [0, 0, 1, 1], [], []>} : vector<1x80xf32>, vector<80x128xf32>, vector<1x128xf32> -> vector<1x128xf32>
    %276 = arith.addf %270, %275 : vector<1x128xf32>
    %c1_301 = arith.constant 1 : index
    %c3_302 = arith.constant 3 : index
    %c0_303 = arith.constant 0 : index
    %277 = vector.load %arg18[%c1_301, %c3_302, %c0_303] : memref<2x5x80xf32, #tpu.memory_space<vmem>>, vector<1x1x80xf32>
    %278 = vector.shape_cast %277 : vector<1x1x80xf32> to vector<1x80xf32>
    %c3_304 = arith.constant 3 : index
    %c0_305 = arith.constant 0 : index
    %c0_306 = arith.constant 0 : index
    %279 = vector.load %arg10[%c3_304, %c0_305, %c0_306] : memref<5x80x128xf32, #tpu.memory_space<vmem>>, vector<1x80x128xf32>
    %280 = vector.shape_cast %279 : vector<1x80x128xf32> to vector<80x128xf32>
    %cst_307 = arith.constant dense<0.000000e+00> : vector<1x128xf32>
    %281 = tpu.matmul %278, %280, %cst_307 {dimension_numbers = #tpu.dot_dimension_numbers<[1], [0], [0], [1], [0, 0, 1, 1], [], []>} : vector<1x80xf32>, vector<80x128xf32>, vector<1x128xf32> -> vector<1x128xf32>
    %282 = arith.addf %276, %281 : vector<1x128xf32>
    %c1_308 = arith.constant 1 : index
    %c4_309 = arith.constant 4 : index
    %c0_310 = arith.constant 0 : index
    %283 = vector.load %arg18[%c1_308, %c4_309, %c0_310] : memref<2x5x80xf32, #tpu.memory_space<vmem>>, vector<1x1x80xf32>
    %284 = vector.shape_cast %283 : vector<1x1x80xf32> to vector<1x80xf32>
    %c4_311 = arith.constant 4 : index
    %c0_312 = arith.constant 0 : index
    %c0_313 = arith.constant 0 : index
    %285 = vector.load %arg10[%c4_311, %c0_312, %c0_313] : memref<5x80x128xf32, #tpu.memory_space<vmem>>, vector<1x80x128xf32>
    %286 = vector.shape_cast %285 : vector<1x80x128xf32> to vector<80x128xf32>
    %cst_314 = arith.constant dense<0.000000e+00> : vector<1x128xf32>
    %287 = tpu.matmul %284, %286, %cst_314 {dimension_numbers = #tpu.dot_dimension_numbers<[1], [0], [0], [1], [0, 0, 1, 1], [], []>} : vector<1x80xf32>, vector<80x128xf32>, vector<1x128xf32> -> vector<1x128xf32>
    %288 = arith.addf %282, %287 : vector<1x128xf32>
    %cst_315 = arith.constant 0.000000e+00 : f32
    %289 = vector.broadcast %cst_315 : f32 to vector<1x128xf32>
    %290 = arith.maximumf %288, %289 : vector<1x128xf32>
    %c0_316 = arith.constant 0 : index
    %c0_317 = arith.constant 0 : index
    %291 = vector.load %arg12[%c0_316, %c0_317] : memref<128x128xf32, #tpu.memory_space<vmem>>, vector<128x128xf32>
    %cst_318 = arith.constant dense<0.000000e+00> : vector<1x128xf32>
    %292 = tpu.matmul %290, %291, %cst_318 {dimension_numbers = #tpu.dot_dimension_numbers<[1], [0], [0], [1], [0, 0, 1, 1], [], []>} : vector<1x128xf32>, vector<128x128xf32>, vector<1x128xf32> -> vector<1x128xf32>
    %c0_319 = arith.constant 0 : index
    %c0_320 = arith.constant 0 : index
    %293 = vector.load %arg13[%c0_319, %c0_320] : memref<1x128xf32, #tpu.memory_space<vmem>>, vector<1x128xf32>
    %294 = arith.addf %292, %293 : vector<1x128xf32>
    %cst_321 = arith.constant 0.000000e+00 : f32
    %295 = vector.broadcast %cst_321 : f32 to vector<1x128xf32>
    %296 = arith.maximumf %294, %295 : vector<1x128xf32>
    %c0_322 = arith.constant 0 : index
    %c0_323 = arith.constant 0 : index
    %297 = vector.load %arg14[%c0_322, %c0_323] : memref<128x128xf32, #tpu.memory_space<vmem>>, vector<128x128xf32>
    %cst_324 = arith.constant dense<0.000000e+00> : vector<1x128xf32>
    %298 = tpu.matmul %296, %297, %cst_324 {dimension_numbers = #tpu.dot_dimension_numbers<[1], [0], [0], [1], [0, 0, 1, 1], [], []>} : vector<1x128xf32>, vector<128x128xf32>, vector<1x128xf32> -> vector<1x128xf32>
    %c0_325 = arith.constant 0 : index
    %c0_326 = arith.constant 0 : index
    %299 = vector.load %arg15[%c0_325, %c0_326] : memref<1x128xf32, #tpu.memory_space<vmem>>, vector<1x128xf32>
    %300 = arith.addf %298, %299 : vector<1x128xf32>
    %c1_327 = arith.constant 1 : index
    %c0_328 = arith.constant 0 : index
    %c0_329 = arith.constant 0 : index
    %301 = vector.load %arg16[%c1_327, %c0_328, %c0_329] : memref<2x1x128xf32, #tpu.memory_space<vmem>>, vector<1x1x128xf32>
    %302 = vector.shape_cast %301 : vector<1x1x128xf32> to vector<1x128xf32>
    %303 = vector.shape_cast %300 : vector<1x128xf32> to vector<1x1x128xf32>
    tpu.vector_store %arg16[%c1_327, %c0_328, %c0_329], %303 {strides = array<i32>} : memref<2x1x128xf32, #tpu.memory_space<vmem>>, vector<1x1x128xf32>,
    return
  }
  func.func @transform_0(%arg0: i32) -> (i32, i32, i32) {
    %c0_i32 = arith.constant 0 : i32
    %c0_i32_0 = arith.constant 0 : i32
    %c0_i32_1 = arith.constant 0 : i32
    return %arg0, %c0_i32, %c0_i32_0 : i32, i32, i32
  }
  func.func @transform_1(%arg0: i32) -> (i32, i32, i32) {
    %c0_i32 = arith.constant 0 : i32
    %c0_i32_0 = arith.constant 0 : i32
    %c0_i32_1 = arith.constant 0 : i32
    %c0_i32_2 = arith.constant 0 : i32
    return %c0_i32, %c0_i32_0, %c0_i32_1 : i32, i32, i32
  }
  func.func @transform_2(%arg0: i32) -> (i32, i32) {
    %c0_i32 = arith.constant 0 : i32
    %c0_i32_0 = arith.constant 0 : i32
    %c0_i32_1 = arith.constant 0 : i32
    return %c0_i32, %c0_i32_0 : i32, i32
  }
  func.func @transform_3(%arg0: i32) -> (i32, i32, i32) {
    %c0_i32 = arith.constant 0 : i32
    %c0_i32_0 = arith.constant 0 : i32
    %c0_i32_1 = arith.constant 0 : i32
    %c0_i32_2 = arith.constant 0 : i32
    return %c0_i32, %c0_i32_0, %c0_i32_1 : i32, i32, i32
  }
  func.func @transform_4(%arg0: i32) -> (i32, i32, i32) {
    %c0_i32 = arith.constant 0 : i32
    %c0_i32_0 = arith.constant 0 : i32
    %c0_i32_1 = arith.constant 0 : i32
    %c0_i32_2 = arith.constant 0 : i32
    return %c0_i32, %c0_i32_0, %c0_i32_1 : i32, i32, i32
  }
  func.func @transform_5(%arg0: i32) -> (i32, i32, i32) {
    %c0_i32 = arith.constant 0 : i32
    %c0_i32_0 = arith.constant 0 : i32
    %c0_i32_1 = arith.constant 0 : i32
    %c0_i32_2 = arith.constant 0 : i32
    return %c0_i32, %c0_i32_0, %c0_i32_1 : i32, i32, i32
  }
  func.func @transform_6(%arg0: i32) -> (i32, i32) {
    %c0_i32 = arith.constant 0 : i32
    %c0_i32_0 = arith.constant 0 : i32
    %c0_i32_1 = arith.constant 0 : i32
    return %c0_i32, %c0_i32_0 : i32, i32
  }
  func.func @transform_7(%arg0: i32) -> (i32, i32, i32) {
    %c0_i32 = arith.constant 0 : i32
    %c0_i32_0 = arith.constant 0 : i32
    %c0_i32_1 = arith.constant 0 : i32
    %c0_i32_2 = arith.constant 0 : i32
    return %c0_i32, %c0_i32_0, %c0_i32_1 : i32, i32, i32
  }
  func.func @transform_8(%arg0: i32) -> (i32, i32, i32) {
    %c0_i32 = arith.constant 0 : i32
    %c0_i32_0 = arith.constant 0 : i32
    %c0_i32_1 = arith.constant 0 : i32
    %c0_i32_2 = arith.constant 0 : i32
    return %c0_i32, %c0_i32_0, %c0_i32_1 : i32, i32, i32
  }
  func.func @transform_9(%arg0: i32) -> (i32, i32, i32) {
    %c0_i32 = arith.constant 0 : i32
    %c0_i32_0 = arith.constant 0 : i32
    %c0_i32_1 = arith.constant 0 : i32
    %c0_i32_2 = arith.constant 0 : i32
    return %c0_i32, %c0_i32_0, %c0_i32_1 : i32, i32, i32
  }
  func.func @transform_10(%arg0: i32) -> (i32, i32) {
    %c0_i32 = arith.constant 0 : i32
    %c0_i32_0 = arith.constant 0 : i32
    %c0_i32_1 = arith.constant 0 : i32
    return %c0_i32, %c0_i32_0 : i32, i32
  }
  func.func @transform_11(%arg0: i32) -> (i32, i32) {
    %c0_i32 = arith.constant 0 : i32
    %c0_i32_0 = arith.constant 0 : i32
    %c0_i32_1 = arith.constant 0 : i32
    return %c0_i32, %c0_i32_0 : i32, i32
  }
  func.func @transform_12(%arg0: i32) -> (i32, i32) {
    %c0_i32 = arith.constant 0 : i32
    %c0_i32_0 = arith.constant 0 : i32
    %c0_i32_1 = arith.constant 0 : i32
    return %c0_i32, %c0_i32_0 : i32, i32
  }
  func.func @transform_13(%arg0: i32) -> (i32, i32) {
    %c0_i32 = arith.constant 0 : i32
    %c0_i32_0 = arith.constant 0 : i32
    %c0_i32_1 = arith.constant 0 : i32
    return %c0_i32, %c0_i32_0 : i32, i32
  }
  func.func @transform_14(%arg0: i32) -> (i32, i32) {
    %c0_i32 = arith.constant 0 : i32
    %c0_i32_0 = arith.constant 0 : i32
    %c0_i32_1 = arith.constant 0 : i32
    return %c0_i32, %c0_i32_0 : i32, i32
  }
  func.func @transform_15(%arg0: i32) -> (i32, i32, i32) {
    %c0_i32 = arith.constant 0 : i32
    %c0_i32_0 = arith.constant 0 : i32
    %c0_i32_1 = arith.constant 0 : i32
    return %arg0, %c0_i32, %c0_i32_0 : i32, i32, i32
  }
}

</mosaic_0001>

<bundles_post_ra>
// kernel: lenet5_forward.1
= control target key start
LH: loop header
LB: loop body
LE: loop exit
PB: predicated region body
PF: predicated region fallthrough
CT: control target
= control target key end

     0   :  { %vm76_vm0 = vcmask 261120   ;;  %v6332_v18 = vmov 0.0   ;;  %s9326_s0 = inlined_call_operand.vmem [shape: f32[2,32,32], index: 0, kind: input, shape index: {}]   ;;  %s9327_s1 = inlined_call_operand.vmem [shape: f32[5,32,224], index: 1, kind: input, shape index: {}]   ;;  %s9328_s2 = inlined_call_operand.vmem [shape: f32[1,112], index: 2, kind: input, shape index: {}]   ;;  %s9329_s3 = inlined_call_operand.vmem [shape: f32[2,14,28], index: 3, kind: input, shape index: {}]   ;;  %s9330_s4 = inlined_call_operand.vmem [shape: f32[2,224,112], index: 4, kind: input, shape index: {}]   ;;  %s9331_s5 = inlined_call_operand.vmem [shape: f32[5,112,160], index: 5, kind: input, shape index: {}]   ;;  %s9332_s6 = inlined_call_operand.vmem [shape: f32[1,80], index: 6, kind: input, shape index: {}]   ;;  %s9333_s7 = inlined_call_operand.vmem [shape: f32[2,5,10], index: 7, kind: input, shape index: {}]   ;;  %s9334_s8 = inlined_call_operand.vmem [shape: f32[2,160,80], index: 8, kind: input, shape index: {}]   ;;  %s9335_s9 = inlined_call_operand.vmem [shape: f32[5,80,128], index: 9, kind: input, shape index: {}]   ;;  %s9336_s10 = inlined_call_operand.vmem [shape: f32[1,128], index: 10, kind: input, shape index: {}]   ;;  %s9337_s11 = inlined_call_operand.vmem [shape: f32[128,128], index: 11, kind: input, shape index: {}]   ;;  %s9338_s12 = inlined_call_operand.vmem [shape: f32[1,128], index: 12, kind: input, shape index: {}]   ;;  %s9339_s13 = inlined_call_operand.vmem [shape: f32[128,128], index: 13, kind: input, shape index: {}]   ;;  %s9340_s14 = inlined_call_operand.vmem [shape: f32[1,128], index: 14, kind: input, shape index: {}]   ;;  %s9341_s15 = inlined_call_operand.hbm [shape: f32[2,1,128], index: 15, kind: output, shape index: {}]  }
   0x1   :  { %v5160_v0 = vld [vmem:[%s9327_s1 + $0x78] sm:$0xff]  ;;  %v5159_v2 = vld [vmem:[%s9327_s1 + $0x70] sm:$0xff]  ;;  %v5158_v4 = vld [vmem:[%s9327_s1 + $0x68] sm:$0xff]  ;;  %153 = vmatprep.mubr.f32.mxu0 %v6332_v18  ;;  %254 = vmatprep.mubr.f32.mxu1 %v6332_v18 }
   0x2   :  { %v62_v1 = vld [vmem:[%s9327_s1 + $0x38] sm:$0xff]  ;;  %113 = vmatprep.subr.mxu0 %v5160_v0  ;;  %v61_v3 = vld [vmem:[%s9327_s1 + $0x30] sm:$0xff]  ;;  %v60_v5 = vld [vmem:[%s9327_s1 + $0x28] sm:$0xff] }
   0x3   :  { %214 = vmatprep.subr.mxu1 %v62_v1  ;;  %114 = vmatpush1.msra.mxu0 %v5159_v2  ;;  %v5157_v6 = vld [vmem:[%s9327_s1 + $0x60] sm:$0xff]  ;;  %v5156_v8 = vld [vmem:[%s9327_s1 + $0x58] sm:$0xff]  ;;  %v5155_v10 = vld [vmem:[%s9327_s1 + $0x50] sm:$0xff] }
   0x4   :  { %215 = vmatpush1.msra.mxu1 %v61_v3  ;;  %v59_v7 = vld [vmem:[%s9327_s1 + $0x20] sm:$0xff]  ;;  %115 = vmatprep.subr.mxu0 %v5158_v4  ;;  %v58_v9 = vld [vmem:[%s9327_s1 + $0x18] sm:$0xff]  ;;  %v57_v11 = vld [vmem:[%s9327_s1 + $0x10] sm:$0xff] }
   0x5   :  { %216 = vmatprep.subr.mxu1 %v60_v5  ;;  %116 = vmatpush1.msra.mxu0 %v5157_v6  ;;  %v5154_v12 = vld [vmem:[%s9327_s1 + $0x48] sm:$0xff]  ;;  %v5153_v14 = vld [vmem:[%s9327_s1 + $0x40] sm:$0xff]  ;;  %v5176_v19 = vld [vmem:[%s9327_s1 + $0xb8] sm:$0xff] }
   0x6   :  { %217 = vmatpush1.msra.mxu1 %v59_v7  ;;  %v56_v13 = vld [vmem:[%s9327_s1 + $0x8] sm:$0xff]  ;;  %117 = vmatprep.subr.mxu0 %v5156_v8  ;;  %v55_v15 = vld [vmem:[%s9327_s1] sm:$0xff]  ;;  %v5188_v20 = vld [vmem:[%s9327_s1 + $0xf8] sm:$0xff] }
   0x7   :  { %218 = vmatprep.subr.mxu1 %v58_v9  ;;  %118 = vmatpush1.msra.mxu0 %v5155_v10  ;;  %v63_v16 = vld [vmem:[%s9326_s0 + $0x1] sm:$0xff]  ;;  %v5175_v21 = vld [vmem:[%s9327_s1 + $0xb0] sm:$0xff]  ;;  %v5172_v31 = vld [vmem:[%s9327_s1 + $0x98] sm:$0xff] }
   0x8   :  { %219 = vmatpush1.msra.mxu1 %v57_v11  ;;  %119 = vmatprep.subr.mxu0 %v5154_v12  ;;  %v51_v17 = vld [vmem:[%s9326_s0] sm:$0xff]  ;;  %v5187_v22 = vld [vmem:[%s9327_s1 + $0xf0] sm:$0xff]  ;;  %v52_v24 = vld [vmem:[%s9326_s0 + $0x8] sm:$0xff] }
   0x9   :  { %220 = vmatprep.subr.mxu1 %v56_v13  ;;  %120 = vmatpush1.msra.mxu0 %v5153_v14  ;;  %v64_v23 = vld [vmem:[%s9326_s0 + $0x9] sm:$0xff]  ;;  %v5173_v27 = vld [vmem:[%s9327_s1 + $0xa0] sm:$0xff]  ;;  %v65_v29 = vld [vmem:[%s9326_s0 + $0x11] sm:$0xff] }
   0xa   :  { %221 = vmatpush1.msra.mxu1 %v55_v15  ;;  %5161 = vmatmul.mubr.msk.f32.vlgmr.msra.gmra.mxu0 %vm76_vm0, %v63_v16  ;;  %v5174_v25 = vld [vmem:[%s9327_s1 + $0xa8] sm:$0xff]  ;;  %v5185_v28 = vld [vmem:[%s9327_s1 + $0xe0] sm:$0xff]  ;;  %v53_v30 = vld [vmem:[%s9326_s0 + $0x10] sm:$0xff] }
   0xb   :  { %5165 = vmatmul.mubr.msk.f32.vlgmr.msra.gmra.mxu1 %vm76_vm0, %v51_v17  ;;  %159 = vmatprep.mubr.f32.mxu0 %v6332_v18  ;;  %v5186_v26 = vld [vmem:[%s9327_s1 + $0xe8] sm:$0xff]  ;;  %v5184_v32 = vld [vmem:[%s9327_s1 + $0xd8] sm:$0xff]  ;;  %v5171_v33 = vld [vmem:[%s9327_s1 + $0x90] sm:$0xff] }
   0xc   :  { %260 = vmatprep.mubr.f32.mxu1 %v6332_v18  ;;  %328 = vmatprep.subr.mxu0 %v5176_v19  ;;  %v5183_v34 = vld [vmem:[%s9327_s1 + $0xd0] sm:$0xff]  ;;  %v66_v35 = vld [vmem:[%s9326_s0 + $0x19] sm:$0xf]  ;;  %v5170_v37 = vld [vmem:[%s9327_s1 + $0x88] sm:$0xff] }
   0xd   :  { %450 = vmatprep.subr.mxu1 %v5188_v20  ;;  %329 = vmatpush1.msra.mxu0 %v5175_v21  ;;  %v54_v36 = vld [vmem:[%s9326_s0 + $0x18] sm:$0xf] }
   0xe   :  { %451 = vmatpush1.msra.mxu1 %v5187_v22  ;;  %5162 = vmatmul.mubr.msk.f32.gmra.mxu0 %vm76_vm0, %v64_v23 }
   0xf   :  { %5166 = vmatmul.mubr.msk.f32.gmra.mxu1 %vm76_vm0, %v52_v24  ;;  %165 = vmatprep.mubr.f32.mxu0 %v6332_v18 }
  0x10   :  { %266 = vmatprep.mubr.f32.mxu1 %v6332_v18  ;;  %330 = vmatprep.subr.mxu0 %v5174_v25 }
  0x11   :  { %452 = vmatprep.subr.mxu1 %v5186_v26  ;;  %331 = vmatpush1.msra.mxu0 %v5173_v27 }
  0x12   :  { %453 = vmatpush1.msra.mxu1 %v5185_v28  ;;  %5163 = vmatmul.mubr.msk.f32.gmra.mxu0 %vm76_vm0, %v65_v29 }
  0x13   :  { %5167 = vmatmul.mubr.msk.f32.gmra.mxu1 %vm76_vm0, %v53_v30  ;;  %171 = vmatprep.mubr.f32.mxu0 %v6332_v18 }
  0x14   :  { %272 = vmatprep.mubr.f32.mxu1 %v6332_v18  ;;  %332 = vmatprep.subr.mxu0 %v5172_v31 }
  0x15   :  { %454 = vmatprep.subr.mxu1 %v5184_v32 }
  0x16   :  { %20 = vsyncpa [#allocation5], 0  ;;  %333 = vmatpush1.msra.mxu0 %v5171_v33  ;;  %v5169_v38 = vld [vmem:[%s9327_s1 + $0x80] sm:$0xff]  ;;  %455 = vmatpush1.msra.mxu1 %v5183_v34  ;;  %v5182_v39 = vld [vmem:[%s9327_s1 + $0xc8] sm:$0xff]  ;;  %vm654_vm1 = vcmask 1043456   ;;  %vm647_vm2 = vcmask 228352  }
  0x17   :  { %5164 = vmatmul.mubr.msk.f32.gmra.mxu0 %vm76_vm0, %v66_v35  ;;  %5168 = vmatmul.mubr.msk.f32.gmra.mxu1 %vm76_vm0, %v54_v36  ;;  %v5181_v40 = vld [vmem:[%s9327_s1 + $0xc0] sm:$0xff]  ;;  %v5200_v43 = vld [vmem:[%s9327_s1 + $0x138] sm:$0xff]  ;;  %v5199_v44 = vld [vmem:[%s9327_s1 + $0x130] sm:$0xff]  ;;  %vm856_vm3 = vcmask 785408   ;;  %vm1055_vm4 = vcmask 916480   ;;  %vm1057_vm5 = vcmask 914432  }
  0x18   :  { %334 = vmatprep.subr.mxu0 %v5170_v37  ;;  %368 = vmatprep.mubr.f32.mxu0 %v6332_v18  ;;  %v279_v41 = vld [vmem:[%s9326_s0 + $0x2] sm:$0xff]  ;;  %v280_v45 = vld [vmem:[%s9326_s0 + $0xa] sm:$0xff]  ;;  %v281_v49 = vld [vmem:[%s9326_s0 + $0x12] sm:$0xff]  ;;  %vm1645_vm6 = vcmask 1041408   ;;  %vm1641_vm7 = vcmask 80896   ;;  %vm6333_vm8 = vmmov 0  }
  0x19   :  { %v401_v42 = vld [vmem:[%s9326_s0 + $0x3] sm:$0xff]  ;;  %335 = vmatpush1.msra.mxu0 %v5169_v38  ;;  %456 = vmatprep.subr.mxu1 %v5182_v39  ;;  %v402_v46 = vld [vmem:[%s9326_s0 + $0xb] sm:$0xff]  ;;  %v403_v50 = vld [vmem:[%s9326_s0 + $0x13] sm:$0xff]  ;;  %vm1995_vm9 = vcmask 651264   ;;  %vm2009_vm10 = vcmask 654336  }
  0x1a   :  { %457 = vmatpush1.msra.mxu1 %v5181_v40  ;;  %490 = vmatprep.mubr.f32.mxu1 %v6332_v18  ;;  %v5198_v47 = vld [vmem:[%s9327_s1 + $0x128] sm:$0xff]  ;;  %v5197_v48 = vld [vmem:[%s9327_s1 + $0x120] sm:$0xff]  ;;  %v5196_v51 = vld [vmem:[%s9327_s1 + $0x118] sm:$0xff] }
  0x1b   :  { %5177 = vmatmul.mubr.msk.f32.vlgmr.msra.gmra.mxu0 %vm76_vm0, %v279_v41  ;;  %5189 = vmatmul.mubr.msk.f32.vlgmr.msra.gmra.mxu1 %vm76_vm0, %v401_v42  ;;  %v5195_v52 = vld [vmem:[%s9327_s1 + $0x110] sm:$0xff]  ;;  %v5194_v53 = vld [vmem:[%s9327_s1 + $0x108] sm:$0xff]  ;;  %v282_v54 = vld [vmem:[%s9326_s0 + $0x1a] sm:$0xf] }
  0x1c   :  { %374 = vmatprep.mubr.f32.mxu0 %v6332_v18  ;;  %496 = vmatprep.mubr.f32.mxu1 %v6332_v18  ;;  %v404_v55 = vld [vmem:[%s9326_s0 + $0x1b] sm:$0xf]  ;;  %v5193_v56 = vld [vmem:[%s9327_s1 + $0x100] sm:$0xff]  ;;  %v524_v58 = vld [vmem:[%s9326_s0 + $0xc] sm:$0xff] }
  0x1d   :  { %572 = vmatprep.subr.mxu0 %v5200_v43  ;;  %v523_v57 = vld [vmem:[%s9326_s0 + $0x4] sm:$0xff]  ;;  %v525_v59 = vld [vmem:[%s9326_s0 + $0x14] sm:$0xff]  ;;  %v526_v60 = vld [vmem:[%s9326_s0 + $0x1c] sm:$0xf] }
  0x1e   :  { %573 = vmatpush1.msra.mxu0 %v5199_v44  ;;  %v843_v61 = vld [vmem:[%s9330_s4 + $0x78] sm:$0xff]  ;;  %v842_v62 = vld [vmem:[%s9330_s4 + $0x70] sm:$0xff]  ;;  %v841_v63 = vld [vmem:[%s9330_s4 + $0x68] sm:$0xff] }
  0x1f   :  { %5178 = vmatmul.mubr.msk.f32.gmra.mxu0 %vm76_vm0, %v280_v45  ;;  %5190 = vmatmul.mubr.msk.f32.gmra.mxu1 %vm76_vm0, %v402_v46  ;;  %v840_v0 = vld [vmem:[%s9330_s4 + $0x60] sm:$0xff]  ;;  %v839_v1 = vld [vmem:[%s9330_s4 + $0x58] sm:$0xff]  ;;  %v838_v2 = vld [vmem:[%s9330_s4 + $0x50] sm:$0xff] }
  0x20   :  { %380 = vmatprep.mubr.f32.mxu0 %v6332_v18  ;;  %502 = vmatprep.mubr.f32.mxu1 %v6332_v18  ;;  %v837_v3 = vld [vmem:[%s9330_s4 + $0x48] sm:$0xff]  ;;  %v836_v4 = vld [vmem:[%s9330_s4 + $0x40] sm:$0xff]  ;;  %v835_v5 = vld [vmem:[%s9330_s4 + $0x38] sm:$0xff] }
  0x21   :  { %574 = vmatprep.subr.mxu0 %v5198_v47  ;;  %v834_v6 = vld [vmem:[%s9330_s4 + $0x30] sm:$0xff]  ;;  %v833_v7 = vld [vmem:[%s9330_s4 + $0x28] sm:$0xff]  ;;  %v832_v8 = vld [vmem:[%s9330_s4 + $0x20] sm:$0xff] }
  0x22   :  { %575 = vmatpush1.msra.mxu0 %v5197_v48  ;;  %v831_v9 = vld [vmem:[%s9330_s4 + $0x18] sm:$0xff]  ;;  %v830_v10 = vld [vmem:[%s9330_s4 + $0x10] sm:$0xff]  ;;  %v829_v11 = vld [vmem:[%s9330_s4 + $0x8] sm:$0xff] }
  0x23   :  { %5179 = vmatmul.mubr.msk.f32.gmra.mxu0 %vm76_vm0, %v281_v49  ;;  %5191 = vmatmul.mubr.msk.f32.gmra.mxu1 %vm76_vm0, %v403_v50  ;;  %v828_v12 = vld [vmem:[%s9330_s4] sm:$0xff]  ;;  %v855_v13 = vld [vmem:[%s9330_s4 + $0xd8] sm:$0xff]  ;;  %v854_v14 = vld [vmem:[%s9330_s4 + $0xd0] sm:$0xff] }
  0x24   :  { %386 = vmatprep.mubr.f32.mxu0 %v6332_v18  ;;  %576 = vmatprep.subr.mxu0 %v5196_v51  ;;  %v853_v15 = vld [vmem:[%s9330_s4 + $0xc8] sm:$0xff]  ;;  %v852_v16 = vld [vmem:[%s9330_s4 + $0xc0] sm:$0xff]  ;;  %v851_v17 = vld [vmem:[%s9330_s4 + $0xb8] sm:$0xff] }
  0x25   :  { %508 = vmatprep.mubr.f32.mxu1 %v6332_v18  ;;  %577 = vmatpush1.msra.mxu0 %v5195_v52 }
  0x26   :  { %578 = vmatprep.subr.mxu0 %v5194_v53 }
  0x27   :  { %5180 = vmatmul.mubr.msk.f32.gmra.mxu0 %vm76_vm0, %v282_v54  ;;  %5192 = vmatmul.mubr.msk.f32.gmra.mxu1 %vm76_vm0, %v404_v55 }
  0x28   :  { %579 = vmatpush1.msra.mxu0 %v5193_v56  ;;  %612 = vmatprep.mubr.f32.mxu0 %v6332_v18 }
  0x29   :  { %725 = vmatprep.mubr.f32.mxu1 %v6332_v18  ;;  %863 = vmatprep.subr.mxu0 %v6332_v18 }
  0x2b   :  { %5201 = vmatmul.mubr.msk.f32.vlgmr.msra.gmra.mxu0 %vm76_vm0, %v523_v57 }
  0x2c   :  { %618 = vmatprep.mubr.f32.mxu0 %v6332_v18  ;;  %864 = vmatpush1.msra.mxu0 %v843_v61 }
  0x2d   :  { %865 = vmatprep.subr.mxu0 %v6332_v18 }
  0x2e   :  { %866 = vmatpush1.msra.mxu0 %v842_v62 }
  0x2f   :  { %5202 = vmatmul.mubr.msk.f32.gmra.mxu0 %vm76_vm0, %v524_v58  ;;  %867 = vmatprep.subr.mxu0 %v6332_v18 }
  0x30   :  { %624 = vmatprep.mubr.f32.mxu0 %v6332_v18  ;;  %868 = vmatpush1.msra.mxu0 %v841_v63 }
  0x31   :  { %869 = vmatprep.subr.mxu0 %v6332_v18 }
  0x32   :  { %870 = vmatpush1.msra.mxu0 %v840_v0 }
  0x33   :  { %5203 = vmatmul.mubr.msk.f32.gmra.mxu0 %vm76_vm0, %v525_v59  ;;  %871 = vmatprep.subr.mxu0 %v6332_v18 }
  0x34   :  { %630 = vmatprep.mubr.f32.mxu0 %v6332_v18  ;;  %872 = vmatpush1.msra.mxu0 %v839_v1 }
  0x35   :  { %873 = vmatprep.subr.mxu0 %v6332_v18 }
  0x36   :  { %874 = vmatpush1.msra.mxu0 %v838_v2 }
  0x37   :  { %5204 = vmatmul.mubr.msk.f32.gmra.mxu0 %vm76_vm0, %v526_v60  ;;  %875 = vmatprep.subr.mxu0 %v6332_v18 }
  0x38   :  { %876 = vmatpush1.msra.mxu0 %v837_v3 }
  0x39   :  { %877 = vmatprep.subr.mxu0 %v6332_v18 }
  0x3a   :  { %878 = vmatpush1.msra.mxu0 %v836_v4 }
  0x3b   :  { %879 = vmatprep.subr.mxu0 %v6332_v18 }
  0x3c   :  { %880 = vmatpush1.msra.mxu0 %v835_v5 }
  0x3d   :  { %881 = vmatprep.subr.mxu0 %v6332_v18 }
  0x3e   :  { %882 = vmatpush1.msra.mxu0 %v834_v6 }
  0x3f   :  { %883 = vmatprep.subr.mxu0 %v6332_v18 }
  0x40   :  { %884 = vmatpush1.msra.mxu0 %v833_v7 }
  0x41   :  { %885 = vmatprep.subr.mxu0 %v6332_v18 }
  0x42   :  { %886 = vmatpush1.msra.mxu0 %v832_v8 }
  0x43   :  { %887 = vmatprep.subr.mxu0 %v6332_v18 }
  0x44   :  { %888 = vmatpush1.msra.mxu0 %v831_v9 }
  0x45   :  { %889 = vmatprep.subr.mxu0 %v6332_v18 }
  0x46   :  { %890 = vmatpush1.msra.mxu0 %v830_v10 }
  0x47   :  { %891 = vmatprep.subr.mxu0 %v6332_v18 }
  0x48   :  { %892 = vmatpush1.msra.mxu0 %v829_v11 }
  0x49   :  { %893 = vmatprep.subr.mxu0 %v6332_v18 }
  0x4a   :  { %894 = vmatpush1.msra.mxu0 %v828_v12 }
  0x4b   :  { %903 = vmatprep.subr.mxu0 %v6332_v18 }
  0x4c   :  { %904 = vmatpush2.msra.mxu0 %v855_v13 }
  0x4d   :  { %905 = vmatprep.subr.mxu0 %v6332_v18 }
  0x4e   :  { %906 = vmatpush2.msra.mxu0 %v854_v14 }
  0x4f   :  { %907 = vmatprep.subr.mxu0 %v6332_v18 }
  0x50   :  { %908 = vmatpush2.msra.mxu0 %v853_v15 }
  0x51   :  { %909 = vmatprep.subr.mxu0 %v6332_v18 }
  0x52   :  { %910 = vmatpush2.msra.mxu0 %v852_v16 }
  0x53   :  { %911 = vmatprep.subr.mxu0 %v6332_v18 }
  0x54   :  { %912 = vmatpush2.msra.mxu0 %v851_v17 }
  0x55   :  { %913 = vmatprep.subr.mxu0 %v6332_v18 }
  0xca   :  { %v155_v19 = vpop.f32.mrf.mxu0 }
  0xcb   :  { %v256_v20 = vpop.f32.mrf.mxu1 }
  0xcc   :  { %v157_v21 = vpop.f32.mrf.mxu0  ;;  %v257_v7 = vadd.f32 %v256_v20, %v155_v19 }
  0xcd   :  { %v258_v22 = vpop.f32.mrf.mxu1 }
  0xce   :  { %v161_v23 = vpop.f32.mrf.mxu0  ;;  %v259_v4 = vadd.f32 %v258_v22, %v157_v21 }
  0xcf   :  { %v262_v24 = vpop.f32.mrf.mxu1 }
  0xd0   :  { %v163_v25 = vpop.f32.mrf.mxu0  ;;  %v263_v1 = vadd.f32 %v262_v24, %v161_v23 }
  0xd1   :  { %v264_v26 = vpop.f32.mrf.mxu1 }
  0xd2   :  { %v167_v27 = vpop.f32.mrf.mxu0  ;;  %v265_v63 = vadd.f32 %v264_v26, %v163_v25 }
  0xd3   :  { %v268_v28 = vpop.f32.mrf.mxu1 }
  0xd4   :  { %v169_v29 = vpop.f32.mrf.mxu0  ;;  %v269_v59 = vadd.f32 %v268_v28, %v167_v27  ;;  %v645_v28 = vld [vmem:[%s9329_s3] sm:$0xff] }
  0xd5   :  { %v270_v30 = vpop.f32.mrf.mxu1 }
  0xd6   :  { %v271_v57 = vadd.f32 %v270_v30, %v169_v29  ;;  %v646_v29 = vld [vmem:[%s9329_s3 + $0x8] sm:$0x3f]  ;;  %v5209_v30 = vld [vmem:[%s9329_s3 + $0x10] sm:$0xff] }
  0xd7   :  { %v173_v31 = vpop.f32.mrf.mxu0  ;;  %v274_v32 = vpop.f32.mrf.mxu1 }
  0xd8   :  { %v275_v55 = vadd.f32 %v274_v32, %v173_v31  ;;  %v5232_v31 = vld [vmem:[%s9330_s4 + $0x158] sm:$0xff]  ;;  %v5231_v32 = vld [vmem:[%s9330_s4 + $0x150] sm:$0xff] }
  0xd9   :  { %v175_v33 = vpop.f32.mrf.mxu0  ;;  %v276_v34 = vpop.f32.mrf.mxu1 }
  0xda   :  { %v277_v54 = vadd.f32 %v276_v34, %v175_v33  ;;  %v5210_v33 = vld [vmem:[%s9329_s3 + $0x18] sm:$0x3f]  ;;  %v5230_v34 = vld [vmem:[%s9330_s4 + $0x148] sm:$0xff] }
  0xdb   :  { %v370_v35 = vpop.f32.mrf.mxu0  ;;  %v492_v36 = vpop.f32.mrf.mxu1 }
  0xdc   :  { %v393_v14 = vadd.f32 %v370_v35, %v257_v7  ;;  %v5229_v35 = vld [vmem:[%s9330_s4 + $0x140] sm:$0xff] }
  0xdd   :  { %v372_v37 = vpop.f32.mrf.mxu0  ;;  %v494_v38 = vpop.f32.mrf.mxu1 }
  0xde   :  { %v394_v11 = vadd.f32 %v372_v37, %v259_v4  ;;  %v515_v20 = vadd.f32 %v492_v36, %v393_v14  ;;  %v5228_v36 = vld [vmem:[%s9330_s4 + $0x138] sm:$0xff]  ;;  %v5227_v37 = vld [vmem:[%s9330_s4 + $0x130] sm:$0xff] }
  0xdf   :  { %v376_v39 = vpop.f32.mrf.mxu0  ;;  %v498_v41 = vpop.f32.mrf.mxu1  ;;  %v5275_v4 = vld [vmem:[%s9331_s5 + $0x1b8] sm:$0xff]  ;;  %v1087_v14 = vld [vmem:[%s9331_s5 + $0xd0] sm:$0xff] }
  0xe0   :  { %v395_v8 = vadd.f32 %v376_v39, %v263_v1  ;;  %v516_v21 = vadd.f32 %v494_v38, %v394_v11  ;;  %v5226_v38 = vld [vmem:[%s9330_s4 + $0x128] sm:$0xff]  ;;  %v5225_v39 = vld [vmem:[%s9330_s4 + $0x120] sm:$0xff] }
  0xe1   :  { %v378_v40 = vpop.f32.mrf.mxu0  ;;  %v500_v43 = vpop.f32.mrf.mxu1  ;;  %v844_v1 = vld [vmem:[%s9330_s4 + $0x80] sm:$0xff] }
  0xe2   :  { %v396_v5 = vadd.f32 %v378_v40, %v265_v63  ;;  %v517_v23 = vadd.f32 %v498_v41, %v395_v8  ;;  %v5224_v40 = vld [vmem:[%s9330_s4 + $0x118] sm:$0xff]  ;;  %v5223_v41 = vld [vmem:[%s9330_s4 + $0x110] sm:$0xff]  ;;  %v845_v63 = vld [vmem:[%s9330_s4 + $0x88] sm:$0xff] }
  0xe3   :  { %v382_v42 = vpop.f32.mrf.mxu0  ;;  %v504_v46 = vpop.f32.mrf.mxu1 }
  0xe4   :  { %v397_v2 = vadd.f32 %v382_v42, %v269_v59  ;;  %v518_v17 = vadd.f32 %v500_v43, %v396_v5  ;;  %v5222_v42 = vld [vmem:[%s9330_s4 + $0x108] sm:$0xff]  ;;  %v5221_v43 = vld [vmem:[%s9330_s4 + $0x100] sm:$0xff]  ;;  %v847_v59 = vld [vmem:[%s9330_s4 + $0x98] sm:$0xff] }
  0xe5   :  { %v384_v44 = vpop.f32.mrf.mxu0  ;;  %v506_v49 = vpop.f32.mrf.mxu1 }
  0xe6   :  { %v398_v0 = vadd.f32 %v384_v44, %v271_v57  ;;  %v519_v15 = vadd.f32 %v504_v46, %v397_v2  ;;  %v5220_v44 = vld [vmem:[%s9330_s4 + $0xf8] sm:$0xff]  ;;  %v5218_v46 = vld [vmem:[%s9330_s4 + $0xe8] sm:$0xff]  ;;  %v848_v57 = vld [vmem:[%s9330_s4 + $0xa0] sm:$0xff] }
  0xe7   :  { %v388_v45 = vpop.f32.mrf.mxu0  ;;  %v510_v52 = vpop.f32.mrf.mxu1  ;;  %v5233_v2 = vld [vmem:[%s9330_s4 + $0x160] sm:$0xff] }
  0xe8   :  { %v399_v60 = vadd.f32 %v388_v45, %v275_v55  ;;  %v520_v12 = vadd.f32 %v506_v49, %v398_v0  ;;  %v5219_v45 = vld [vmem:[%s9330_s4 + $0xf0] sm:$0xff]  ;;  %v849_v55 = vld [vmem:[%s9330_s4 + $0xa8] sm:$0xff] }
  0xe9   :  { %v390_v47 = vpop.f32.mrf.mxu0  ;;  %v512_v61 = vpop.f32.mrf.mxu1  ;;  %v5243_v49 = vld [vmem:[%s9330_s4 + $0x1b0] sm:$0xff]  ;;  %v5234_v0 = vld [vmem:[%s9330_s4 + $0x168] sm:$0xff] }
  0xea   :  { %v400_v58 = vadd.f32 %v390_v47, %v277_v54  ;;  %v521_v9 = vadd.f32 %v510_v52, %v399_v60  ;;  %v5217_v47 = vld [vmem:[%s9330_s4 + $0xe0] sm:$0xff]  ;;  %v5240_v52 = vld [vmem:[%s9330_s4 + $0x198] sm:$0xff]  ;;  %v5239_v54 = vld [vmem:[%s9330_s4 + $0x190] sm:$0xff] }
  0xeb   :  { %v614_v48 = vpop.f32.mrf.mxu0  ;;  %v5236_v60 = vld [vmem:[%s9330_s4 + $0x178] sm:$0xff] }
  0xec   :  { %v522_v6 = vadd.f32 %v512_v61, %v400_v58  ;;  %v637_v27 = vadd.f32 %v614_v48, %v515_v20  ;;  %v5244_v48 = vld [vmem:[%s9330_s4 + $0x1b8] sm:$0xff]  ;;  %v5237_v58 = vld [vmem:[%s9330_s4 + $0x180] sm:$0xff]  ;;  %v846_v61 = vld [vmem:[%s9330_s4 + $0x90] sm:$0xff] }
  0xed   :  { %v616_v50 = vpop.f32.mrf.mxu0  ;;  %v1084_v20 = vld [vmem:[%s9331_s5 + $0xb8] sm:$0xff] }
  0xee   :  { %v638_v26 = vadd.f32 %v616_v50, %v516_v21  ;;  %v5242_v50 = vld [vmem:[%s9330_s4 + $0x1a8] sm:$0xff]  ;;  %v1085_v21 = vld [vmem:[%s9331_s5 + $0xc0] sm:$0xff] }
  0xef   :  { %v620_v51 = vpop.f32.mrf.mxu0 }
  0xf0   :  { %v639_v22 = vadd.f32 %v620_v51, %v517_v23  ;;  %v5241_v51 = vld [vmem:[%s9330_s4 + $0x1a0] sm:$0xff] }
  0xf1   :  { %v622_v53 = vpop.f32.mrf.mxu0 }
  0xf2   :  { %v640_v19 = vadd.f32 %v622_v53, %v518_v17  ;;  %v850_v53 = vld [vmem:[%s9330_s4 + $0xb0] sm:$0xff]  ;;  %v5273_v17 = vld [vmem:[%s9331_s5 + $0x1a8] sm:$0xff] }
  0xf3   :  { %v626_v56 = vpop.f32.mrf.mxu0  ;;  %914 = vmatpush2.msra.mxu0 %v850_v53  ;;  %v1068_v53 = vld [vmem:[%s9331_s5 + $0x38] sm:$0xff] }
  0xf4   :  { %v641_v24 = vadd.f32 %v626_v56, %v519_v15  ;;  %915 = vmatprep.subr.mxu0 %v6332_v18  ;;  %v5238_v56 = vld [vmem:[%s9330_s4 + $0x188] sm:$0xff]  ;;  %v5274_v15 = vld [vmem:[%s9331_s5 + $0x1b0] sm:$0xff] }
  0xf5   :  { %v628_v62 = vpop.f32.mrf.mxu0  ;;  %916 = vmatpush2.msra.mxu0 %v849_v55  ;;  %v1067_v55 = vld [vmem:[%s9331_s5 + $0x30] sm:$0xff] }
  0xf6   :  { %v642_v25 = vadd.f32 %v628_v62, %v520_v12  ;;  %917 = vmatprep.subr.mxu0 %v6332_v18  ;;  %v5235_v62 = vld [vmem:[%s9330_s4 + $0x170] sm:$0xff] }
  0xf7   :  { %v632_v3 = vpop.f32.mrf.mxu0  ;;  %918 = vmatpush2.msra.mxu0 %v848_v57  ;;  %v1066_v57 = vld [vmem:[%s9331_s5 + $0x28] sm:$0xff] }
  0xf8   :  { %v643_v16 = vadd.f32 %v632_v3, %v521_v9  ;;  %919 = vmatprep.subr.mxu0 %v6332_v18  ;;  %v1088_v3 = vld [vmem:[%s9331_s5 + $0xd8] sm:$0xff] }
  0xf9   :  { %v634_v10 = vpop.f32.mrf.mxu0  ;;  %920 = vmatpush2.msra.mxu0 %v847_v59  ;;  %v1065_v59 = vld [vmem:[%s9331_s5 + $0x20] sm:$0xff] }
  0xfa   :  { %v644_v13 = vadd.f32 %v634_v10, %v522_v6  ;;  %921 = vmatprep.subr.mxu0 %v6332_v18 }
  0xfb   :  { %922 = vmatpush2.msra.mxu0 %v846_v61  ;;  %v1064_v61 = vld [vmem:[%s9331_s5 + $0x18] sm:$0xff] }
  0xfc   :  { %5205 = vmatprep.subr.msk.mxu1 %vm654_vm1, %v644_v13  ;;  %923 = vmatprep.subr.mxu0 %v6332_v18 }
  0xfd   :  { %5206 = vmatpush1.msk.msra.mxu1 %vm654_vm1, %v643_v16  ;;  %924 = vmatpush2.msra.mxu0 %v845_v63  ;;  %v1063_v63 = vld [vmem:[%s9331_s5 + $0x10] sm:$0xff] }
  0xfe   :  { %687 = vmatprep.subr.mxu1 %v642_v25  ;;  %925 = vmatprep.subr.mxu0 %v6332_v18 }
  0xff   :  { %688 = vmatpush1.msra.mxu1 %v641_v24  ;;  %926 = vmatpush2.msra.mxu0 %v844_v1  ;;  %v1062_v1 = vld [vmem:[%s9331_s5 + $0x8] sm:$0xff] }
 0x100   :  { %689 = vmatprep.subr.mxu1 %v640_v19  ;;  %1130 = vmatprep.subr.mxu0 %v5275_v4  ;;  %v5251_v4 = vld [vmem:[%s9331_s5 + $0xf8] sm:$0xff] }
 0x101   :  { %690 = vmatpush1.msra.mxu1 %v639_v22 }
 0x102   :  { %691 = vmatprep.subr.mxu1 %v638_v26 }
 0x103   :  { %692 = vmatpush1.msra.mxu1 %v637_v27 }
 0x104   :  { %5207 = vmatmul.mubr.msk.f32.vlgmr.msra.gmra.mxu1 %vm647_vm2, %v645_v28  ;;  %5211 = vmatprep.subr.msk.mxu1 %vm654_vm1, %v644_v13  ;;  %v1082_v28 = vld [vmem:[%s9331_s5 + $0xa8] sm:$0xff] }
 0x105   :  { %5212 = vmatpush1.msk.msra.mxu1 %vm654_vm1, %v643_v16  ;;  %731 = vmatprep.mubr.f32.mxu1 %v6332_v18  ;;  %v1086_v16 = vld [vmem:[%s9331_s5 + $0xc8] sm:$0xff] }
 0x106   :  { %773 = vmatprep.subr.mxu1 %v642_v25 }
 0x107   :  { %774 = vmatpush1.msra.mxu1 %v641_v24 }
 0x108   :  { %5208 = vmatmul.mubr.msk.f32.gmra.mxu1 %vm647_vm2, %v646_v29  ;;  %775 = vmatprep.subr.mxu1 %v640_v19  ;;  %v5272_v19 = vld [vmem:[%s9331_s5 + $0x1a0] sm:$0xff]  ;;  %v5269_v29 = vld [vmem:[%s9331_s5 + $0x188] sm:$0xff] }
 0x109   :  { %776 = vmatpush1.msra.mxu1 %v639_v22  ;;  %811 = vmatprep.mubr.f32.mxu1 %v6332_v18  ;;  %v5271_v22 = vld [vmem:[%s9331_s5 + $0x198] sm:$0xff] }
 0x10a   :  { %777 = vmatprep.subr.mxu1 %v638_v26  ;;  %v1083_v26 = vld [vmem:[%s9331_s5 + $0xb0] sm:$0xff] }
 0x10b   :  { %778 = vmatpush1.msra.mxu1 %v637_v27  ;;  %v5270_v27 = vld [vmem:[%s9331_s5 + $0x190] sm:$0xff] }
 0x10c   :  { %5213 = vmatmul.mubr.msk.f32.vlgmr.msra.gmra.mxu1 %vm647_vm2, %v5209_v30  ;;  %967 = vmatprep.subr.mxu1 %v6332_v18  ;;  %v1081_v30 = vld [vmem:[%s9331_s5 + $0xa0] sm:$0xff] }
 0x10d   :  { %817 = vmatprep.mubr.f32.mxu1 %v6332_v18  ;;  %968 = vmatpush1.msra.mxu1 %v5232_v31  ;;  %v5268_v31 = vld [vmem:[%s9331_s5 + $0x180] sm:$0xff] }
 0x10e   :  { %969 = vmatprep.subr.mxu1 %v6332_v18 }
 0x10f   :  { %970 = vmatpush1.msra.mxu1 %v5231_v32  ;;  %v1080_v32 = vld [vmem:[%s9331_s5 + $0x98] sm:$0xff] }
 0x110   :  { %5214 = vmatmul.mubr.msk.f32.gmra.mxu1 %vm647_vm2, %v5210_v33  ;;  %971 = vmatprep.subr.mxu1 %v6332_v18  ;;  %v5267_v33 = vld [vmem:[%s9331_s5 + $0x178] sm:$0xff] }
 0x111   :  { %972 = vmatpush1.msra.mxu1 %v5230_v34  ;;  %v1079_v34 = vld [vmem:[%s9331_s5 + $0x90] sm:$0xff] }
 0x112   :  { %973 = vmatprep.subr.mxu1 %v6332_v18 }
 0x113   :  { %974 = vmatpush1.msra.mxu1 %v5229_v35  ;;  %v5266_v35 = vld [vmem:[%s9331_s5 + $0x170] sm:$0xff] }
 0x114   :  { %975 = vmatprep.subr.mxu1 %v6332_v18 }
 0x115   :  { %976 = vmatpush1.msra.mxu1 %v5228_v36  ;;  %v1078_v36 = vld [vmem:[%s9331_s5 + $0x88] sm:$0xff] }
 0x116   :  { %977 = vmatprep.subr.mxu1 %v6332_v18 }
 0x117   :  { %978 = vmatpush1.msra.mxu1 %v5227_v37  ;;  %v1077_v37 = vld [vmem:[%s9331_s5 + $0x80] sm:$0xff] }
 0x118   :  { %979 = vmatprep.subr.mxu1 %v6332_v18 }
 0x119   :  { %980 = vmatpush1.msra.mxu1 %v5226_v38  ;;  %v1076_v38 = vld [vmem:[%s9331_s5 + $0x78] sm:$0xff] }
 0x11a   :  { %981 = vmatprep.subr.mxu1 %v6332_v18 }
 0x11b   :  { %982 = vmatpush1.msra.mxu1 %v5225_v39  ;;  %v1075_v39 = vld [vmem:[%s9331_s5 + $0x70] sm:$0xff] }
 0x11c   :  { %983 = vmatprep.subr.mxu1 %v6332_v18 }
 0x11d   :  { %984 = vmatpush1.msra.mxu1 %v5224_v40  ;;  %v5265_v40 = vld [vmem:[%s9331_s5 + $0x168] sm:$0xff] }
 0x11e   :  { %985 = vmatprep.subr.mxu1 %v6332_v18 }
 0x11f   :  { %986 = vmatpush1.msra.mxu1 %v5223_v41  ;;  %v1074_v41 = vld [vmem:[%s9331_s5 + $0x68] sm:$0xff] }
 0x120   :  { %987 = vmatprep.subr.mxu1 %v6332_v18 }
 0x121   :  { %988 = vmatpush1.msra.mxu1 %v5222_v42  ;;  %v5264_v42 = vld [vmem:[%s9331_s5 + $0x160] sm:$0xff] }
 0x122   :  { %989 = vmatprep.subr.mxu1 %v6332_v18 }
 0x123   :  { %990 = vmatpush1.msra.mxu1 %v5221_v43  ;;  %v1073_v43 = vld [vmem:[%s9331_s5 + $0x60] sm:$0xff] }
 0x124   :  { %991 = vmatprep.subr.mxu1 %v6332_v18 }
 0x125   :  { %992 = vmatpush1.msra.mxu1 %v5220_v44  ;;  %v5263_v44 = vld [vmem:[%s9331_s5 + $0x158] sm:$0xff] }
 0x126   :  { %993 = vmatprep.subr.mxu1 %v6332_v18 }
 0x127   :  { %994 = vmatpush1.msra.mxu1 %v5219_v45  ;;  %v1072_v45 = vld [vmem:[%s9331_s5 + $0x58] sm:$0xff] }
 0x128   :  { %995 = vmatprep.subr.mxu1 %v6332_v18 }
 0x129   :  { %996 = vmatpush1.msra.mxu1 %v5218_v46  ;;  %v5262_v46 = vld [vmem:[%s9331_s5 + $0x150] sm:$0xff] }
 0x12a   :  { %997 = vmatprep.subr.mxu1 %v6332_v18 }
 0x12b   :  { %998 = vmatpush1.msra.mxu1 %v5217_v47  ;;  %v1071_v47 = vld [vmem:[%s9331_s5 + $0x50] sm:$0xff] }
 0x12c   :  { %1007 = vmatprep.subr.mxu1 %v6332_v18 }
 0x12d   :  { %1008 = vmatpush2.msra.mxu1 %v5244_v48  ;;  %v5261_v48 = vld [vmem:[%s9331_s5 + $0x148] sm:$0xff] }
 0x12e   :  { %1009 = vmatprep.subr.mxu1 %v6332_v18 }
 0x12f   :  { %1010 = vmatpush2.msra.mxu1 %v5243_v49  ;;  %v1070_v49 = vld [vmem:[%s9331_s5 + $0x48] sm:$0xff] }
 0x130   :  { %1011 = vmatprep.subr.mxu1 %v6332_v18 }
 0x131   :  { %1012 = vmatpush2.msra.mxu1 %v5242_v50  ;;  %v5260_v50 = vld [vmem:[%s9331_s5 + $0x140] sm:$0xff] }
 0x132   :  { %1013 = vmatprep.subr.mxu1 %v6332_v18 }
 0x133   :  { %1014 = vmatpush2.msra.mxu1 %v5241_v51  ;;  %v1069_v51 = vld [vmem:[%s9331_s5 + $0x40] sm:$0xff] }
 0x134   :  { %1015 = vmatprep.subr.mxu1 %v6332_v18 }
 0x135   :  { %1016 = vmatpush2.msra.mxu1 %v5240_v52  ;;  %v5259_v52 = vld [vmem:[%s9331_s5 + $0x138] sm:$0xff] }
 0x136   :  { %1017 = vmatprep.subr.mxu1 %v6332_v18 }
 0x137   :  { %1018 = vmatpush2.msra.mxu1 %v5239_v54  ;;  %v5258_v54 = vld [vmem:[%s9331_s5 + $0x130] sm:$0xff] }
 0x138   :  { %1019 = vmatprep.subr.mxu1 %v6332_v18 }
 0x139   :  { %1020 = vmatpush2.msra.mxu1 %v5238_v56  ;;  %v5257_v56 = vld [vmem:[%s9331_s5 + $0x128] sm:$0xff] }
 0x13a   :  { %1021 = vmatprep.subr.mxu1 %v6332_v18 }
 0x13b   :  { %1022 = vmatpush2.msra.mxu1 %v5237_v58  ;;  %v5256_v58 = vld [vmem:[%s9331_s5 + $0x120] sm:$0xff] }
 0x13c   :  { %1023 = vmatprep.subr.mxu1 %v6332_v18 }
 0x13d   :  { %1024 = vmatpush2.msra.mxu1 %v5236_v60  ;;  %v5255_v60 = vld [vmem:[%s9331_s5 + $0x118] sm:$0xff] }
 0x13e   :  { %1025 = vmatprep.subr.mxu1 %v6332_v18 }
 0x13f   :  { %1026 = vmatpush2.msra.mxu1 %v5235_v62  ;;  %v5254_v62 = vld [vmem:[%s9331_s5 + $0x110] sm:$0xff] }
 0x140   :  { %1027 = vmatprep.subr.mxu1 %v6332_v18 }
 0x141   :  { %1028 = vmatpush2.msra.mxu1 %v5234_v0  ;;  %v5253_v0 = vld [vmem:[%s9331_s5 + $0x108] sm:$0xff] }
 0x142   :  { %1029 = vmatprep.subr.mxu1 %v6332_v18 }
 0x143   :  { %1030 = vmatpush2.msra.mxu1 %v5233_v2  ;;  %v5252_v2 = vld [vmem:[%s9331_s5 + $0x100] sm:$0xff] }
 0x144   :  { %1213 = vmatprep.subr.mxu1 %v1088_v3  ;;  %v1061_v3 = vld [vmem:[%s9331_s5] sm:$0xff] }
 0x1c4   :  { %v727_v5 = vpop.f32.mrf.mxu1 }
 0x1c6   :  { %v729_v6 = vpop.f32.mrf.mxu1 }
 0x1c8   :  { %v733_v7 = vpop.f32.mrf.mxu1 }
 0x1ca   :  { %v735_v8 = vpop.f32.mrf.mxu1 }
 0x1cc   :  { %v813_v9 = vpop.f32.mrf.mxu1 }
 0x1cd   :  { %v824_v12 = vmax.f32 %v727_v5, %v813_v9  ;;  %v5337_v5 = vld [vmem:[%s9331_s5 + $0x378] sm:$0xff] }
 0x1ce   :  { %v815_v10 = vpop.f32.mrf.mxu1  ;;  %v5307_v9 = vld [vmem:[%s9331_s5 + $0x298] sm:$0xff] }
 0x1cf   :  { %v825_v11 = vmax.f32 %v729_v6, %v815_v10  ;;  %v5250_v6 = vld [vmem:[%s9331_s5 + $0xf0] sm:$0xff] }
 0x1d0   :  { %v819_v13 = vpop.f32.mrf.mxu1 }
 0x1d1   :  { %5215 = vmatprep.mubr.msk.f32.mxu0 %vm856_vm3, %v825_v11  ;;  %5245 = vmatprep.mubr.msk.f32.mxu1 %vm856_vm3, %v825_v11  ;;  %v826_v24 = vmax.f32 %v733_v7, %v819_v13  ;;  %v5249_v7 = vld [vmem:[%s9331_s5 + $0xe8] sm:$0xff] }
 0x1d2   :  { %v821_v25 = vpop.f32.mrf.mxu1  ;;  %928 = vmatmul.mubr.f32.vlgmr.msra.gmra.mxu0 %v824_v12  ;;  %1032 = vmatmul.mubr.f32.vlgmr.msra.gmra.mxu1 %v824_v12  ;;  %v5247_v12 = vld [vmem:[%s9328_s2] ss:$0 sm:$0xff] }
 0x1d3   :  { %v827_v23 = vmax.f32 %v735_v8, %v821_v25  ;;  %1214 = vmatpush1.msra.mxu1 %v1087_v14  ;;  %1131 = vmatpush1.msra.mxu0 %v5274_v15  ;;  %v5248_v8 = vld [vmem:[%s9331_s5 + $0xe0] sm:$0xff] }
 0x1d4   :  { %1215 = vmatprep.subr.mxu1 %v1086_v16  ;;  %1132 = vmatprep.subr.mxu0 %v5273_v17 }
 0x1d5   :  { %5216 = vmatprep.mubr.msk.f32.mxu0 %vm856_vm3, %v827_v23  ;;  %5246 = vmatprep.mubr.msk.f32.mxu1 %vm856_vm3, %v827_v23 }
 0x1d6   :  { %933 = vmatmul.mubr.f32.gmra.mxu0 %v826_v24  ;;  %1037 = vmatmul.mubr.f32.gmra.mxu1 %v826_v24 }
 0x1d7   :  { %1216 = vmatpush1.msra.mxu1 %v1085_v21  ;;  %1133 = vmatpush1.msra.mxu0 %v5272_v19 }
 0x1d8   :  { %1217 = vmatprep.subr.mxu1 %v1084_v20  ;;  %1134 = vmatprep.subr.mxu0 %v5271_v22 }
 0x1d9   :  { %1218 = vmatpush1.msra.mxu1 %v1083_v26  ;;  %1135 = vmatpush1.msra.mxu0 %v5270_v27  ;;  %v5336_v26 = vld [vmem:[%s9331_s5 + $0x370] sm:$0xff] }
 0x1da   :  { %1219 = vmatprep.subr.mxu1 %v1082_v28  ;;  %1136 = vmatprep.subr.mxu0 %v5269_v29  ;;  %v5335_v28 = vld [vmem:[%s9331_s5 + $0x368] sm:$0xff]  ;;  %v5334_v29 = vld [vmem:[%s9331_s5 + $0x360] sm:$0xff] }
 0x1db   :  { %1220 = vmatpush1.msra.mxu1 %v1081_v30  ;;  %1137 = vmatpush1.msra.mxu0 %v5268_v31  ;;  %v5333_v30 = vld [vmem:[%s9331_s5 + $0x358] sm:$0xff]  ;;  %v5306_v31 = vld [vmem:[%s9331_s5 + $0x290] sm:$0xff] }
 0x1dc   :  { %1221 = vmatprep.subr.mxu1 %v1080_v32  ;;  %1138 = vmatprep.subr.mxu0 %v5267_v33  ;;  %v5332_v32 = vld [vmem:[%s9331_s5 + $0x350] sm:$0xff] }
 0x1dd   :  { %1222 = vmatpush1.msra.mxu1 %v1079_v34  ;;  %1139 = vmatpush1.msra.mxu0 %v5266_v35  ;;  %v5305_v35 = vld [vmem:[%s9331_s5 + $0x288] sm:$0xff] }
 0x1de   :  { %1223 = vmatprep.subr.mxu1 %v1078_v36  ;;  %1273 = vmatprep.mubr.f32.mxu1 %v6332_v18  ;;  %v5331_v36 = vld [vmem:[%s9331_s5 + $0x348] sm:$0xff] }
 0x1df   :  { %1224 = vmatpush1.msra.mxu1 %v1077_v37  ;;  %1190 = vmatprep.mubr.f32.mxu0 %v6332_v18  ;;  %v5304_v37 = vld [vmem:[%s9331_s5 + $0x280] sm:$0xff] }
 0x1e0   :  { %1225 = vmatprep.subr.mxu1 %v1076_v38  ;;  %1140 = vmatprep.subr.mxu0 %v5265_v40  ;;  %v5330_v38 = vld [vmem:[%s9331_s5 + $0x340] sm:$0xff]  ;;  %v5329_v40 = vld [vmem:[%s9331_s5 + $0x338] sm:$0xff] }
 0x1e1   :  { %1226 = vmatpush1.msra.mxu1 %v1075_v39  ;;  %1141 = vmatpush1.msra.mxu0 %v5264_v42  ;;  %v5303_v39 = vld [vmem:[%s9331_s5 + $0x278] sm:$0xff]  ;;  %v5302_v42 = vld [vmem:[%s9331_s5 + $0x270] sm:$0xff] }
 0x1e2   :  { %1227 = vmatprep.subr.mxu1 %v1074_v41  ;;  %1142 = vmatprep.subr.mxu0 %v5263_v44  ;;  %v5328_v41 = vld [vmem:[%s9331_s5 + $0x330] sm:$0xff] }
 0x1e3   :  { %1228 = vmatpush1.msra.mxu1 %v1073_v43  ;;  %1143 = vmatpush1.msra.mxu0 %v5262_v46  ;;  %v5327_v43 = vld [vmem:[%s9331_s5 + $0x328] sm:$0xff]  ;;  %v5326_v46 = vld [vmem:[%s9331_s5 + $0x320] sm:$0xff] }
 0x1e4   :  { %1229 = vmatprep.subr.mxu1 %v1072_v45  ;;  %1144 = vmatprep.subr.mxu0 %v5261_v48  ;;  %v5301_v45 = vld [vmem:[%s9331_s5 + $0x268] sm:$0xff]  ;;  %v5325_v48 = vld [vmem:[%s9331_s5 + $0x318] sm:$0xff] }
 0x1e5   :  { %1230 = vmatpush1.msra.mxu1 %v1071_v47  ;;  %1145 = vmatpush1.msra.mxu0 %v5260_v50  ;;  %v5300_v47 = vld [vmem:[%s9331_s5 + $0x260] sm:$0xff]  ;;  %v5324_v50 = vld [vmem:[%s9331_s5 + $0x310] sm:$0xff] }
 0x1e6   :  { %1231 = vmatprep.subr.mxu1 %v1070_v49  ;;  %1146 = vmatprep.subr.mxu0 %v5259_v52  ;;  %v5299_v49 = vld [vmem:[%s9331_s5 + $0x258] sm:$0xff]  ;;  %v5323_v52 = vld [vmem:[%s9331_s5 + $0x308] sm:$0xff] }
 0x1e7   :  { %1232 = vmatpush1.msra.mxu1 %v1069_v51  ;;  %1147 = vmatpush1.msra.mxu0 %v5258_v54  ;;  %v5298_v51 = vld [vmem:[%s9331_s5 + $0x250] sm:$0xff]  ;;  %v5322_v54 = vld [vmem:[%s9331_s5 + $0x300] sm:$0xff] }
 0x1e8   :  { %1233 = vmatprep.subr.mxu1 %v1068_v53  ;;  %1148 = vmatprep.subr.mxu0 %v5257_v56  ;;  %v5297_v53 = vld [vmem:[%s9331_s5 + $0x248] sm:$0xff]  ;;  %v5321_v56 = vld [vmem:[%s9331_s5 + $0x2f8] sm:$0xff] }
 0x1e9   :  { %1234 = vmatpush1.msra.mxu1 %v1067_v55  ;;  %1149 = vmatpush1.msra.mxu0 %v5256_v58  ;;  %v5296_v55 = vld [vmem:[%s9331_s5 + $0x240] sm:$0xff]  ;;  %v5320_v58 = vld [vmem:[%s9331_s5 + $0x2f0] sm:$0xff] }
 0x1ea   :  { %1235 = vmatprep.subr.mxu1 %v1066_v57  ;;  %1150 = vmatprep.subr.mxu0 %v5255_v60  ;;  %v5295_v57 = vld [vmem:[%s9331_s5 + $0x238] sm:$0xff]  ;;  %v5319_v60 = vld [vmem:[%s9331_s5 + $0x2e8] sm:$0xff] }
 0x1eb   :  { %1236 = vmatpush1.msra.mxu1 %v1065_v59  ;;  %1151 = vmatpush1.msra.mxu0 %v5254_v62  ;;  %v5294_v59 = vld [vmem:[%s9331_s5 + $0x230] sm:$0xff]  ;;  %v5318_v62 = vld [vmem:[%s9331_s5 + $0x2e0] sm:$0xff] }
 0x1ec   :  { %1237 = vmatprep.subr.mxu1 %v1064_v61  ;;  %1152 = vmatprep.subr.mxu0 %v5253_v0  ;;  %v5293_v61 = vld [vmem:[%s9331_s5 + $0x228] sm:$0xff]  ;;  %v5317_v0 = vld [vmem:[%s9331_s5 + $0x2d8] sm:$0xff] }
 0x1ed   :  { %1238 = vmatpush1.msra.mxu1 %v1063_v63  ;;  %1153 = vmatpush1.msra.mxu0 %v5252_v2  ;;  %v5292_v63 = vld [vmem:[%s9331_s5 + $0x220] sm:$0xff]  ;;  %v5316_v2 = vld [vmem:[%s9331_s5 + $0x2d0] sm:$0xff] }
 0x1ee   :  { %1239 = vmatprep.subr.mxu1 %v1062_v1  ;;  %1154 = vmatprep.subr.mxu0 %v5251_v4  ;;  %v5291_v1 = vld [vmem:[%s9331_s5 + $0x218] sm:$0xff]  ;;  %v5315_v4 = vld [vmem:[%s9331_s5 + $0x2c8] sm:$0xff] }
 0x1ef   :  { %1240 = vmatpush1.msra.mxu1 %v1061_v3  ;;  %1155 = vmatpush1.msra.mxu0 %v5250_v6  ;;  %v5290_v3 = vld [vmem:[%s9331_s5 + $0x210] sm:$0xff]  ;;  %v5314_v6 = vld [vmem:[%s9331_s5 + $0x2c0] sm:$0xff] }
 0x1f0   :  { %1445 = vmatprep.subr.mxu1 %v5337_v5  ;;  %1156 = vmatprep.subr.mxu0 %v5249_v7  ;;  %v5289_v5 = vld [vmem:[%s9331_s5 + $0x208] sm:$0xff]  ;;  %v5288_v7 = vld [vmem:[%s9331_s5 + $0x200] sm:$0xff] }
 0x1f1   :  { %1157 = vmatpush1.msra.mxu0 %v5248_v8  ;;  %v5313_v8 = vld [vmem:[%s9331_s5 + $0x2b8] sm:$0xff] }
 0x1f2   :  { %1327 = vmatprep.subr.mxu0 %v5307_v9  ;;  %v5287_v9 = vld [vmem:[%s9331_s5 + $0x1f8] sm:$0xff] }
 0x292   :  { %v929_v10 = vpop.f32.mrf.mxu0  ;;  %v1033_v11 = vpop.f32.mrf.mxu1 }
 0x293   :  { %v1042_v13 = vmax.f32 %v929_v10, %v1033_v11  ;;  %v5312_v10 = vld [vmem:[%s9331_s5 + $0x2b0] sm:$0xff] }
 0x294   :  { %v931_v14 = vpop.f32.mrf.mxu0  ;;  %v1035_v15 = vpop.f32.mrf.mxu1  ;;  %v5286_v11 = vld [vmem:[%s9331_s5 + $0x1f0] sm:$0xff] }
 0x295   :  { %v1051_v16 = vadd.f32 %v5247_v12, %v1042_v13  ;;  %v5285_v13 = vld [vmem:[%s9331_s5 + $0x1e8] sm:$0xff]  ;;  %v5310_v14 = vld [vmem:[%s9331_s5 + $0x2a0] sm:$0xff] }
 0x296   :  { %v934_v17 = vpop.f32.mrf.mxu0  ;;  %v1038_v25 = vpop.f32.mrf.mxu1  ;;  %v5284_v15 = vld [vmem:[%s9331_s5 + $0x1e0] sm:$0xff] }
 0x297   :  { %v1053_v23 = vmax.f32 %v1051_v16, 0.0  ;;  %v1043_v24 = vmax.f32 %v934_v17, %v1038_v25  ;;  %v5283_v16 = vld [vmem:[%s9331_s5 + $0x1d8] sm:$0xff]  ;;  %v5282_v17 = vld [vmem:[%s9331_s5 + $0x1d0] sm:$0xff] }
 0x298   :  { %v936_v21 = vpop.f32.mrf.mxu0  ;;  %v1040_v19 = vpop.f32.mrf.mxu1 }
 0x299   :  { %1056 = vst.msk [vmem:[#allocation2] sm:$0xff] %vm1055_vm4, %v1053_v23  ;;  %v1052_v20 = vadd.f32 %v5247_v12, %v1043_v24  ;;  %v5311_v12 = vld [vmem:[%s9331_s5 + $0x2a8] sm:$0xff]  ;;  %v5280_v24 = vld [vmem:[%s9331_s5 + $0x1c0] sm:$0xff]  ;;  %v5367_v21 = vld [vmem:[%s9331_s5 + $0x458] sm:$0xff] }
 0x29a   :  { %v5281_v23 = vld [vmem:[%s9331_s5 + $0x1c8] sm:$0xff] }
 0x29b   :  { %v1054_v22 = vmax.f32 %v1052_v20, 0.0 }
 0x29d   :  { %1058 = vst.msk [vmem:[#allocation2 + $0x8] sm:$0x3f] %vm1057_vm5, %v1054_v22  ;;  %v5366_v22 = vld [vmem:[%s9331_s5 + $0x450] sm:$0xff] }
 0x2a0   :  { %v1059_v27 = vld [vmem:[#allocation2] sm:$0xff] }
 0x2a1   :  { %5278 = vmatmul.mubr.msk.f32.vlgmr.msra.gmra.mxu1 %vm1055_vm4, %v1059_v27  ;;  %v5364_v27 = vld [vmem:[%s9331_s5 + $0x440] sm:$0xff] }
 0x2a2   :  { %1446 = vmatpush1.msra.mxu1 %v5336_v26  ;;  %1279 = vmatprep.mubr.f32.mxu1 %v6332_v18  ;;  %v5365_v26 = vld [vmem:[%s9331_s5 + $0x448] sm:$0xff] }
 0x2a3   :  { %1447 = vmatprep.subr.mxu1 %v5335_v28  ;;  %v5363_v28 = vld [vmem:[%s9331_s5 + $0x438] sm:$0xff] }
 0x2a4   :  { %1448 = vmatpush1.msra.mxu1 %v5334_v29  ;;  %v1089_v33 = vld [vmem:[#allocation2 + $0x1] sm:$0xff]  ;;  %v1090_v44 = vld [vmem:[#allocation2 + $0x9] sm:$0x3]  ;;  %v1405_v20 = vld [vmem:[#allocation2 + $0xb] sm:$0x3] }
 0x2a5   :  { %v1060_v34 = vld [vmem:[#allocation2 + $0x8] sm:$0x3]  ;;  %1449 = vmatprep.subr.mxu1 %v5333_v30  ;;  %5276 = vmatmul.mubr.msk.f32.vlgmr.msra.gmra.mxu0 %vm1055_vm4, %v1089_v33  ;;  %v5362_v29 = vld [vmem:[%s9331_s5 + $0x430] sm:$0xff]  ;;  %v1287_v30 = vld [vmem:[#allocation2 + $0xa] sm:$0x3] }
 0x2a6   :  { %5279 = vmatmul.mubr.msk.f32.gmra.mxu1 %vm1055_vm4, %v1060_v34  ;;  %1328 = vmatpush1.msra.mxu0 %v5306_v31  ;;  %v1404_v25 = vld [vmem:[#allocation2 + $0x3] sm:$0xff]  ;;  %v5359_v33 = vld [vmem:[%s9331_s5 + $0x418] sm:$0xff]  ;;  %v5358_v34 = vld [vmem:[%s9331_s5 + $0x410] sm:$0xff] }
 0x2a7   :  { %1450 = vmatpush1.msra.mxu1 %v5332_v32  ;;  %1329 = vmatprep.subr.mxu0 %v5305_v35  ;;  %v1286_v19 = vld [vmem:[#allocation2 + $0x2] sm:$0xff] }
 0x2a8   :  { %1451 = vmatprep.subr.mxu1 %v5331_v36  ;;  %1330 = vmatpush1.msra.mxu0 %v5304_v37  ;;  %v5361_v31 = vld [vmem:[%s9331_s5 + $0x428] sm:$0xff]  ;;  %v5360_v32 = vld [vmem:[%s9331_s5 + $0x420] sm:$0xff]  ;;  %v5355_v37 = vld [vmem:[%s9331_s5 + $0x3f8] sm:$0xff] }
 0x2a9   :  { %1452 = vmatpush1.msra.mxu1 %v5330_v38  ;;  %1196 = vmatprep.mubr.f32.mxu0 %v6332_v18  ;;  %v5357_v35 = vld [vmem:[%s9331_s5 + $0x408] sm:$0xff]  ;;  %v5356_v36 = vld [vmem:[%s9331_s5 + $0x400] sm:$0xff]  ;;  %v5354_v38 = vld [vmem:[%s9331_s5 + $0x3f0] sm:$0xff] }
 0x2aa   :  { %1331 = vmatprep.subr.mxu0 %v5303_v39  ;;  %1453 = vmatprep.subr.mxu1 %v5329_v40  ;;  %v5353_v39 = vld [vmem:[%s9331_s5 + $0x3e8] sm:$0xff]  ;;  %v5352_v40 = vld [vmem:[%s9331_s5 + $0x3e0] sm:$0xff] }
 0x2ab   :  { %5277 = vmatmul.mubr.msk.f32.gmra.mxu0 %vm1055_vm4, %v1090_v44  ;;  %1454 = vmatpush1.msra.mxu1 %v5328_v41  ;;  %v5351_v41 = vld [vmem:[%s9331_s5 + $0x3d8] sm:$0xff]  ;;  %v5348_v44 = vld [vmem:[%s9331_s5 + $0x3c0] sm:$0xff] }
 0x2ac   :  { %1332 = vmatpush1.msra.mxu0 %v5302_v42  ;;  %1455 = vmatprep.subr.mxu1 %v5327_v43  ;;  %v5350_v42 = vld [vmem:[%s9331_s5 + $0x3d0] sm:$0xff]  ;;  %v5349_v43 = vld [vmem:[%s9331_s5 + $0x3c8] sm:$0xff] }
 0x2ad   :  { %1333 = vmatprep.subr.mxu0 %v5301_v45  ;;  %1456 = vmatpush1.msra.mxu1 %v5326_v46  ;;  %v5347_v45 = vld [vmem:[%s9331_s5 + $0x3b8] sm:$0xff]  ;;  %v5346_v46 = vld [vmem:[%s9331_s5 + $0x3b0] sm:$0xff] }
 0x2ae   :  { %1334 = vmatpush1.msra.mxu0 %v5300_v47  ;;  %1457 = vmatprep.subr.mxu1 %v5325_v48  ;;  %v5345_v47 = vld [vmem:[%s9331_s5 + $0x3a8] sm:$0xff]  ;;  %v5344_v48 = vld [vmem:[%s9331_s5 + $0x3a0] sm:$0xff] }
 0x2af   :  { %1335 = vmatprep.subr.mxu0 %v5299_v49  ;;  %1458 = vmatpush1.msra.mxu1 %v5324_v50  ;;  %v5343_v49 = vld [vmem:[%s9331_s5 + $0x398] sm:$0xff]  ;;  %v5342_v50 = vld [vmem:[%s9331_s5 + $0x390] sm:$0xff] }
 0x2b0   :  { %1336 = vmatpush1.msra.mxu0 %v5298_v51  ;;  %1459 = vmatprep.subr.mxu1 %v5323_v52  ;;  %v5341_v51 = vld [vmem:[%s9331_s5 + $0x388] sm:$0xff]  ;;  %v5340_v52 = vld [vmem:[%s9331_s5 + $0x380] sm:$0xff] }
 0x2b1   :  { %1337 = vmatprep.subr.mxu0 %v5297_v53  ;;  %1460 = vmatpush1.msra.mxu1 %v5322_v54  ;;  %v1522_v53 = vld [vmem:[#allocation2 + $0x4] sm:$0xff]  ;;  %v1523_v54 = vld [vmem:[#allocation2 + $0xc] sm:$0x3] }
 0x2b2   :  { %1338 = vmatpush1.msra.mxu0 %v5296_v55  ;;  %1461 = vmatprep.subr.mxu1 %v5321_v56  ;;  %v5393_v55 = vld [vmem:[%s9334_s8 + $0x118] sm:$0xff]  ;;  %v5392_v56 = vld [vmem:[%s9334_s8 + $0x110] sm:$0xff] }
 0x2b3   :  { %1339 = vmatprep.subr.mxu0 %v5295_v57  ;;  %1462 = vmatpush1.msra.mxu1 %v5320_v58  ;;  %v5391_v57 = vld [vmem:[%s9334_s8 + $0x108] sm:$0xff]  ;;  %v5390_v58 = vld [vmem:[%s9334_s8 + $0x100] sm:$0xff] }
 0x2b4   :  { %1340 = vmatpush1.msra.mxu0 %v5294_v59  ;;  %1463 = vmatprep.subr.mxu1 %v5319_v60  ;;  %v5389_v59 = vld [vmem:[%s9334_s8 + $0xf8] sm:$0xff]  ;;  %v5388_v60 = vld [vmem:[%s9334_s8 + $0xf0] sm:$0xff] }
 0x2b5   :  { %1341 = vmatprep.subr.mxu0 %v5293_v61  ;;  %1464 = vmatpush1.msra.mxu1 %v5318_v62  ;;  %v5387_v61 = vld [vmem:[%s9334_s8 + $0xe8] sm:$0xff]  ;;  %v5386_v62 = vld [vmem:[%s9334_s8 + $0xe0] sm:$0xff] }
 0x2b6   :  { %1342 = vmatpush1.msra.mxu0 %v5292_v63  ;;  %1465 = vmatprep.subr.mxu1 %v5317_v0  ;;  %v5385_v63 = vld [vmem:[%s9334_s8 + $0xd8] sm:$0xff]  ;;  %v5384_v0 = vld [vmem:[%s9334_s8 + $0xd0] sm:$0xff] }
 0x2b7   :  { %1343 = vmatprep.subr.mxu0 %v5291_v1  ;;  %1466 = vmatpush1.msra.mxu1 %v5316_v2  ;;  %v5383_v1 = vld [vmem:[%s9334_s8 + $0xc8] sm:$0xff]  ;;  %v5382_v2 = vld [vmem:[%s9334_s8 + $0xc0] sm:$0xff] }
 0x2b8   :  { %1344 = vmatpush1.msra.mxu0 %v5290_v3  ;;  %1467 = vmatprep.subr.mxu1 %v5315_v4  ;;  %v5381_v3 = vld [vmem:[%s9334_s8 + $0xb8] sm:$0xff]  ;;  %v5380_v4 = vld [vmem:[%s9334_s8 + $0xb0] sm:$0xff] }
 0x2b9   :  { %1345 = vmatprep.subr.mxu0 %v5289_v5  ;;  %1468 = vmatpush1.msra.mxu1 %v5314_v6  ;;  %v5379_v5 = vld [vmem:[%s9334_s8 + $0xa8] sm:$0xff] }
 0x2ba   :  { %1346 = vmatpush1.msra.mxu0 %v5288_v7  ;;  %1469 = vmatprep.subr.mxu1 %v5313_v8 }
 0x2bb   :  { %1347 = vmatprep.subr.mxu0 %v5287_v9  ;;  %1470 = vmatpush1.msra.mxu1 %v5312_v10 }
 0x2bc   :  { %1348 = vmatpush1.msra.mxu0 %v5286_v11  ;;  %1471 = vmatprep.subr.mxu1 %v5311_v12 }
 0x2bd   :  { %1349 = vmatprep.subr.mxu0 %v5285_v13  ;;  %1472 = vmatpush1.msra.mxu1 %v5310_v14 }
 0x2be   :  { %1350 = vmatpush1.msra.mxu0 %v5284_v15  ;;  %1505 = vmatprep.mubr.f32.mxu1 %v6332_v18 }
 0x2bf   :  { %1351 = vmatprep.subr.mxu0 %v5283_v16  ;;  %5338 = vmatmul.mubr.msk.f32.vlgmr.msra.gmra.mxu1 %vm1055_vm4, %v1404_v25 }
 0x2c0   :  { %1352 = vmatpush1.msra.mxu0 %v5282_v17  ;;  %1387 = vmatprep.mubr.f32.mxu0 %v6332_v18 }
 0x2c1   :  { %1353 = vmatprep.subr.mxu0 %v5281_v23  ;;  %1511 = vmatprep.mubr.f32.mxu1 %v6332_v18 }
 0x2c2   :  { %1354 = vmatpush1.msra.mxu0 %v5280_v24 }
 0x2c3   :  { %5308 = vmatmul.mubr.msk.f32.vlgmr.msra.gmra.mxu0 %vm1055_vm4, %v1286_v19  ;;  %5339 = vmatmul.mubr.msk.f32.gmra.mxu1 %vm1055_vm4, %v1405_v20 }
 0x2c4   :  { %1563 = vmatprep.subr.mxu0 %v5367_v21  ;;  %1393 = vmatprep.mubr.f32.mxu0 %v6332_v18 }
 0x2c5   :  { %1564 = vmatpush1.msra.mxu0 %v5366_v22  ;;  %1716 = vmatprep.mubr.f32.mxu1 %v6332_v18 }
 0x2c6   :  { %1565 = vmatprep.subr.mxu0 %v5365_v26 }
 0x2c7   :  { %1566 = vmatpush1.msra.mxu0 %v5364_v27 }
 0x2c8   :  { %5309 = vmatmul.mubr.msk.f32.gmra.mxu0 %vm1055_vm4, %v1287_v30  ;;  %1567 = vmatprep.subr.mxu0 %v5363_v28 }
 0x2c9   :  { %1568 = vmatpush1.msra.mxu0 %v5362_v29  ;;  %1623 = vmatprep.mubr.f32.mxu0 %v6332_v18 }
 0x2ca   :  { %1569 = vmatprep.subr.mxu0 %v5361_v31 }
 0x2cb   :  { %1570 = vmatpush1.msra.mxu0 %v5360_v32 }
 0x2cc   :  { %1571 = vmatprep.subr.mxu0 %v5359_v33 }
 0x2cd   :  { %1572 = vmatpush1.msra.mxu0 %v5358_v34 }
 0x2ce   :  { %1573 = vmatprep.subr.mxu0 %v5357_v35 }
 0x2cf   :  { %1574 = vmatpush1.msra.mxu0 %v5356_v36 }
 0x2d0   :  { %1575 = vmatprep.subr.mxu0 %v5355_v37 }
 0x2d1   :  { %1576 = vmatpush1.msra.mxu0 %v5354_v38 }
 0x2d2   :  { %1577 = vmatprep.subr.mxu0 %v5353_v39 }
 0x2d3   :  { %1578 = vmatpush1.msra.mxu0 %v5352_v40 }
 0x2d4   :  { %1579 = vmatprep.subr.mxu0 %v5351_v41 }
 0x2d5   :  { %1580 = vmatpush1.msra.mxu0 %v5350_v42 }
 0x2d6   :  { %1581 = vmatprep.subr.mxu0 %v5349_v43  ;;  %v1640_v43 = vld [vmem:[%s9333_s7] sm:$0x1f] }
 0x2d7   :  { %1582 = vmatpush1.msra.mxu0 %v5348_v44  ;;  %v5373_v44 = vld [vmem:[%s9333_s7 + $0x8] sm:$0x1f] }
 0x2d8   :  { %1583 = vmatprep.subr.mxu0 %v5347_v45  ;;  %v1816_v45 = vld [vmem:[%s9334_s8 + $0x78] sm:$0xff] }
 0x2d9   :  { %1584 = vmatpush1.msra.mxu0 %v5346_v46  ;;  %v1815_v46 = vld [vmem:[%s9334_s8 + $0x70] sm:$0xff] }
 0x2da   :  { %1585 = vmatprep.subr.mxu0 %v5345_v47  ;;  %v1814_v47 = vld [vmem:[%s9334_s8 + $0x68] sm:$0xff] }
 0x2db   :  { %1586 = vmatpush1.msra.mxu0 %v5344_v48  ;;  %v1813_v48 = vld [vmem:[%s9334_s8 + $0x60] sm:$0xff] }
 0x2dc   :  { %1587 = vmatprep.subr.mxu0 %v5343_v49  ;;  %v1812_v49 = vld [vmem:[%s9334_s8 + $0x58] sm:$0xff] }
 0x2dd   :  { %1588 = vmatpush1.msra.mxu0 %v5342_v50  ;;  %v1811_v50 = vld [vmem:[%s9334_s8 + $0x50] sm:$0xff] }
 0x2de   :  { %1589 = vmatprep.subr.mxu0 %v5341_v51  ;;  %v1810_v51 = vld [vmem:[%s9334_s8 + $0x48] sm:$0xff] }
 0x2df   :  { %1590 = vmatpush1.msra.mxu0 %v5340_v52  ;;  %v1809_v52 = vld [vmem:[%s9334_s8 + $0x40] sm:$0xff] }
 0x2e0   :  { %5368 = vmatmul.mubr.msk.f32.vlgmr.msra.gmra.mxu0 %vm1055_vm4, %v1522_v53  ;;  %1915 = vmatprep.subr.mxu0 %v6332_v18  ;;  %v1808_v53 = vld [vmem:[%s9334_s8 + $0x38] sm:$0xff] }
 0x2e1   :  { %1629 = vmatprep.mubr.f32.mxu0 %v6332_v18  ;;  %1916 = vmatpush1.msra.mxu0 %v5393_v55  ;;  %v1806_v55 = vld [vmem:[%s9334_s8 + $0x28] sm:$0xff] }
 0x2e2   :  { %1917 = vmatprep.subr.mxu0 %v6332_v18 }
 0x2e3   :  { %1918 = vmatpush1.msra.mxu0 %v5392_v56  ;;  %v1805_v56 = vld [vmem:[%s9334_s8 + $0x20] sm:$0xff] }
 0x2e4   :  { %5369 = vmatmul.mubr.msk.f32.gmra.mxu0 %vm1055_vm4, %v1523_v54  ;;  %1919 = vmatprep.subr.mxu0 %v6332_v18  ;;  %v1807_v54 = vld [vmem:[%s9334_s8 + $0x30] sm:$0xff] }
 0x2e5   :  { %1920 = vmatpush1.msra.mxu0 %v5391_v57  ;;  %v1804_v57 = vld [vmem:[%s9334_s8 + $0x18] sm:$0xff] }
 0x2e6   :  { %1921 = vmatprep.subr.mxu0 %v6332_v18 }
 0x2e7   :  { %1922 = vmatpush1.msra.mxu0 %v5390_v58  ;;  %v1803_v58 = vld [vmem:[%s9334_s8 + $0x10] sm:$0xff] }
 0x2e8   :  { %1923 = vmatprep.subr.mxu0 %v6332_v18 }
 0x2e9   :  { %1924 = vmatpush1.msra.mxu0 %v5389_v59  ;;  %v1802_v59 = vld [vmem:[%s9334_s8 + $0x8] sm:$0xff] }
 0x2ea   :  { %1925 = vmatprep.subr.mxu0 %v6332_v18 }
 0x2eb   :  { %1926 = vmatpush1.msra.mxu0 %v5388_v60  ;;  %v1801_v60 = vld [vmem:[%s9334_s8] sm:$0xff] }
 0x2ec   :  { %1927 = vmatprep.subr.mxu0 %v6332_v18 }
 0x2ed   :  { %1928 = vmatpush1.msra.mxu0 %v5387_v61  ;;  %v5378_v61 = vld [vmem:[%s9334_s8 + $0xa0] sm:$0xff] }
 0x2ee   :  { %1929 = vmatprep.subr.mxu0 %v6332_v18 }
 0x2ef   :  { %1930 = vmatpush1.msra.mxu0 %v5386_v62  ;;  %v1820_v62 = vld [vmem:[%s9334_s8 + $0x98] sm:$0xff] }
 0x2f0   :  { %1931 = vmatprep.subr.mxu0 %v6332_v18 }
 0x2f1   :  { %1932 = vmatpush1.msra.mxu0 %v5385_v63  ;;  %v5397_v63 = vld [vmem:[%s9334_s8 + $0x138] sm:$0xff] }
 0x2f2   :  { %1933 = vmatprep.subr.mxu0 %v6332_v18 }
 0x2f3   :  { %1934 = vmatpush1.msra.mxu0 %v5384_v0  ;;  %v1819_v0 = vld [vmem:[%s9334_s8 + $0x90] sm:$0xff] }
 0x2f4   :  { %1935 = vmatprep.subr.mxu0 %v6332_v18 }
 0x2f5   :  { %1936 = vmatpush1.msra.mxu0 %v5383_v1  ;;  %v5396_v1 = vld [vmem:[%s9334_s8 + $0x130] sm:$0xff] }
 0x2f6   :  { %1937 = vmatprep.subr.mxu0 %v6332_v18 }
 0x2f7   :  { %1938 = vmatpush1.msra.mxu0 %v5382_v2  ;;  %v1818_v2 = vld [vmem:[%s9334_s8 + $0x88] sm:$0xff] }
 0x2f8   :  { %1939 = vmatprep.subr.mxu0 %v6332_v18 }
 0x2f9   :  { %1940 = vmatpush1.msra.mxu0 %v5381_v3  ;;  %v5395_v3 = vld [vmem:[%s9334_s8 + $0x128] sm:$0xff] }
 0x2fa   :  { %1941 = vmatprep.subr.mxu0 %v6332_v18 }
 0x2fb   :  { %1942 = vmatpush1.msra.mxu0 %v5380_v4  ;;  %v1817_v4 = vld [vmem:[%s9334_s8 + $0x80] sm:$0xff] }
 0x2fc   :  { %1943 = vmatprep.subr.mxu0 %v6332_v18 }
 0x2fd   :  { %1944 = vmatpush1.msra.mxu0 %v5379_v5  ;;  %v5394_v5 = vld [vmem:[%s9334_s8 + $0x120] sm:$0xff] }
 0x2fe   :  { %1945 = vmatprep.subr.mxu0 %v6332_v18 }
 0x2ff   :  { %1946 = vmatpush1.msra.mxu0 %v5378_v61  ;;  %v5412_v61 = vld [vmem:[%s9335_s9 + $0xa0] sm:$0xff] }
 0x300   :  { %1971 = vmatprep.subr.mxu0 %v6332_v18 }
 0x301   :  { %1972 = vmatpush2.msra.mxu0 %v5397_v63 }
 0x302   :  { %1973 = vmatprep.subr.mxu0 %v6332_v18 }
 0x303   :  { %1974 = vmatpush2.msra.mxu0 %v5396_v1  ;;  %v5443_v1 = vld [vmem:[%s9335_s9 + $0x188] sm:$0xff] }
 0x304   :  { %1975 = vmatprep.subr.mxu0 %v6332_v18 }
 0x305   :  { %1976 = vmatpush2.msra.mxu0 %v5395_v3  ;;  %v5441_v3 = vld [vmem:[%s9335_s9 + $0x178] sm:$0xff] }
 0x306   :  { %1977 = vmatprep.subr.mxu0 %v6332_v18 }
 0x307   :  { %1978 = vmatpush2.msra.mxu0 %v5394_v5  ;;  %v5439_v5 = vld [vmem:[%s9335_s9 + $0x168] sm:$0xff] }
 0x308   :  { %5958 = vmatprep.subr.mxu0 %v6332_v18 }
 0x361   :  { %v1275_v8 = vpop.f32.mrf.mxu1 }
 0x363   :  { %v1277_v10 = vpop.f32.mrf.mxu1 }
 0x365   :  { %v1192_v6 = vpop.f32.mrf.mxu0 }
 0x366   :  { %v1281_v12 = vpop.f32.mrf.mxu1  ;;  %v1276_v27 = vadd.f32 %v1275_v8, %v1192_v6 }
 0x367   :  { %v1194_v7 = vpop.f32.mrf.mxu0 }
 0x368   :  { %v1283_v14 = vpop.f32.mrf.mxu1  ;;  %v1278_v22 = vadd.f32 %v1277_v10, %v1194_v7 }
 0x36b   :  { %v1198_v9 = vpop.f32.mrf.mxu0 }
 0x36c   :  { %v1282_v21 = vadd.f32 %v1281_v12, %v1198_v9  ;;  %v2008_v12 = vld [vmem:[%s9335_s9 + $0x48] sm:$0xff] }
 0x36d   :  { %v1200_v11 = vpop.f32.mrf.mxu0 }
 0x36e   :  { %v1284_v24 = vadd.f32 %v1283_v14, %v1200_v11  ;;  %v2007_v14 = vld [vmem:[%s9335_s9 + $0x40] sm:$0xff] }
 0x37f   :  { %v1507_v16 = vpop.f32.mrf.mxu1 }
 0x381   :  { %v1509_v25 = vpop.f32.mrf.mxu1 }
 0x383   :  { %v1389_v13 = vpop.f32.mrf.mxu0  ;;  %v1513_v19 = vpop.f32.mrf.mxu1 }
 0x384   :  { %v1400_v31 = vadd.f32 %v1389_v13, %v1276_v27  ;;  %v5410_v13 = vld [vmem:[%s9335_s9 + $0x98] sm:$0xff]  ;;  %v2001_v27 = vld [vmem:[%s9335_s9 + $0x10] sm:$0xff] }
 0x385   :  { %v1391_v15 = vpop.f32.mrf.mxu0  ;;  %v1515_v32 = vpop.f32.mrf.mxu1 }
 0x386   :  { %v1401_v30 = vadd.f32 %v1391_v15, %v1278_v22  ;;  %v1518_v39 = vadd.f32 %v1507_v16, %v1400_v31  ;;  %v5409_v15 = vld [vmem:[%s9335_s9 + $0x90] sm:$0xff]  ;;  %v2006_v16 = vld [vmem:[%s9335_s9 + $0x38] sm:$0xff]  ;;  %v1999_v31 = vld [vmem:[%s9335_s9] sm:$0xff] }
 0x387   :  { %v2002_v22 = vld [vmem:[%s9335_s9 + $0x18] sm:$0xff] }
 0x388   :  { %v1395_v17 = vpop.f32.mrf.mxu0  ;;  %v1519_v37 = vadd.f32 %v1509_v25, %v1401_v30  ;;  %v2005_v25 = vld [vmem:[%s9335_s9 + $0x30] sm:$0xff]  ;;  %v5402_v30 = vld [vmem:[%s9335_s9 + $0x58] sm:$0xff] }
 0x389   :  { %v1402_v28 = vadd.f32 %v1395_v17, %v1282_v21  ;;  %v5408_v17 = vld [vmem:[%s9335_s9 + $0x88] sm:$0xff]  ;;  %v5406_v21 = vld [vmem:[%s9335_s9 + $0x78] sm:$0xff] }
 0x38a   :  { %v1397_v23 = vpop.f32.mrf.mxu0 }
 0x38b   :  { %v1403_v26 = vadd.f32 %v1397_v23, %v1284_v24  ;;  %v1520_v35 = vadd.f32 %v1513_v19, %v1402_v28  ;;  %v5407_v23 = vld [vmem:[%s9335_s9 + $0x80] sm:$0xff]  ;;  %v2004_v24 = vld [vmem:[%s9335_s9 + $0x28] sm:$0xff] }
 0x38c   :  { %v2003_v19 = vld [vmem:[%s9335_s9 + $0x20] sm:$0xff] }
 0x38d   :  { %v1521_v34 = vadd.f32 %v1515_v32, %v1403_v26  ;;  %v5404_v26 = vld [vmem:[%s9335_s9 + $0x68] sm:$0xff]  ;;  %v5403_v28 = vld [vmem:[%s9335_s9 + $0x60] sm:$0xff]  ;;  %v5401_v32 = vld [vmem:[%s9335_s9 + $0x50] sm:$0xff] }
 0x3a0   :  { %v1625_v20 = vpop.f32.mrf.mxu0 }
 0x3a1   :  { %v1636_v42 = vadd.f32 %v1625_v20, %v1518_v39  ;;  %v5405_v20 = vld [vmem:[%s9335_s9 + $0x70] sm:$0xff] }
 0x3a2   :  { %v1627_v29 = vpop.f32.mrf.mxu0 }
 0x3a3   :  { %v1637_v41 = vadd.f32 %v1627_v29, %v1519_v37  ;;  %v2000_v29 = vld [vmem:[%s9335_s9 + $0x8] sm:$0xff] }
 0x3a4   :  { %v1631_v33 = vpop.f32.mrf.mxu0 }
 0x3a5   :  { %v1638_v40 = vadd.f32 %v1631_v33, %v1520_v35  ;;  %v5399_v35 = vld [vmem:[%s9332_s6] ss:$0 sm:$0xff] }
 0x3a6   :  { %v1633_v36 = vpop.f32.mrf.mxu0 }
 0x3a7   :  { %v1639_v38 = vadd.f32 %v1633_v36, %v1521_v34 }
 0x3a9   :  { %5370 = vmatprep.subr.msk.mxu1 %vm1645_vm6, %v1639_v38 }
 0x3aa   :  { %5371 = vmatpush1.msk.msra.mxu1 %vm1645_vm6, %v1638_v40 }
 0x3ab   :  { %1682 = vmatprep.subr.mxu1 %v1637_v41 }
 0x3ac   :  { %1683 = vmatpush1.msra.mxu1 %v1636_v42 }
 0x3ad   :  { %5372 = vmatmul.mubr.msk.f32.vlgmr.msra.gmra.mxu1 %vm1641_vm7, %v1640_v43  ;;  %5374 = vmatprep.subr.msk.mxu1 %vm1645_vm6, %v1639_v38 }
 0x3ae   :  { %5375 = vmatpush1.msk.msra.mxu1 %vm1645_vm6, %v1638_v40  ;;  %1792 = vmatprep.mubr.f32.mxu1 %v6332_v18 }
 0x3af   :  { %1758 = vmatprep.subr.mxu1 %v1637_v41  ;;  %v5421_v41 = vld [vmem:[%s9335_s9 + $0xe8] sm:$0xff] }
 0x3b0   :  { %1759 = vmatpush1.msra.mxu1 %v1636_v42  ;;  %v5432_v42 = vld [vmem:[%s9335_s9 + $0x138] sm:$0xff] }
 0x3b1   :  { %5376 = vmatmul.mubr.msk.f32.vlgmr.msra.gmra.mxu1 %vm1641_vm7, %v5373_v44  ;;  %1824 = vmatprep.subr.mxu1 %v6332_v18 }
 0x3b2   :  { %1825 = vmatpush1.msra.mxu1 %v1816_v45  ;;  %v5420_v45 = vld [vmem:[%s9335_s9 + $0xe0] sm:$0xff] }
 0x3b3   :  { %1826 = vmatprep.subr.mxu1 %v6332_v18 }
 0x3b4   :  { %1827 = vmatpush1.msra.mxu1 %v1815_v46  ;;  %v5431_v46 = vld [vmem:[%s9335_s9 + $0x130] sm:$0xff] }
 0x3b5   :  { %1828 = vmatprep.subr.mxu1 %v6332_v18 }
 0x3b6   :  { %1829 = vmatpush1.msra.mxu1 %v1814_v47  ;;  %v5419_v47 = vld [vmem:[%s9335_s9 + $0xd8] sm:$0xff] }
 0x3b7   :  { %1830 = vmatprep.subr.mxu1 %v6332_v18 }
 0x3b8   :  { %1831 = vmatpush1.msra.mxu1 %v1813_v48  ;;  %v5430_v48 = vld [vmem:[%s9335_s9 + $0x128] sm:$0xff] }
 0x3b9   :  { %1832 = vmatprep.subr.mxu1 %v6332_v18 }
 0x3ba   :  { %1833 = vmatpush1.msra.mxu1 %v1812_v49  ;;  %v5418_v49 = vld [vmem:[%s9335_s9 + $0xd0] sm:$0xff] }
 0x3bb   :  { %1834 = vmatprep.subr.mxu1 %v6332_v18 }
 0x3bc   :  { %1835 = vmatpush1.msra.mxu1 %v1811_v50  ;;  %v5429_v50 = vld [vmem:[%s9335_s9 + $0x120] sm:$0xff] }
 0x3bd   :  { %1836 = vmatprep.subr.mxu1 %v6332_v18 }
 0x3be   :  { %1837 = vmatpush1.msra.mxu1 %v1810_v51  ;;  %v5417_v51 = vld [vmem:[%s9335_s9 + $0xc8] sm:$0xff] }
 0x3bf   :  { %1838 = vmatprep.subr.mxu1 %v6332_v18 }
 0x3c0   :  { %1839 = vmatpush1.msra.mxu1 %v1809_v52  ;;  %v5428_v52 = vld [vmem:[%s9335_s9 + $0x118] sm:$0xff] }
 0x3c1   :  { %1840 = vmatprep.subr.mxu1 %v6332_v18 }
 0x3c2   :  { %1841 = vmatpush1.msra.mxu1 %v1808_v53  ;;  %v5416_v53 = vld [vmem:[%s9335_s9 + $0xc0] sm:$0xff] }
 0x3c3   :  { %1842 = vmatprep.subr.mxu1 %v6332_v18 }
 0x3c4   :  { %1843 = vmatpush1.msra.mxu1 %v1807_v54  ;;  %v5427_v54 = vld [vmem:[%s9335_s9 + $0x110] sm:$0xff] }
 0x3c5   :  { %1844 = vmatprep.subr.mxu1 %v6332_v18 }
 0x3c6   :  { %1845 = vmatpush1.msra.mxu1 %v1806_v55  ;;  %v5415_v55 = vld [vmem:[%s9335_s9 + $0xb8] sm:$0xff] }
 0x3c7   :  { %1846 = vmatprep.subr.mxu1 %v6332_v18 }
 0x3c8   :  { %1847 = vmatpush1.msra.mxu1 %v1805_v56  ;;  %v5426_v56 = vld [vmem:[%s9335_s9 + $0x108] sm:$0xff] }
 0x3c9   :  { %1848 = vmatprep.subr.mxu1 %v6332_v18 }
 0x3ca   :  { %1849 = vmatpush1.msra.mxu1 %v1804_v57  ;;  %v5414_v57 = vld [vmem:[%s9335_s9 + $0xb0] sm:$0xff] }
 0x3cb   :  { %1850 = vmatprep.subr.mxu1 %v6332_v18 }
 0x3cc   :  { %1851 = vmatpush1.msra.mxu1 %v1803_v58  ;;  %v5425_v58 = vld [vmem:[%s9335_s9 + $0x100] sm:$0xff] }
 0x3cd   :  { %1852 = vmatprep.subr.mxu1 %v6332_v18 }
 0x3ce   :  { %1853 = vmatpush1.msra.mxu1 %v1802_v59  ;;  %v5413_v59 = vld [vmem:[%s9335_s9 + $0xa8] sm:$0xff] }
 0x3cf   :  { %1854 = vmatprep.subr.mxu1 %v6332_v18 }
 0x3d0   :  { %1855 = vmatpush1.msra.mxu1 %v1801_v60  ;;  %v5424_v60 = vld [vmem:[%s9335_s9 + $0xf8] sm:$0xff] }
 0x3d1   :  { %1880 = vmatprep.subr.mxu1 %v6332_v18 }
 0x3d2   :  { %1881 = vmatpush2.msra.mxu1 %v1820_v62  ;;  %v5423_v62 = vld [vmem:[%s9335_s9 + $0xf0] sm:$0xff] }
 0x3d3   :  { %1882 = vmatprep.subr.mxu1 %v6332_v18 }
 0x3d4   :  { %1883 = vmatpush2.msra.mxu1 %v1819_v0 }
 0x3d5   :  { %1884 = vmatprep.subr.mxu1 %v6332_v18 }
 0x3d6   :  { %1885 = vmatpush2.msra.mxu1 %v1818_v2  ;;  %v5442_v2 = vld [vmem:[%s9335_s9 + $0x180] sm:$0xff] }
 0x3d7   :  { %1886 = vmatprep.subr.mxu1 %v6332_v18 }
 0x3d8   :  { %1887 = vmatpush2.msra.mxu1 %v1817_v4  ;;  %v5440_v4 = vld [vmem:[%s9335_s9 + $0x170] sm:$0xff] }
 0x3d9   :  { %5935 = vmatprep.subr.mxu1 %v6332_v18 }
 0x46d   :  { %v1718_v6 = vpop.f32.mrf.mxu1 }
 0x46f   :  { %v1720_v7 = vpop.f32.mrf.mxu1 }
 0x471   :  { %v1794_v8 = vpop.f32.mrf.mxu1 }
 0x472   :  { %v1799_v11 = vmax.f32 %v1718_v6, %v1794_v8  ;;  %v5438_v6 = vld [vmem:[%s9335_s9 + $0x160] sm:$0xff]  ;;  %v5436_v8 = vld [vmem:[%s9335_s9 + $0x150] sm:$0xff] }
 0x473   :  { %v1796_v9 = vpop.f32.mrf.mxu1 }
 0x474   :  { %v1800_v10 = vmax.f32 %v1720_v7, %v1796_v9  ;;  %v5437_v7 = vld [vmem:[%s9335_s9 + $0x158] sm:$0xff]  ;;  %v5435_v9 = vld [vmem:[%s9335_s9 + $0x148] sm:$0xff] }
 0x476   :  { %5377 = vmatprep.mubr.msk.f32.mxu1 %vm76_vm0, %v1800_v10  ;;  %5398 = vmatprep.mubr.msk.f32.mxu0 %vm76_vm0, %v1800_v10  ;;  %v5434_v10 = vld [vmem:[%s9335_s9 + $0x140] sm:$0xff] }
 0x477   :  { %1889 = vmatmul.mubr.f32.vlgmr.msra.gmra.mxu1 %v1799_v11  ;;  %1980 = vmatmul.mubr.f32.vlgmr.msra.gmra.mxu0 %v1799_v11 }
 0x478   :  { %5936 = vmatpush3.msra.mxu1 %v2008_v12  ;;  %5959 = vmatpush3.msra.mxu0 %v5410_v13  ;;  %v2444_v12 = vld [vmem:[%s9337_s11 + $0x78] sm:$0xff]  ;;  %v2443_v13 = vld [vmem:[%s9337_s11 + $0x70] sm:$0xff] }
 0x479   :  { %5937 = vmatprep.subr.mxu1 %v6332_v18  ;;  %5960 = vmatprep.subr.mxu0 %v6332_v18 }
 0x47a   :  { %5938 = vmatpush3.msra.mxu1 %v2007_v14  ;;  %5961 = vmatpush3.msra.mxu0 %v5409_v15  ;;  %v2442_v14 = vld [vmem:[%s9337_s11 + $0x68] sm:$0xff]  ;;  %v2441_v15 = vld [vmem:[%s9337_s11 + $0x60] sm:$0xff] }
 0x47b   :  { %5939 = vmatprep.subr.mxu1 %v6332_v18  ;;  %5962 = vmatprep.subr.mxu0 %v6332_v18 }
 0x47c   :  { %5940 = vmatpush3.msra.mxu1 %v2006_v16  ;;  %5963 = vmatpush3.msra.mxu0 %v5408_v17  ;;  %v2440_v16 = vld [vmem:[%s9337_s11 + $0x58] sm:$0xff]  ;;  %v2439_v17 = vld [vmem:[%s9337_s11 + $0x50] sm:$0xff] }
 0x47d   :  { %5941 = vmatprep.subr.mxu1 %v6332_v18  ;;  %5964 = vmatprep.subr.mxu0 %v6332_v18 }
 0x47e   :  { %5942 = vmatpush3.msra.mxu1 %v2005_v25  ;;  %5965 = vmatpush3.msra.mxu0 %v5407_v23  ;;  %v2438_v25 = vld [vmem:[%s9337_s11 + $0x48] sm:$0xff]  ;;  %v2437_v23 = vld [vmem:[%s9337_s11 + $0x40] sm:$0xff] }
 0x47f   :  { %5943 = vmatprep.subr.mxu1 %v6332_v18  ;;  %5966 = vmatprep.subr.mxu0 %v6332_v18 }
 0x480   :  { %5944 = vmatpush3.msra.mxu1 %v2004_v24  ;;  %5967 = vmatpush3.msra.mxu0 %v5406_v21  ;;  %v2436_v24 = vld [vmem:[%s9337_s11 + $0x38] sm:$0xff]  ;;  %v2435_v21 = vld [vmem:[%s9337_s11 + $0x30] sm:$0xff] }
 0x481   :  { %5945 = vmatprep.subr.mxu1 %v6332_v18  ;;  %5968 = vmatprep.subr.mxu0 %v6332_v18 }
 0x482   :  { %5946 = vmatpush3.msra.mxu1 %v2003_v19  ;;  %5969 = vmatpush3.msra.mxu0 %v5405_v20  ;;  %v2434_v19 = vld [vmem:[%s9337_s11 + $0x28] sm:$0xff]  ;;  %v2433_v20 = vld [vmem:[%s9337_s11 + $0x20] sm:$0xff] }
 0x483   :  { %5947 = vmatprep.subr.mxu1 %v6332_v18  ;;  %5970 = vmatprep.subr.mxu0 %v6332_v18 }
 0x484   :  { %5948 = vmatpush3.msra.mxu1 %v2002_v22  ;;  %5971 = vmatpush3.msra.mxu0 %v5404_v26  ;;  %v2432_v22 = vld [vmem:[%s9337_s11 + $0x18] sm:$0xff]  ;;  %v2431_v26 = vld [vmem:[%s9337_s11 + $0x10] sm:$0xff] }
 0x485   :  { %5949 = vmatprep.subr.mxu1 %v6332_v18  ;;  %5972 = vmatprep.subr.mxu0 %v6332_v18 }
 0x486   :  { %5950 = vmatpush3.msra.mxu1 %v2001_v27  ;;  %5973 = vmatpush3.msra.mxu0 %v5403_v28  ;;  %v2430_v27 = vld [vmem:[%s9337_s11 + $0x8] sm:$0xff]  ;;  %v2429_v28 = vld [vmem:[%s9337_s11] sm:$0xff] }
 0x487   :  { %5951 = vmatprep.subr.mxu1 %v6332_v18  ;;  %5974 = vmatprep.subr.mxu0 %v6332_v18 }
 0x488   :  { %5952 = vmatpush3.msra.mxu1 %v2000_v29  ;;  %5975 = vmatpush3.msra.mxu0 %v5402_v30  ;;  %v2532_v29 = vld [vmem:[%s9339_s13 + $0x78] sm:$0xff]  ;;  %v2531_v30 = vld [vmem:[%s9339_s13 + $0x70] sm:$0xff] }
 0x489   :  { %5953 = vmatprep.subr.mxu1 %v6332_v18  ;;  %5976 = vmatprep.subr.mxu0 %v6332_v18 }
 0x48a   :  { %5954 = vmatpush3.msra.mxu1 %v1999_v31  ;;  %5977 = vmatpush3.msra.mxu0 %v5401_v32  ;;  %v2530_v31 = vld [vmem:[%s9339_s13 + $0x68] sm:$0xff]  ;;  %v5460_v32 = vld [vmem:[%s9327_s1 + $0x78] sm:$0xff] }
 0x48b   :  { %5955 = vmatprep.mubr.msk.f32.mxu1 %vm6333_vm8, %v6332_v18  ;;  %5978 = vmatprep.mubr.msk.f32.mxu0 %vm6333_vm8, %v6332_v18 }
 0x48c   :  { %5981 = vmatprep.subr.mxu1 %v6332_v18  ;;  %6004 = vmatprep.subr.mxu0 %v6332_v18 }
 0x537   :  { %v1890_v33 = vpop.f32.mrf.mxu1  ;;  %v1981_v34 = vpop.f32.mrf.mxu0 }
 0x538   :  { %v1985_v36 = vmax.f32 %v1890_v33, %v1981_v34  ;;  %v2529_v33 = vld [vmem:[%s9339_s13 + $0x60] sm:$0xff]  ;;  %v2528_v34 = vld [vmem:[%s9339_s13 + $0x58] sm:$0xff] }
 0x539   :  { %v1892_v37 = vpop.f32.mrf.mxu1  ;;  %v1983_v38 = vpop.f32.mrf.mxu0 }
 0x53a   :  { %v1993_v39 = vadd.f32 %v5399_v35, %v1985_v36  ;;  %v2527_v35 = vld [vmem:[%s9339_s13 + $0x50] sm:$0xff]  ;;  %v2526_v36 = vld [vmem:[%s9339_s13 + $0x48] sm:$0xff]  ;;  %v2525_v37 = vld [vmem:[%s9339_s13 + $0x40] sm:$0xff] }
 0x53b   :  { %v2524_v38 = vld [vmem:[%s9339_s13 + $0x38] sm:$0xff] }
 0x53c   :  { %v1994_v40 = vmax.f32 %v1993_v39, 0.0  ;;  %v2523_v39 = vld [vmem:[%s9339_s13 + $0x30] sm:$0xff] }
 0x53e   :  { %1996 = vst.msk [vmem:[#allocation3] sm:$0x1f] %vm1995_vm9, %v1994_v40  ;;  %v2522_v40 = vld [vmem:[%s9339_s13 + $0x28] sm:$0xff] }
 0x545   :  { %v1998_v43 = vld [vmem:[#allocation3] sm:$0x1]  ;;  %v2084_v44 = vld [vmem:[#allocation3 + $0x1] sm:$0x1]  ;;  %v2170_v63 = vld [vmem:[#allocation3 + $0x2] sm:$0x1] }
 0x546   :  { %5956 = vmatmul.mubr.msk.f32.vlgmr.msra.gmra.mxu1 %vm2009_vm10, %v1998_v43  ;;  %5979 = vmatmul.mubr.msk.f32.vlgmr.msra.gmra.mxu0 %vm2009_vm10, %v2084_v44  ;;  %v2256_v0 = vld [vmem:[#allocation3 + $0x3] sm:$0x1]  ;;  %v2342_v11 = vld [vmem:[#allocation3 + $0x4] sm:$0x1]  ;;  %v2519_v43 = vld [vmem:[%s9339_s13 + $0x10] sm:$0xff] }
 0x547   :  { %5982 = vmatpush3.msra.mxu1 %v5421_v41  ;;  %6005 = vmatpush3.msra.mxu0 %v5432_v42  ;;  %v2521_v41 = vld [vmem:[%s9339_s13 + $0x20] sm:$0xff]  ;;  %v2520_v42 = vld [vmem:[%s9339_s13 + $0x18] sm:$0xff] }
 0x548   :  { %5983 = vmatprep.subr.mxu1 %v6332_v18  ;;  %6006 = vmatprep.subr.mxu0 %v6332_v18 }
 0x549   :  { %5984 = vmatpush3.msra.mxu1 %v5420_v45  ;;  %6007 = vmatpush3.msra.mxu0 %v5431_v46 }
 0x54a   :  { %5985 = vmatprep.subr.mxu1 %v6332_v18  ;;  %6008 = vmatprep.subr.mxu0 %v6332_v18 }
 0x54b   :  { %5986 = vmatpush3.msra.mxu1 %v5419_v47  ;;  %6009 = vmatpush3.msra.mxu0 %v5430_v48 }
 0x54c   :  { %5987 = vmatprep.subr.mxu1 %v6332_v18  ;;  %6010 = vmatprep.subr.mxu0 %v6332_v18 }
 0x54d   :  { %5988 = vmatpush3.msra.mxu1 %v5418_v49  ;;  %6011 = vmatpush3.msra.mxu0 %v5429_v50 }
 0x54e   :  { %5989 = vmatprep.subr.mxu1 %v6332_v18  ;;  %6012 = vmatprep.subr.mxu0 %v6332_v18 }
 0x54f   :  { %5990 = vmatpush3.msra.mxu1 %v5417_v51  ;;  %6013 = vmatpush3.msra.mxu0 %v5428_v52  ;;  %v1997_v52 = vld [vmem:[%s9336_s10] sm:$0x1] }
 0x550   :  { %5991 = vmatprep.subr.mxu1 %v6332_v18  ;;  %6014 = vmatprep.subr.mxu0 %v6332_v18 }
 0x551   :  { %5992 = vmatpush3.msra.mxu1 %v5416_v53  ;;  %6015 = vmatpush3.msra.mxu0 %v5427_v54 }
 0x552   :  { %5993 = vmatprep.subr.mxu1 %v6332_v18  ;;  %6016 = vmatprep.subr.mxu0 %v6332_v18 }
 0x553   :  { %5994 = vmatpush3.msra.mxu1 %v5415_v55  ;;  %6017 = vmatpush3.msra.mxu0 %v5426_v56 }
 0x554   :  { %5995 = vmatprep.subr.mxu1 %v6332_v18  ;;  %6018 = vmatprep.subr.mxu0 %v6332_v18 }
 0x555   :  { %5996 = vmatpush3.msra.mxu1 %v5414_v57  ;;  %6019 = vmatpush3.msra.mxu0 %v5425_v58 }
 0x556   :  { %5997 = vmatprep.subr.mxu1 %v6332_v18  ;;  %6020 = vmatprep.subr.mxu0 %v6332_v18 }
 0x557   :  { %5998 = vmatpush3.msra.mxu1 %v5413_v59  ;;  %6021 = vmatpush3.msra.mxu0 %v5424_v60 }
 0x558   :  { %5999 = vmatprep.subr.mxu1 %v6332_v18  ;;  %6022 = vmatprep.subr.mxu0 %v6332_v18 }
 0x559   :  { %6000 = vmatpush3.msra.mxu1 %v5412_v61  ;;  %6001 = vmatprep.mubr.msk.f32.mxu1 %vm6333_vm8, %v6332_v18  ;;  %v5459_v61 = vld [vmem:[%s9327_s1 + $0x70] sm:$0xff] }
 0x55a   :  { %6023 = vmatpush3.msra.mxu0 %v5423_v62  ;;  %6024 = vmatprep.mubr.msk.f32.mxu0 %vm6333_vm8, %v6332_v18  ;;  %v5458_v62 = vld [vmem:[%s9327_s1 + $0x68] sm:$0xff] }
 0x55b   :  { %6002 = vmatmul.mubr.msk.f32.vlgmr.msra.gmra.mxu1 %vm2009_vm10, %v2170_v63  ;;  %6025 = vmatmul.mubr.msk.f32.vlgmr.msra.gmra.mxu0 %vm2009_vm10, %v2256_v0  ;;  %v5457_v63 = vld [vmem:[%s9327_s1 + $0x60] sm:$0xff]  ;;  %v5456_v0 = vld [vmem:[%s9327_s1 + $0x58] sm:$0xff] }
 0x55c   :  { %6027 = vmatprep.subr.mxu1 %v6332_v18  ;;  %6047 = vmatprep.mubr.msk.f32.mxu1 %vm6333_vm8, %v6332_v18 }
 0x55d   :  { %6028 = vmatpush3.msra.mxu1 %v5443_v1  ;;  %6050 = vmatprep.subr.mxu0 %v6332_v18  ;;  %v5455_v1 = vld [vmem:[%s9327_s1 + $0x50] sm:$0xff] }
 0x55e   :  { %6029 = vmatprep.subr.mxu1 %v6332_v18  ;;  %6082 = vmatprep.mubr.msk.f32.mxu0 %vm6333_vm8, %v6332_v18 }
 0x55f   :  { %6030 = vmatpush3.msra.mxu1 %v5442_v2  ;;  %6051 = vmatpush3.msra.mxu0 %v2444_v12  ;;  %v5454_v2 = vld [vmem:[%s9327_s1 + $0x48] sm:$0xff] }
 0x560   :  { %6031 = vmatprep.subr.mxu1 %v6332_v18  ;;  %6052 = vmatprep.subr.mxu0 %v6332_v18  ;;  %v5478_v12 = vld [vmem:[%s9327_s1 + $0xa8] sm:$0xff] }
 0x561   :  { %6032 = vmatpush3.msra.mxu1 %v5441_v3  ;;  %6053 = vmatpush3.msra.mxu0 %v2443_v13  ;;  %v5453_v3 = vld [vmem:[%s9327_s1 + $0x40] sm:$0xff] }
 0x562   :  { %6033 = vmatprep.subr.mxu1 %v6332_v18  ;;  %6054 = vmatprep.subr.mxu0 %v6332_v18  ;;  %v5477_v13 = vld [vmem:[%s9327_s1 + $0xa0] sm:$0xff] }
 0x563   :  { %6034 = vmatpush3.msra.mxu1 %v5440_v4  ;;  %6055 = vmatpush3.msra.mxu0 %v2442_v14  ;;  %v5449_v4 = vld [vmem:[%s9326_s0 + $0x21] sm:$0xff]  ;;  %v5452_v14 = vld [vmem:[%s9326_s0 + $0x39] sm:$0xf] }
 0x564   :  { %6035 = vmatprep.subr.mxu1 %v6332_v18  ;;  %6056 = vmatprep.subr.mxu0 %v6332_v18 }
 0x565   :  { %6036 = vmatpush3.msra.mxu1 %v5439_v5  ;;  %6057 = vmatpush3.msra.mxu0 %v2441_v15  ;;  %v5450_v5 = vld [vmem:[%s9326_s0 + $0x29] sm:$0xff]  ;;  %v5476_v15 = vld [vmem:[%s9327_s1 + $0x98] sm:$0xff] }
 0x566   :  { %6037 = vmatprep.subr.mxu1 %v6332_v18  ;;  %6058 = vmatprep.subr.mxu0 %v6332_v18 }
 0x567   :  { %6038 = vmatpush3.msra.mxu1 %v5438_v6  ;;  %6059 = vmatpush3.msra.mxu0 %v2440_v16  ;;  %v2518_v6 = vld [vmem:[%s9339_s13 + $0x8] sm:$0xff]  ;;  %v5475_v16 = vld [vmem:[%s9327_s1 + $0x90] sm:$0xff] }
 0x568   :  { %6039 = vmatprep.subr.mxu1 %v6332_v18  ;;  %6060 = vmatprep.subr.mxu0 %v6332_v18 }
 0x569   :  { %6040 = vmatpush3.msra.mxu1 %v5437_v7  ;;  %6061 = vmatpush3.msra.mxu0 %v2439_v17  ;;  %v2517_v7 = vld [vmem:[%s9339_s13] sm:$0xff]  ;;  %v5474_v17 = vld [vmem:[%s9327_s1 + $0x88] sm:$0xff] }
 0x56a   :  { %6041 = vmatprep.subr.mxu1 %v6332_v18  ;;  %6062 = vmatprep.subr.mxu0 %v6332_v18 }
 0x56b   :  { %6042 = vmatpush3.msra.mxu1 %v5436_v8  ;;  %6063 = vmatpush3.msra.mxu0 %v2438_v25  ;;  %v5451_v8 = vld [vmem:[%s9326_s0 + $0x31] sm:$0xff]  ;;  %v5473_v25 = vld [vmem:[%s9327_s1 + $0x80] sm:$0xff] }
 0x56c   :  { %6043 = vmatprep.subr.mxu1 %v6332_v18  ;;  %6064 = vmatprep.subr.mxu0 %v6332_v18 }
 0x56d   :  { %6044 = vmatpush3.msra.mxu1 %v5435_v9  ;;  %6065 = vmatpush3.msra.mxu0 %v2437_v23  ;;  %v2617_v9 = vld [vmem:[%s9327_s1 + $0x38] sm:$0xff]  ;;  %v5469_v23 = vld [vmem:[%s9326_s0 + $0x22] sm:$0xff] }
 0x56e   :  { %6045 = vmatprep.subr.mxu1 %v6332_v18  ;;  %6066 = vmatprep.subr.mxu0 %v6332_v18 }
 0x56f   :  { %6046 = vmatpush3.msra.mxu1 %v5434_v10  ;;  %6067 = vmatpush3.msra.mxu0 %v2436_v24  ;;  %v5480_v10 = vld [vmem:[%s9327_s1 + $0xb8] sm:$0xff]  ;;  %v5470_v24 = vld [vmem:[%s9326_s0 + $0x2a] sm:$0xff] }
 0x570   :  { %6048 = vmatmul.mubr.msk.f32.vlgmr.msra.gmra.mxu1 %vm2009_vm10, %v2342_v11  ;;  %6085 = vmatprep.subr.mxu1 %v6332_v18  ;;  %v5479_v11 = vld [vmem:[%s9327_s1 + $0xb0] sm:$0xff] }
 0x571   :  { %6117 = vmatprep.mubr.msk.f32.mxu1 %vm6333_vm8, %v6332_v18  ;;  %6068 = vmatprep.subr.mxu0 %v6332_v18 }
 0x572   :  { %6069 = vmatpush3.msra.mxu0 %v2435_v21  ;;  %6086 = vmatpush3.msra.mxu1 %v2532_v29  ;;  %v5471_v21 = vld [vmem:[%s9326_s0 + $0x32] sm:$0xff] }
 0x573   :  { %6070 = vmatprep.subr.mxu0 %v6332_v18  ;;  %6087 = vmatprep.subr.mxu1 %v6332_v18  ;;  %v5507_v29 = vld [vmem:[%s9327_s1 + $0x110] sm:$0xff] }
 0x574   :  { %6071 = vmatpush3.msra.mxu0 %v2434_v19  ;;  %6088 = vmatpush3.msra.mxu1 %v2531_v30  ;;  %v5512_v19 = vld [vmem:[%s9327_s1 + $0x138] sm:$0xff]  ;;  %v5506_v30 = vld [vmem:[%s9327_s1 + $0x108] sm:$0xff] }
 0x575   :  { %6072 = vmatprep.subr.mxu0 %v6332_v18  ;;  %6089 = vmatprep.subr.mxu1 %v6332_v18 }
 0x576   :  { %6073 = vmatpush3.msra.mxu0 %v2433_v20  ;;  %6090 = vmatpush3.msra.mxu1 %v2530_v31  ;;  %v5511_v20 = vld [vmem:[%s9327_s1 + $0x130] sm:$0xff]  ;;  %v5505_v31 = vld [vmem:[%s9327_s1 + $0x100] sm:$0xff] }
 0x577   :  { %6074 = vmatprep.subr.mxu0 %v6332_v18  ;;  %6091 = vmatprep.subr.mxu1 %v6332_v18 }
 0x578   :  { %6075 = vmatpush3.msra.mxu0 %v2432_v22  ;;  %6092 = vmatpush3.msra.mxu1 %v2529_v33  ;;  %v5510_v22 = vld [vmem:[%s9327_s1 + $0x128] sm:$0xff] }
 0x579   :  { %6076 = vmatprep.subr.mxu0 %v6332_v18  ;;  %6093 = vmatprep.subr.mxu1 %v6332_v18  ;;  %v5502_v33 = vld [vmem:[%s9326_s0 + $0x2c] sm:$0xff] }
 0x57a   :  { %6077 = vmatpush3.msra.mxu0 %v2431_v26  ;;  %6094 = vmatpush3.msra.mxu1 %v2528_v34  ;;  %v5509_v26 = vld [vmem:[%s9327_s1 + $0x120] sm:$0xff]  ;;  %v5503_v34 = vld [vmem:[%s9326_s0 + $0x34] sm:$0xff] }
 0x57b   :  { %6078 = vmatprep.subr.mxu0 %v6332_v18  ;;  %6095 = vmatprep.subr.mxu1 %v6332_v18 }
 0x57c   :  { %6079 = vmatpush3.msra.mxu0 %v2430_v27  ;;  %6096 = vmatpush3.msra.mxu1 %v2527_v35  ;;  %v5472_v27 = vld [vmem:[%s9326_s0 + $0x3a] sm:$0xf] }
 0x57d   :  { %6080 = vmatprep.subr.mxu0 %v6332_v18  ;;  %6097 = vmatprep.subr.mxu1 %v6332_v18  ;;  %v5504_v35 = vld [vmem:[%s9326_s0 + $0x3c] sm:$0xf] }
 0x57e   :  { %6081 = vmatpush3.msra.mxu0 %v2429_v28  ;;  %6098 = vmatpush3.msra.mxu1 %v2526_v36  ;;  %v5508_v28 = vld [vmem:[%s9327_s1 + $0x118] sm:$0xff]  ;;  %v2445_v36 = vld [vmem:[%s9338_s12] sm:$0x1] }
 0x57f   :  { %2666 = vmatprep.subr.mxu0 %v5460_v32  ;;  %6099 = vmatprep.subr.mxu1 %v6332_v18  ;;  %v5501_v32 = vld [vmem:[%s9326_s0 + $0x24] sm:$0xff] }
 0x580   :  { %6100 = vmatpush3.msra.mxu1 %v2525_v37 }
 0x581   :  { %6101 = vmatprep.subr.mxu1 %v6332_v18 }
 0x582   :  { %6102 = vmatpush3.msra.mxu1 %v2524_v38 }
 0x583   :  { %6103 = vmatprep.subr.mxu1 %v6332_v18 }
 0x584   :  { %6104 = vmatpush3.msra.mxu1 %v2523_v39 }
 0x585   :  { %6105 = vmatprep.subr.mxu1 %v6332_v18 }
 0x586   :  { %6106 = vmatpush3.msra.mxu1 %v2522_v40 }
 0x587   :  { %6107 = vmatprep.subr.mxu1 %v6332_v18 }
 0x588   :  { %6108 = vmatpush3.msra.mxu1 %v2521_v41  ;;  %v2616_v41 = vld [vmem:[%s9327_s1 + $0x30] sm:$0xff] }
 0x589   :  { %6109 = vmatprep.subr.mxu1 %v6332_v18 }
 0x58a   :  { %6110 = vmatpush3.msra.mxu1 %v2520_v42  ;;  %v2615_v42 = vld [vmem:[%s9327_s1 + $0x28] sm:$0xff] }
 0x58b   :  { %6111 = vmatprep.subr.mxu1 %v6332_v18 }
 0x58c   :  { %6112 = vmatpush3.msra.mxu1 %v2519_v43  ;;  %v2614_v43 = vld [vmem:[%s9327_s1 + $0x20] sm:$0xff] }
 0x58d   :  { %6113 = vmatprep.subr.mxu1 %v6332_v18 }
 0x58e   :  { %6114 = vmatpush3.msra.mxu1 %v2518_v6 }
 0x58f   :  { %6115 = vmatprep.subr.mxu1 %v6332_v18 }
 0x590   :  { %6116 = vmatpush3.msra.mxu1 %v2517_v7 }
 0x591   :  { %2767 = vmatprep.subr.mxu1 %v2617_v9 }
 0x606   :  { %v2079_v44 = vpop.f32.mrf.mxu1  ;;  %v2165_v45 = vpop.f32.mrf.mxu0 }
 0x607   :  { %v2083_v53 = vadd.f32 %v2079_v44, %v1997_v52  ;;  %v2613_v44 = vld [vmem:[%s9327_s1 + $0x18] sm:$0xff]  ;;  %v5493_v52 = vld [vmem:[%s9327_s1 + $0xe0] sm:$0xff] }
 0x608   :  { %v5957_v46 = vpop.f32.mrf.mxu1  ;;  %v5980_v47 = vpop.f32.mrf.mxu0 }
 0x609   :  { %v2169_v54 = vadd.f32 %v2165_v45, %v2083_v53  ;;  %v2612_v45 = vld [vmem:[%s9327_s1 + $0x10] sm:$0xff]  ;;  %v2611_v46 = vld [vmem:[%s9327_s1 + $0x8] sm:$0xff]  ;;  %v2610_v47 = vld [vmem:[%s9327_s1] sm:$0xff] }
 0x60a   :  { %v5446_v53 = vld [vmem:[%s9326_s0 + $0x28] sm:$0xff] }
 0x61b   :  { %v2251_v48 = vpop.f32.mrf.mxu1  ;;  %v2337_v49 = vpop.f32.mrf.mxu0 }
 0x61c   :  { %v2255_v55 = vadd.f32 %v2251_v48, %v2169_v54  ;;  %v5445_v48 = vld [vmem:[%s9326_s0 + $0x20] sm:$0xff]  ;;  %v5492_v54 = vld [vmem:[%s9327_s1 + $0xd8] sm:$0xff] }
 0x61d   :  { %v6003_v50 = vpop.f32.mrf.mxu1  ;;  %v6026_v51 = vpop.f32.mrf.mxu0 }
 0x61e   :  { %v2341_v56 = vadd.f32 %v2337_v49, %v2255_v55  ;;  %v5496_v49 = vld [vmem:[%s9327_s1 + $0xf8] sm:$0xff]  ;;  %v5495_v50 = vld [vmem:[%s9327_s1 + $0xf0] sm:$0xff]  ;;  %v5494_v51 = vld [vmem:[%s9327_s1 + $0xe8] sm:$0xff] }
 0x61f   :  { %v5491_v55 = vld [vmem:[%s9327_s1 + $0xd0] sm:$0xff] }
 0x630   :  { %v2423_v57 = vpop.f32.mrf.mxu1 }
 0x631   :  { %v2427_v58 = vadd.f32 %v2423_v57, %v2341_v56  ;;  %v5490_v56 = vld [vmem:[%s9327_s1 + $0xc8] sm:$0xff]  ;;  %v5489_v57 = vld [vmem:[%s9327_s1 + $0xc0] sm:$0xff] }
 0x632   :  { %v6049_v59 = vpop.f32.mrf.mxu1 }
 0x633   :  { %v2428_v60 = vmax.f32 %v2427_v58, 0.0  ;;  %v5447_v58 = vld [vmem:[%s9326_s0 + $0x30] sm:$0xff]  ;;  %v5448_v59 = vld [vmem:[%s9326_s0 + $0x38] sm:$0xf] }
 0x635   :  { %6083 = vmatmul.mubr.f32.vlgmr.msra.gmra.mxu0 %v2428_v60  ;;  %v5485_v60 = vld [vmem:[%s9326_s0 + $0x23] sm:$0xff] }
 0x636   :  { %2667 = vmatpush1.msra.mxu0 %v5459_v61  ;;  %2706 = vmatprep.mubr.f32.mxu0 %v6332_v18  ;;  %v5486_v61 = vld [vmem:[%s9326_s0 + $0x2b] sm:$0xff] }
 0x637   :  { %2668 = vmatprep.subr.mxu0 %v5458_v62  ;;  %v5487_v62 = vld [vmem:[%s9326_s0 + $0x33] sm:$0xff] }
 0x638   :  { %2669 = vmatpush1.msra.mxu0 %v5457_v63  ;;  %v5488_v63 = vld [vmem:[%s9326_s0 + $0x3b] sm:$0xf] }
 0x639   :  { %2670 = vmatprep.subr.mxu0 %v5456_v0 }
 0x63a   :  { %2671 = vmatpush1.msra.mxu0 %v5455_v1 }
 0x63b   :  { %2672 = vmatprep.subr.mxu0 %v5454_v2 }
 0x63c   :  { %2673 = vmatpush1.msra.mxu0 %v5453_v3 }
 0x63d   :  { %5461 = vmatmul.mubr.msk.f32.vlgmr.msra.gmra.mxu0 %vm76_vm0, %v5449_v4  ;;  %2880 = vmatprep.subr.mxu0 %v5480_v10 }
 0x63e   :  { %2712 = vmatprep.mubr.f32.mxu0 %v6332_v18  ;;  %2881 = vmatpush1.msra.mxu0 %v5479_v11 }
 0x63f   :  { %2882 = vmatprep.subr.mxu0 %v5478_v12 }
 0x640   :  { %2883 = vmatpush1.msra.mxu0 %v5477_v13  ;;  %v2533_v13 = vld [vmem:[%s9340_s14] sm:$0x1] }
 0x641   :  { %5462 = vmatmul.mubr.msk.f32.gmra.mxu0 %vm76_vm0, %v5450_v5  ;;  %2884 = vmatprep.subr.mxu0 %v5476_v15 }
 0x642   :  { %2718 = vmatprep.mubr.f32.mxu0 %v6332_v18  ;;  %2885 = vmatpush1.msra.mxu0 %v5475_v16 }
 0x643   :  { %2886 = vmatprep.subr.mxu0 %v5474_v17 }
 0x644   :  { %2887 = vmatpush1.msra.mxu0 %v5473_v25 }
 0x645   :  { %5463 = vmatmul.mubr.msk.f32.gmra.mxu0 %vm76_vm0, %v5451_v8  ;;  %3122 = vmatprep.subr.mxu0 %v5512_v19 }
 0x646   :  { %2724 = vmatprep.mubr.f32.mxu0 %v6332_v18 }
 0x649   :  { %5464 = vmatmul.mubr.msk.f32.gmra.mxu0 %vm76_vm0, %v5452_v14 }
 0x64a   :  { %2920 = vmatprep.mubr.f32.mxu0 %v6332_v18 }
 0x64d   :  { %5481 = vmatmul.mubr.msk.f32.vlgmr.msra.gmra.mxu0 %vm76_vm0, %v5469_v23 }
 0x64e   :  { %2926 = vmatprep.mubr.f32.mxu0 %v6332_v18  ;;  %3123 = vmatpush1.msra.mxu0 %v5511_v20 }
 0x64f   :  { %3124 = vmatprep.subr.mxu0 %v5510_v22 }
 0x650   :  { %3125 = vmatpush1.msra.mxu0 %v5509_v26 }
 0x651   :  { %5482 = vmatmul.mubr.msk.f32.gmra.mxu0 %vm76_vm0, %v5470_v24  ;;  %3126 = vmatprep.subr.mxu0 %v5508_v28 }
 0x652   :  { %2932 = vmatprep.mubr.f32.mxu0 %v6332_v18  ;;  %3127 = vmatpush1.msra.mxu0 %v5507_v29 }
 0x653   :  { %3128 = vmatprep.subr.mxu0 %v5506_v30 }
 0x654   :  { %3129 = vmatpush1.msra.mxu0 %v5505_v31 }
 0x655   :  { %5483 = vmatmul.mubr.msk.f32.gmra.mxu0 %vm76_vm0, %v5471_v21 }
 0x656   :  { %2938 = vmatprep.mubr.f32.mxu0 %v6332_v18 }
 0x659   :  { %5484 = vmatmul.mubr.msk.f32.gmra.mxu0 %vm76_vm0, %v5472_v27 }
 0x65a   :  { %3162 = vmatprep.mubr.f32.mxu0 %v6332_v18 }
 0x65d   :  { %5513 = vmatmul.mubr.msk.f32.vlgmr.msra.gmra.mxu0 %vm76_vm0, %v5501_v32 }
 0x65e   :  { %3168 = vmatprep.mubr.f32.mxu0 %v6332_v18 }
 0x661   :  { %5514 = vmatmul.mubr.msk.f32.gmra.mxu0 %vm76_vm0, %v5502_v33 }
 0x662   :  { %3174 = vmatprep.mubr.f32.mxu0 %v6332_v18 }
 0x665   :  { %5515 = vmatmul.mubr.msk.f32.gmra.mxu0 %vm76_vm0, %v5503_v34 }
 0x666   :  { %3180 = vmatprep.mubr.f32.mxu0 %v6332_v18 }
 0x669   :  { %5516 = vmatmul.mubr.msk.f32.gmra.mxu0 %vm76_vm0, %v5504_v35 }
 0x66a   :  { %3358 = vmatprep.mubr.f32.mxu0 %v6332_v18 }
 0x6f5   :  { %v2512_v37 = vpop.f32.mrf.mxu0 }
 0x6f6   :  { %v2513_v38 = vadd.f32 %v2512_v37, %v2445_v36 }
 0x6f7   :  { %v6084_v39 = vpop.f32.mrf.mxu0 }
 0x6f8   :  { %v2516_v40 = vmax.f32 %v2513_v38, 0.0 }
 0x6fa   :  { %6118 = vmatmul.mubr.f32.vlgmr.msra.gmra.mxu1 %v2516_v40 }
 0x6fb   :  { %2768 = vmatpush1.msra.mxu1 %v2616_v41  ;;  %2807 = vmatprep.mubr.f32.mxu1 %v6332_v18 }
 0x6fc   :  { %2769 = vmatprep.subr.mxu1 %v2615_v42 }
 0x6fd   :  { %2770 = vmatpush1.msra.mxu1 %v2614_v43  ;;  %v2708_v0 = vpop.f32.mrf.mxu0 }
 0x6fe   :  { %2771 = vmatprep.subr.mxu1 %v2613_v44 }
 0x6ff   :  { %2772 = vmatpush1.msra.mxu1 %v2612_v45  ;;  %v2710_v1 = vpop.f32.mrf.mxu0 }
 0x700   :  { %2773 = vmatprep.subr.mxu1 %v2611_v46 }
 0x701   :  { %2774 = vmatpush1.msra.mxu1 %v2610_v47  ;;  %v2714_v2 = vpop.f32.mrf.mxu0 }
 0x702   :  { %5465 = vmatmul.mubr.msk.f32.vlgmr.msra.gmra.mxu1 %vm76_vm0, %v5445_v48  ;;  %3001 = vmatprep.subr.mxu1 %v5496_v49 }
 0x703   :  { %2813 = vmatprep.mubr.f32.mxu1 %v6332_v18  ;;  %3002 = vmatpush1.msra.mxu1 %v5495_v50  ;;  %v2716_v3 = vpop.f32.mrf.mxu0 }
 0x704   :  { %3003 = vmatprep.subr.mxu1 %v5494_v51 }
 0x705   :  { %3004 = vmatpush1.msra.mxu1 %v5493_v52  ;;  %v2720_v4 = vpop.f32.mrf.mxu0 }
 0x706   :  { %5466 = vmatmul.mubr.msk.f32.gmra.mxu1 %vm76_vm0, %v5446_v53  ;;  %3005 = vmatprep.subr.mxu1 %v5492_v54 }
 0x707   :  { %2819 = vmatprep.mubr.f32.mxu1 %v6332_v18  ;;  %3006 = vmatpush1.msra.mxu1 %v5491_v55  ;;  %v2722_v5 = vpop.f32.mrf.mxu0 }
 0x708   :  { %3007 = vmatprep.subr.mxu1 %v5490_v56 }
 0x709   :  { %3008 = vmatpush1.msra.mxu1 %v5489_v57  ;;  %v2726_v6 = vpop.f32.mrf.mxu0 }
 0x70a   :  { %5467 = vmatmul.mubr.msk.f32.gmra.mxu1 %vm76_vm0, %v5447_v58 }
 0x70b   :  { %2825 = vmatprep.mubr.f32.mxu1 %v6332_v18  ;;  %v2728_v7 = vpop.f32.mrf.mxu0 }
 0x70d   :  { %v2922_v8 = vpop.f32.mrf.mxu0 }
 0x70e   :  { %5468 = vmatmul.mubr.msk.f32.gmra.mxu1 %vm76_vm0, %v5448_v59 }
 0x70f   :  { %3041 = vmatprep.mubr.f32.mxu1 %v6332_v18  ;;  %v2924_v9 = vpop.f32.mrf.mxu0 }
 0x711   :  { %v2928_v10 = vpop.f32.mrf.mxu0 }
 0x712   :  { %5497 = vmatmul.mubr.msk.f32.vlgmr.msra.gmra.mxu1 %vm76_vm0, %v5485_v60 }
 0x713   :  { %3047 = vmatprep.mubr.f32.mxu1 %v6332_v18  ;;  %v2930_v11 = vpop.f32.mrf.mxu0 }
 0x715   :  { %v2934_v12 = vpop.f32.mrf.mxu0 }
 0x716   :  { %5498 = vmatmul.mubr.msk.f32.gmra.mxu1 %vm76_vm0, %v5486_v61 }
 0x717   :  { %3053 = vmatprep.mubr.f32.mxu1 %v6332_v18  ;;  %v2936_v15 = vpop.f32.mrf.mxu0 }
 0x719   :  { %v2940_v25 = vpop.f32.mrf.mxu0 }
 0x71a   :  { %5499 = vmatmul.mubr.msk.f32.gmra.mxu1 %vm76_vm0, %v5487_v62 }
 0x71b   :  { %3059 = vmatprep.mubr.f32.mxu1 %v6332_v18  ;;  %v2942_v24 = vpop.f32.mrf.mxu0 }
 0x71d   :  { %v3164_v20 = vpop.f32.mrf.mxu0 }
 0x71e   :  { %5500 = vmatmul.mubr.msk.f32.gmra.mxu1 %vm76_vm0, %v5488_v63 }
 0x71f   :  { %3273 = vmatprep.mubr.f32.mxu1 %v6332_v18  ;;  %v3166_v27 = vpop.f32.mrf.mxu0 }
 0x721   :  { %v3170_v30 = vpop.f32.mrf.mxu0 }
 0x723   :  { %v3172_v33 = vpop.f32.mrf.mxu0 }
 0x725   :  { %v3176_v36 = vpop.f32.mrf.mxu0 }
 0x727   :  { %v3178_v40 = vpop.f32.mrf.mxu0 }
 0x729   :  { %v3182_v49 = vpop.f32.mrf.mxu0 }
 0x72b   :  { %v3184_v62 = vpop.f32.mrf.mxu0 }
 0x7ba   :  { %v2600_v14 = vpop.f32.mrf.mxu1 }
 0x7bb   :  { %v2601_v16 = vadd.f32 %v2600_v14, %v2533_v13  ;;  %v3195_v13 = vld [vmem:[%s9329_s3] sm:$0xff]  ;;  %v5521_v14 = vld [vmem:[%s9329_s3 + $0x10] sm:$0xff] }
 0x7bc   :  { %v6119_v17 = vpop.f32.mrf.mxu1 }
 0x7bd   :  { %2604 = vst [vmem:[#allocation4] sm:$0x1] %v2601_v16  ;;  %v5544_v16 = vld [vmem:[%s9330_s4 + $0x158] sm:$0xff]  ;;  %v3196_v17 = vld [vmem:[%s9329_s3 + $0x8] sm:$0x3f] }
 0x7c2   :  { %v2809_v23 = vpop.f32.mrf.mxu1 }
 0x7c3   :  { %v2810_v53 = vadd.f32 %v2809_v23, %v2708_v0  ;;  %v3389_v23 = vld [vmem:[%s9330_s4 + $0x70] sm:$0xff] }
 0x7c4   :  { %v2811_v21 = vpop.f32.mrf.mxu1 }
 0x7c5   :  { %v2812_v50 = vadd.f32 %v2811_v21, %v2710_v1  ;;  %v3388_v21 = vld [vmem:[%s9330_s4 + $0x68] sm:$0xff] }
 0x7c6   :  { %v2815_v19 = vpop.f32.mrf.mxu1 }
 0x7c7   :  { %v2816_v46 = vadd.f32 %v2815_v19, %v2714_v2  ;;  %v2946_v63 = vadd.f32 %v2924_v9, %v2812_v50  ;;  %v2945_v2 = vadd.f32 %v2922_v8, %v2810_v53  ;;  %v5542_v19 = vld [vmem:[%s9330_s4 + $0x148] sm:$0xff]  ;;  %v3402_v50 = vld [vmem:[%s9330_s4 + $0xd8] sm:$0xff]  ;;  %v5555_v53 = vld [vmem:[%s9330_s4 + $0x1b0] sm:$0xff] }
 0x7c8   :  { %v2817_v22 = vpop.f32.mrf.mxu1 }
 0x7c9   :  { %v2818_v45 = vadd.f32 %v2817_v22, %v2716_v3  ;;  %v2947_v60 = vadd.f32 %v2928_v10, %v2816_v46  ;;  %v5541_v22 = vld [vmem:[%s9330_s4 + $0x140] sm:$0xff]  ;;  %v3376_v46 = vld [vmem:[%s9330_s4 + $0x8] sm:$0xff] }
 0x7ca   :  { %v2821_v26 = vpop.f32.mrf.mxu1 }
 0x7cb   :  { %v2822_v43 = vadd.f32 %v2821_v26, %v2720_v4  ;;  %v2948_v57 = vadd.f32 %v2930_v11, %v2818_v45  ;;  %v3386_v26 = vld [vmem:[%s9330_s4 + $0x58] sm:$0xff]  ;;  %v5531_v45 = vld [vmem:[%s9330_s4 + $0xf0] sm:$0xff] }
 0x7cc   :  { %v2823_v28 = vpop.f32.mrf.mxu1 }
 0x7cd   :  { %v2824_v41 = vadd.f32 %v2823_v28, %v2722_v5  ;;  %v2949_v54 = vadd.f32 %v2934_v12, %v2822_v43  ;;  %v3385_v28 = vld [vmem:[%s9330_s4 + $0x50] sm:$0xff]  ;;  %v5532_v43 = vld [vmem:[%s9330_s4 + $0xf8] sm:$0xff] }
 0x7ce   :  { %v2827_v29 = vpop.f32.mrf.mxu1 }
 0x7cf   :  { %v2828_v38 = vadd.f32 %v2827_v29, %v2726_v6  ;;  %v2950_v51 = vadd.f32 %v2936_v15, %v2824_v41  ;;  %v3390_v15 = vld [vmem:[%s9330_s4 + $0x78] sm:$0xff]  ;;  %v5539_v29 = vld [vmem:[%s9330_s4 + $0x130] sm:$0xff]  ;;  %v5533_v41 = vld [vmem:[%s9330_s4 + $0x100] sm:$0xff] }
 0x7d0   :  { %v2829_v31 = vpop.f32.mrf.mxu1 }
 0x7d1   :  { %v2830_v42 = vadd.f32 %v2829_v31, %v2728_v7  ;;  %v2951_v47 = vadd.f32 %v2940_v25, %v2828_v38  ;;  %v5522_v25 = vld [vmem:[%s9329_s3 + $0x18] sm:$0x3f]  ;;  %v5538_v31 = vld [vmem:[%s9330_s4 + $0x128] sm:$0xff] }
 0x7d2   :  { %v3043_v32 = vpop.f32.mrf.mxu1  ;;  %v3380_v38 = vld [vmem:[%s9330_s4 + $0x28] sm:$0xff] }
 0x7d3   :  { %v2952_v52 = vadd.f32 %v2942_v24, %v2830_v42  ;;  %v3066_v0 = vadd.f32 %v3043_v32, %v2945_v2  ;;  %v5543_v24 = vld [vmem:[%s9330_s4 + $0x150] sm:$0xff]  ;;  %v3383_v32 = vld [vmem:[%s9330_s4 + $0x40] sm:$0xff]  ;;  %v3378_v42 = vld [vmem:[%s9330_s4 + $0x18] sm:$0xff] }
 0x7d4   :  { %v3045_v34 = vpop.f32.mrf.mxu1  ;;  %v3394_v2 = vld [vmem:[%s9330_s4 + $0x98] sm:$0xff] }
 0x7d5   :  { %v3067_v7 = vadd.f32 %v3045_v34, %v2946_v63  ;;  %v3187_v11 = vadd.f32 %v3164_v20, %v3066_v0  ;;  %v3387_v20 = vld [vmem:[%s9330_s4 + $0x60] sm:$0xff]  ;;  %v3382_v34 = vld [vmem:[%s9330_s4 + $0x38] sm:$0xff]  ;;  %v5550_v63 = vld [vmem:[%s9330_s4 + $0x188] sm:$0xff] }
 0x7d6   :  { %v3049_v35 = vpop.f32.mrf.mxu1  ;;  %v5546_v0 = vld [vmem:[%s9330_s4 + $0x168] sm:$0xff] }
 0x7d7   :  { %v3068_v5 = vadd.f32 %v3049_v35, %v2947_v60  ;;  %v3188_v8 = vadd.f32 %v3166_v27, %v3067_v7  ;;  %v5540_v27 = vld [vmem:[%s9330_s4 + $0x138] sm:$0xff]  ;;  %v3397_v60 = vld [vmem:[%s9330_s4 + $0xb0] sm:$0xff] }
 0x7d8   :  { %v3051_v37 = vpop.f32.mrf.mxu1  ;;  %v5536_v35 = vld [vmem:[%s9330_s4 + $0x118] sm:$0xff]  ;;  %v5547_v7 = vld [vmem:[%s9330_s4 + $0x170] sm:$0xff] }
 0x7d9   :  { %v3069_v4 = vadd.f32 %v3051_v37, %v2948_v57  ;;  %v3189_v9 = vadd.f32 %v3170_v30, %v3068_v5  ;;  %v3384_v30 = vld [vmem:[%s9330_s4 + $0x48] sm:$0xff]  ;;  %v5535_v37 = vld [vmem:[%s9330_s4 + $0x110] sm:$0xff]  ;;  %v5553_v57 = vld [vmem:[%s9330_s4 + $0x1a0] sm:$0xff] }
 0x7da   :  { %v3055_v39 = vpop.f32.mrf.mxu1  ;;  %v5548_v5 = vld [vmem:[%s9330_s4 + $0x178] sm:$0xff] }
 0x7db   :  { %v3070_v61 = vadd.f32 %v3055_v39, %v2949_v54  ;;  %v3190_v10 = vadd.f32 %v3172_v33, %v3069_v4  ;;  %v5537_v33 = vld [vmem:[%s9330_s4 + $0x120] sm:$0xff]  ;;  %v5534_v39 = vld [vmem:[%s9330_s4 + $0x108] sm:$0xff] }
 0x7dc   :  { %v3057_v44 = vpop.f32.mrf.mxu1  ;;  %v3400_v54 = vld [vmem:[%s9330_s4 + $0xc8] sm:$0xff]  ;;  %v3395_v4 = vld [vmem:[%s9330_s4 + $0xa0] sm:$0xff] }
 0x7dd   :  { %v3071_v58 = vadd.f32 %v3057_v44, %v2950_v51  ;;  %v3191_v12 = vadd.f32 %v3176_v36, %v3070_v61  ;;  %v3381_v36 = vld [vmem:[%s9330_s4 + $0x30] sm:$0xff]  ;;  %v5556_v51 = vld [vmem:[%s9330_s4 + $0x1b8] sm:$0xff] }
 0x7de   :  { %v3061_v48 = vpop.f32.mrf.mxu1  ;;  %v3377_v44 = vld [vmem:[%s9330_s4 + $0x10] sm:$0xff] }
 0x7df   :  { %v3072_v55 = vadd.f32 %v3061_v48, %v2951_v47  ;;  %v3192_v1 = vadd.f32 %v3178_v40, %v3071_v58  ;;  %v3379_v40 = vld [vmem:[%s9330_s4 + $0x20] sm:$0xff]  ;;  %v5530_v47 = vld [vmem:[%s9330_s4 + $0xe8] sm:$0xff]  ;;  %v3398_v58 = vld [vmem:[%s9330_s4 + $0xb8] sm:$0xff] }
 0x7e0   :  { %v3063_v56 = vpop.f32.mrf.mxu1  ;;  %v3375_v48 = vld [vmem:[%s9330_s4] sm:$0xff]  ;;  %v5551_v61 = vld [vmem:[%s9330_s4 + $0x190] sm:$0xff] }
 0x7e1   :  { %v3073_v59 = vadd.f32 %v3063_v56, %v2952_v52  ;;  %v3193_v6 = vadd.f32 %v3182_v49, %v3072_v55  ;;  %v5529_v49 = vld [vmem:[%s9330_s4 + $0xe0] sm:$0xff]  ;;  %v3401_v52 = vld [vmem:[%s9330_s4 + $0xd0] sm:$0xff]  ;;  %v5554_v55 = vld [vmem:[%s9330_s4 + $0x1a8] sm:$0xff] }
 0x7e2   :  { %v3399_v56 = vld [vmem:[%s9330_s4 + $0xc0] sm:$0xff] }
 0x7e3   :  { %v3194_v3 = vadd.f32 %v3184_v62, %v3073_v59  ;;  %v5552_v59 = vld [vmem:[%s9330_s4 + $0x198] sm:$0xff]  ;;  %v3396_v62 = vld [vmem:[%s9330_s4 + $0xa8] sm:$0xff] }
 0x7e5   :  { %5517 = vmatprep.subr.msk.mxu1 %vm654_vm1, %v3194_v3  ;;  %5523 = vmatprep.subr.msk.mxu0 %vm654_vm1, %v3194_v3  ;;  %v5549_v3 = vld [vmem:[%s9330_s4 + $0x180] sm:$0xff] }
 0x7e6   :  { %5518 = vmatpush1.msk.msra.mxu1 %vm654_vm1, %v3193_v6  ;;  %5524 = vmatpush1.msk.msra.mxu0 %vm654_vm1, %v3193_v6  ;;  %v3393_v6 = vld [vmem:[%s9330_s4 + $0x90] sm:$0xff] }
 0x7e7   :  { %3235 = vmatprep.subr.mxu1 %v3192_v1  ;;  %3320 = vmatprep.subr.mxu0 %v3192_v1  ;;  %v3392_v1 = vld [vmem:[%s9330_s4 + $0x88] sm:$0xff] }
 0x7e8   :  { %3236 = vmatpush1.msra.mxu1 %v3191_v12  ;;  %3321 = vmatpush1.msra.mxu0 %v3191_v12  ;;  %v3391_v12 = vld [vmem:[%s9330_s4 + $0x80] sm:$0xff] }
 0x7e9   :  { %3237 = vmatprep.subr.mxu1 %v3190_v10  ;;  %3322 = vmatprep.subr.mxu0 %v3190_v10  ;;  %v5545_v10 = vld [vmem:[%s9330_s4 + $0x160] sm:$0xff]  ;;  %s6334_s4 = smov [#allocation4]  }
 0x7ea   :  { %3238 = vmatpush1.msra.mxu1 %v3189_v9  ;;  %3323 = vmatpush1.msra.mxu0 %v3189_v9  ;;  %v3632_v9 = vld [vmem:[%s9331_s5 + $0xd8] sm:$0xff]  ;;  %s5142_s3 = sshll.u32 %s6334_s4, 4  ;;  %s5143_s3 = int_to_ptr.vmem [resolvable:$true] %s5142_s3 }
 0x7eb   :  { %3239 = vmatprep.subr.mxu1 %v3188_v8  ;;  %3324 = vmatprep.subr.mxu0 %v3188_v8  ;;  %v5587_v8 = vld [vmem:[%s9331_s5 + $0x1b8] sm:$0xff]  ;;  %p6315_p1 = scmp.lt.s32.totalorder %s5143_s3, %s5143_s3 }
 0x7ec   :  { %3240 = vmatpush1.msra.mxu1 %v3187_v11  ;;  %3325 = vmatpush1.msra.mxu0 %v3187_v11 }
 0x7ed   :  { %5519 = vmatmul.mubr.msk.f32.vlgmr.msra.gmra.mxu1 %vm647_vm2, %v3195_v13  ;;  %5525 = vmatmul.mubr.msk.f32.vlgmr.msra.gmra.mxu0 %vm647_vm2, %v5521_v14 }
 0x7ee   :  { %3279 = vmatprep.mubr.f32.mxu1 %v6332_v18  ;;  %3364 = vmatprep.mubr.f32.mxu0 %v6332_v18 }
 0x7ef   :  { %3409 = vmatprep.subr.mxu1 %v6332_v18  ;;  %3512 = vmatprep.subr.mxu0 %v6332_v18 }
 0x7f0   :  { %3410 = vmatpush1.msra.mxu1 %v3390_v15  ;;  %3513 = vmatpush1.msra.mxu0 %v5544_v16 }
 0x7f1   :  { %5520 = vmatmul.mubr.msk.f32.gmra.mxu1 %vm647_vm2, %v3196_v17  ;;  %5526 = vmatmul.mubr.msk.f32.gmra.mxu0 %vm647_vm2, %v5522_v25 }
 0x7f2   :  { %3411 = vmatprep.subr.mxu1 %v6332_v18  ;;  %3514 = vmatprep.subr.mxu0 %v6332_v18 }
 0x7f3   :  { %3412 = vmatpush1.msra.mxu1 %v3389_v23  ;;  %3515 = vmatpush1.msra.mxu0 %v5543_v24  ;;  %v3631_v24 = vld [vmem:[%s9331_s5 + $0xd0] sm:$0xff] }
 0x7f4   :  { %3413 = vmatprep.subr.mxu1 %v6332_v18  ;;  %3516 = vmatprep.subr.mxu0 %v6332_v18 }
 0x7f5   :  { %3414 = vmatpush1.msra.mxu1 %v3388_v21  ;;  %3517 = vmatpush1.msra.mxu0 %v5542_v19  ;;  %v5586_v21 = vld [vmem:[%s9331_s5 + $0x1b0] sm:$0xff]  ;;  %v3630_v19 = vld [vmem:[%s9331_s5 + $0xc8] sm:$0xff] }
 0x7f6   :  { %3415 = vmatprep.subr.mxu1 %v6332_v18  ;;  %3518 = vmatprep.subr.mxu0 %v6332_v18 }
 0x7f7   :  { %3416 = vmatpush1.msra.mxu1 %v3387_v20  ;;  %3519 = vmatpush1.msra.mxu0 %v5541_v22  ;;  %v5585_v20 = vld [vmem:[%s9331_s5 + $0x1a8] sm:$0xff] }
 0x7f8   :  { %3417 = vmatprep.subr.mxu1 %v6332_v18  ;;  %3520 = vmatprep.subr.mxu0 %v6332_v18 }
 0x7f9   :  { %3418 = vmatpush1.msra.mxu1 %v3386_v26  ;;  %3521 = vmatpush1.msra.mxu0 %v5540_v27 }
 0x7fa   :  { %3419 = vmatprep.subr.mxu1 %v6332_v18  ;;  %3522 = vmatprep.subr.mxu0 %v6332_v18 }
 0x7fb   :  { %3420 = vmatpush1.msra.mxu1 %v3385_v28  ;;  %3523 = vmatpush1.msra.mxu0 %v5539_v29  ;;  %v3629_v29 = vld [vmem:[%s9331_s5 + $0xc0] sm:$0xff] }
 0x7fc   :  { %3421 = vmatprep.subr.mxu1 %v6332_v18  ;;  %3524 = vmatprep.subr.mxu0 %v6332_v18 }
 0x7fd   :  { %3422 = vmatpush1.msra.mxu1 %v3384_v30  ;;  %3525 = vmatpush1.msra.mxu0 %v5538_v31  ;;  %v5584_v30 = vld [vmem:[%s9331_s5 + $0x1a0] sm:$0xff]  ;;  %v3628_v31 = vld [vmem:[%s9331_s5 + $0xb8] sm:$0xff] }
 0x7fe   :  { %3423 = vmatprep.subr.mxu1 %v6332_v18  ;;  %3526 = vmatprep.subr.mxu0 %v6332_v18 }
 0x7ff   :  { %3424 = vmatpush1.msra.mxu1 %v3383_v32  ;;  %3527 = vmatpush1.msra.mxu0 %v5537_v33  ;;  %v5583_v32 = vld [vmem:[%s9331_s5 + $0x198] sm:$0xff]  ;;  %v3627_v33 = vld [vmem:[%s9331_s5 + $0xb0] sm:$0xff] }
 0x800   :  { %3425 = vmatprep.subr.mxu1 %v6332_v18  ;;  %3528 = vmatprep.subr.mxu0 %v6332_v18 }
 0x801   :  { %3426 = vmatpush1.msra.mxu1 %v3382_v34  ;;  %3529 = vmatpush1.msra.mxu0 %v5536_v35  ;;  %v5582_v34 = vld [vmem:[%s9331_s5 + $0x190] sm:$0xff]  ;;  %v3626_v35 = vld [vmem:[%s9331_s5 + $0xa8] sm:$0xff] }
 0x802   :  { %3427 = vmatprep.subr.mxu1 %v6332_v18  ;;  %3530 = vmatprep.subr.mxu0 %v6332_v18 }
 0x803   :  { %3428 = vmatpush1.msra.mxu1 %v3381_v36  ;;  %3531 = vmatpush1.msra.mxu0 %v5535_v37  ;;  %v5581_v36 = vld [vmem:[%s9331_s5 + $0x188] sm:$0xff]  ;;  %v3625_v37 = vld [vmem:[%s9331_s5 + $0xa0] sm:$0xff] }
 0x804   :  { %3429 = vmatprep.subr.mxu1 %v6332_v18  ;;  %3532 = vmatprep.subr.mxu0 %v6332_v18 }
 0x805   :  { %3430 = vmatpush1.msra.mxu1 %v3380_v38  ;;  %3533 = vmatpush1.msra.mxu0 %v5534_v39  ;;  %v5580_v38 = vld [vmem:[%s9331_s5 + $0x180] sm:$0xff]  ;;  %v3624_v39 = vld [vmem:[%s9331_s5 + $0x98] sm:$0xff] }
 0x806   :  { %3431 = vmatprep.subr.mxu1 %v6332_v18  ;;  %3534 = vmatprep.subr.mxu0 %v6332_v18 }
 0x807   :  { %3432 = vmatpush1.msra.mxu1 %v3379_v40  ;;  %3535 = vmatpush1.msra.mxu0 %v5533_v41  ;;  %v5579_v40 = vld [vmem:[%s9331_s5 + $0x178] sm:$0xff]  ;;  %v3623_v41 = vld [vmem:[%s9331_s5 + $0x90] sm:$0xff] }
 0x808   :  { %3433 = vmatprep.subr.mxu1 %v6332_v18  ;;  %3536 = vmatprep.subr.mxu0 %v6332_v18 }
 0x809   :  { %3434 = vmatpush1.msra.mxu1 %v3378_v42  ;;  %3537 = vmatpush1.msra.mxu0 %v5532_v43  ;;  %v5578_v42 = vld [vmem:[%s9331_s5 + $0x170] sm:$0xff]  ;;  %v3622_v43 = vld [vmem:[%s9331_s5 + $0x88] sm:$0xff] }
 0x80a   :  { %3435 = vmatprep.subr.mxu1 %v6332_v18  ;;  %3538 = vmatprep.subr.mxu0 %v6332_v18 }
 0x80b   :  { %3436 = vmatpush1.msra.mxu1 %v3377_v44  ;;  %3539 = vmatpush1.msra.mxu0 %v5531_v45  ;;  %v3621_v44 = vld [vmem:[%s9331_s5 + $0x80] sm:$0xff]  ;;  %v3620_v45 = vld [vmem:[%s9331_s5 + $0x78] sm:$0xff] }
 0x80c   :  { %3437 = vmatprep.subr.mxu1 %v6332_v18  ;;  %3540 = vmatprep.subr.mxu0 %v6332_v18 }
 0x80d   :  { %3438 = vmatpush1.msra.mxu1 %v3376_v46  ;;  %3541 = vmatpush1.msra.mxu0 %v5530_v47  ;;  %v3619_v46 = vld [vmem:[%s9331_s5 + $0x70] sm:$0xff]  ;;  %v5577_v47 = vld [vmem:[%s9331_s5 + $0x168] sm:$0xff] }
 0x80e   :  { %3439 = vmatprep.subr.mxu1 %v6332_v18  ;;  %3542 = vmatprep.subr.mxu0 %v6332_v18 }
 0x80f   :  { %3440 = vmatpush1.msra.mxu1 %v3375_v48  ;;  %3543 = vmatpush1.msra.mxu0 %v5529_v49  ;;  %v3618_v48 = vld [vmem:[%s9331_s5 + $0x68] sm:$0xff]  ;;  %v5576_v49 = vld [vmem:[%s9331_s5 + $0x160] sm:$0xff] }
 0x810   :  { %3449 = vmatprep.subr.mxu1 %v6332_v18  ;;  %3552 = vmatprep.subr.mxu0 %v6332_v18 }
 0x811   :  { %3450 = vmatpush2.msra.mxu1 %v3402_v50  ;;  %3553 = vmatpush2.msra.mxu0 %v5556_v51  ;;  %v3617_v50 = vld [vmem:[%s9331_s5 + $0x60] sm:$0xff]  ;;  %v5575_v51 = vld [vmem:[%s9331_s5 + $0x158] sm:$0xff] }
 0x812   :  { %3451 = vmatprep.subr.mxu1 %v6332_v18  ;;  %3554 = vmatprep.subr.mxu0 %v6332_v18 }
 0x813   :  { %3452 = vmatpush2.msra.mxu1 %v3401_v52  ;;  %3555 = vmatpush2.msra.mxu0 %v5555_v53  ;;  %v3616_v52 = vld [vmem:[%s9331_s5 + $0x58] sm:$0xff]  ;;  %v5574_v53 = vld [vmem:[%s9331_s5 + $0x150] sm:$0xff] }
 0x814   :  { %3453 = vmatprep.subr.mxu1 %v6332_v18  ;;  %3556 = vmatprep.subr.mxu0 %v6332_v18 }
 0x815   :  { %3454 = vmatpush2.msra.mxu1 %v3400_v54  ;;  %3557 = vmatpush2.msra.mxu0 %v5554_v55  ;;  %v3615_v54 = vld [vmem:[%s9331_s5 + $0x50] sm:$0xff]  ;;  %v5573_v55 = vld [vmem:[%s9331_s5 + $0x148] sm:$0xff] }
 0x816   :  { %3455 = vmatprep.subr.mxu1 %v6332_v18  ;;  %3558 = vmatprep.subr.mxu0 %v6332_v18 }
 0x817   :  { %3456 = vmatpush2.msra.mxu1 %v3399_v56  ;;  %3559 = vmatpush2.msra.mxu0 %v5553_v57  ;;  %v3614_v56 = vld [vmem:[%s9331_s5 + $0x48] sm:$0xff]  ;;  %v5572_v57 = vld [vmem:[%s9331_s5 + $0x140] sm:$0xff] }
 0x818   :  { %3457 = vmatprep.subr.mxu1 %v6332_v18  ;;  %3560 = vmatprep.subr.mxu0 %v6332_v18 }
 0x819   :  { %3458 = vmatpush2.msra.mxu1 %v3398_v58  ;;  %3561 = vmatpush2.msra.mxu0 %v5552_v59  ;;  %v3613_v58 = vld [vmem:[%s9331_s5 + $0x40] sm:$0xff]  ;;  %v5571_v59 = vld [vmem:[%s9331_s5 + $0x138] sm:$0xff] }
 0x81a   :  { %3459 = vmatprep.subr.mxu1 %v6332_v18  ;;  %3562 = vmatprep.subr.mxu0 %v6332_v18 }
 0x81b   :  { %3460 = vmatpush2.msra.mxu1 %v3397_v60  ;;  %3563 = vmatpush2.msra.mxu0 %v5551_v61  ;;  %v3612_v60 = vld [vmem:[%s9331_s5 + $0x38] sm:$0xff]  ;;  %v5570_v61 = vld [vmem:[%s9331_s5 + $0x130] sm:$0xff] }
 0x81c   :  { %3461 = vmatprep.subr.mxu1 %v6332_v18  ;;  %3564 = vmatprep.subr.mxu0 %v6332_v18 }
 0x81d   :  { %3462 = vmatpush2.msra.mxu1 %v3396_v62  ;;  %3565 = vmatpush2.msra.mxu0 %v5550_v63  ;;  %v3611_v62 = vld [vmem:[%s9331_s5 + $0x30] sm:$0xff]  ;;  %v5569_v63 = vld [vmem:[%s9331_s5 + $0x128] sm:$0xff] }
 0x81e   :  { %3463 = vmatprep.subr.mxu1 %v6332_v18  ;;  %3566 = vmatprep.subr.mxu0 %v6332_v18 }
 0x81f   :  { %3464 = vmatpush2.msra.mxu1 %v3395_v4  ;;  %3567 = vmatpush2.msra.mxu0 %v5549_v3  ;;  %v3610_v4 = vld [vmem:[%s9331_s5 + $0x28] sm:$0xff]  ;;  %v5568_v3 = vld [vmem:[%s9331_s5 + $0x120] sm:$0xff] }
 0x820   :  { %3465 = vmatprep.subr.mxu1 %v6332_v18  ;;  %3568 = vmatprep.subr.mxu0 %v6332_v18 }
 0x821   :  { %3466 = vmatpush2.msra.mxu1 %v3394_v2  ;;  %3569 = vmatpush2.msra.mxu0 %v5548_v5  ;;  %v3609_v2 = vld [vmem:[%s9331_s5 + $0x20] sm:$0xff]  ;;  %v5567_v5 = vld [vmem:[%s9331_s5 + $0x118] sm:$0xff] }
 0x822   :  { %3467 = vmatprep.subr.mxu1 %v6332_v18  ;;  %3570 = vmatprep.subr.mxu0 %v6332_v18 }
 0x823   :  { %3468 = vmatpush2.msra.mxu1 %v3393_v6  ;;  %3571 = vmatpush2.msra.mxu0 %v5547_v7  ;;  %v3608_v6 = vld [vmem:[%s9331_s5 + $0x18] sm:$0xff]  ;;  %v5566_v7 = vld [vmem:[%s9331_s5 + $0x110] sm:$0xff] }
 0x824   :  { %3469 = vmatprep.subr.mxu1 %v6332_v18  ;;  %3572 = vmatprep.subr.mxu0 %v6332_v18 }
 0x825   :  { %3470 = vmatpush2.msra.mxu1 %v3392_v1  ;;  %3573 = vmatpush2.msra.mxu0 %v5546_v0  ;;  %v3607_v1 = vld [vmem:[%s9331_s5 + $0x10] sm:$0xff]  ;;  %v5565_v0 = vld [vmem:[%s9331_s5 + $0x108] sm:$0xff] }
 0x826   :  { %3471 = vmatprep.subr.mxu1 %v6332_v18  ;;  %3574 = vmatprep.subr.mxu0 %v6332_v18 }
 0x827   :  { %3472 = vmatpush2.msra.mxu1 %v3391_v12  ;;  %3575 = vmatpush2.msra.mxu0 %v5545_v10  ;;  %v3606_v12 = vld [vmem:[%s9331_s5 + $0x8] sm:$0xff]  ;;  %v5564_v10 = vld [vmem:[%s9331_s5 + $0x100] sm:$0xff] }
 0x828   :  { %3756 = vmatprep.subr.mxu0 %v3632_v9  ;;  %3673 = vmatprep.subr.mxu1 %v5587_v8  ;;  %v3605_v9 = vld [vmem:[%s9331_s5] sm:$0xff]  ;;  %v5563_v8 = vld [vmem:[%s9331_s5 + $0xf8] sm:$0xff] }
 0x8ad   :  { %v3275_v11 = vpop.f32.mrf.mxu1  ;;  %v3360_v13 = vpop.f32.mrf.mxu0 }
 0x8ae   :  { %v3371_v17 = vmax.f32 %v3275_v11, %v3360_v13  ;;  %v5649_v11 = vld [vmem:[%s9331_s5 + $0x378] sm:$0xff]  ;;  %v5562_v13 = vld [vmem:[%s9331_s5 + $0xf0] sm:$0xff] }
 0x8af   :  { %v3277_v14 = vpop.f32.mrf.mxu1  ;;  %v3362_v15 = vpop.f32.mrf.mxu0 }
 0x8b0   :  { %v3372_v16 = vmax.f32 %v3277_v14, %v3362_v15  ;;  %v5561_v14 = vld [vmem:[%s9331_s5 + $0xe8] sm:$0xff]  ;;  %v5560_v15 = vld [vmem:[%s9331_s5 + $0xe0] sm:$0xff] }
 0x8b1   :  { %v3281_v25 = vpop.f32.mrf.mxu1  ;;  %v3366_v23 = vpop.f32.mrf.mxu0 }
 0x8b2   :  { %5527 = vmatprep.mubr.msk.f32.mxu1 %vm856_vm3, %v3372_v16  ;;  %5557 = vmatprep.mubr.msk.f32.mxu0 %vm856_vm3, %v3372_v16  ;;  %v3373_v28 = vmax.f32 %v3281_v25, %v3366_v23  ;;  %v5619_v16 = vld [vmem:[%s9331_s5 + $0x298] sm:$0xff]  ;;  %v5559_v23 = vld [vmem:[%s9328_s2] ss:$0 sm:$0xff] }
 0x8b3   :  { %v3283_v22 = vpop.f32.mrf.mxu1  ;;  %v3368_v26 = vpop.f32.mrf.mxu0  ;;  %3474 = vmatmul.mubr.f32.vlgmr.msra.gmra.mxu1 %v3371_v17  ;;  %3577 = vmatmul.mubr.f32.vlgmr.msra.gmra.mxu0 %v3371_v17 }
 0x8b4   :  { %v3374_v27 = vmax.f32 %v3283_v22, %v3368_v26  ;;  %3757 = vmatpush1.msra.mxu0 %v3631_v24  ;;  %3674 = vmatpush1.msra.mxu1 %v5586_v21 }
 0x8b5   :  { %3758 = vmatprep.subr.mxu0 %v3630_v19  ;;  %3675 = vmatprep.subr.mxu1 %v5585_v20 }
 0x8b6   :  { %5528 = vmatprep.mubr.msk.f32.mxu1 %vm856_vm3, %v3374_v27  ;;  %5558 = vmatprep.mubr.msk.f32.mxu0 %vm856_vm3, %v3374_v27 }
 0x8b7   :  { %3479 = vmatmul.mubr.f32.gmra.mxu1 %v3373_v28  ;;  %3582 = vmatmul.mubr.f32.gmra.mxu0 %v3373_v28 }
 0x8b8   :  { %3759 = vmatpush1.msra.mxu0 %v3629_v29  ;;  %3676 = vmatpush1.msra.mxu1 %v5584_v30 }
 0x8b9   :  { %3760 = vmatprep.subr.mxu0 %v3628_v31  ;;  %3677 = vmatprep.subr.mxu1 %v5583_v32 }
 0x8ba   :  { %3761 = vmatpush1.msra.mxu0 %v3627_v33  ;;  %3678 = vmatpush1.msra.mxu1 %v5582_v34  ;;  %v5648_v33 = vld [vmem:[%s9331_s5 + $0x370] sm:$0xff] }
 0x8bb   :  { %3762 = vmatprep.subr.mxu0 %v3626_v35  ;;  %3679 = vmatprep.subr.mxu1 %v5581_v36  ;;  %v5647_v35 = vld [vmem:[%s9331_s5 + $0x368] sm:$0xff]  ;;  %v5646_v36 = vld [vmem:[%s9331_s5 + $0x360] sm:$0xff] }
 0x8bc   :  { %3763 = vmatpush1.msra.mxu0 %v3625_v37  ;;  %3680 = vmatpush1.msra.mxu1 %v5580_v38  ;;  %v5645_v37 = vld [vmem:[%s9331_s5 + $0x358] sm:$0xff]  ;;  %v5618_v38 = vld [vmem:[%s9331_s5 + $0x290] sm:$0xff] }
 0x8bd   :  { %3764 = vmatprep.subr.mxu0 %v3624_v39  ;;  %3681 = vmatprep.subr.mxu1 %v5579_v40  ;;  %v5644_v39 = vld [vmem:[%s9331_s5 + $0x350] sm:$0xff] }
 0x8be   :  { %3765 = vmatpush1.msra.mxu0 %v3623_v41  ;;  %3682 = vmatpush1.msra.mxu1 %v5578_v42  ;;  %v5617_v42 = vld [vmem:[%s9331_s5 + $0x288] sm:$0xff] }
 0x8bf   :  { %3766 = vmatprep.subr.mxu0 %v3622_v43  ;;  %3816 = vmatprep.mubr.f32.mxu0 %v6332_v18  ;;  %v5643_v43 = vld [vmem:[%s9331_s5 + $0x348] sm:$0xff] }
 0x8c0   :  { %3767 = vmatpush1.msra.mxu0 %v3621_v44  ;;  %3733 = vmatprep.mubr.f32.mxu1 %v6332_v18  ;;  %v5616_v44 = vld [vmem:[%s9331_s5 + $0x280] sm:$0xff] }
 0x8c1   :  { %3768 = vmatprep.subr.mxu0 %v3620_v45  ;;  %3683 = vmatprep.subr.mxu1 %v5577_v47  ;;  %v5642_v45 = vld [vmem:[%s9331_s5 + $0x340] sm:$0xff]  ;;  %v5641_v47 = vld [vmem:[%s9331_s5 + $0x338] sm:$0xff] }
 0x8c2   :  { %3769 = vmatpush1.msra.mxu0 %v3619_v46  ;;  %3684 = vmatpush1.msra.mxu1 %v5576_v49  ;;  %v5615_v46 = vld [vmem:[%s9331_s5 + $0x278] sm:$0xff]  ;;  %v5614_v49 = vld [vmem:[%s9331_s5 + $0x270] sm:$0xff] }
 0x8c3   :  { %3770 = vmatprep.subr.mxu0 %v3618_v48  ;;  %3685 = vmatprep.subr.mxu1 %v5575_v51  ;;  %v5640_v48 = vld [vmem:[%s9331_s5 + $0x330] sm:$0xff] }
 0x8c4   :  { %3771 = vmatpush1.msra.mxu0 %v3617_v50  ;;  %3686 = vmatpush1.msra.mxu1 %v5574_v53  ;;  %v5639_v50 = vld [vmem:[%s9331_s5 + $0x328] sm:$0xff]  ;;  %v5638_v53 = vld [vmem:[%s9331_s5 + $0x320] sm:$0xff] }
 0x8c5   :  { %3772 = vmatprep.subr.mxu0 %v3616_v52  ;;  %3687 = vmatprep.subr.mxu1 %v5573_v55  ;;  %v5613_v52 = vld [vmem:[%s9331_s5 + $0x268] sm:$0xff]  ;;  %v5637_v55 = vld [vmem:[%s9331_s5 + $0x318] sm:$0xff] }
 0x8c6   :  { %3773 = vmatpush1.msra.mxu0 %v3615_v54  ;;  %3688 = vmatpush1.msra.mxu1 %v5572_v57  ;;  %v5612_v54 = vld [vmem:[%s9331_s5 + $0x260] sm:$0xff]  ;;  %v5636_v57 = vld [vmem:[%s9331_s5 + $0x310] sm:$0xff] }
 0x8c7   :  { %3774 = vmatprep.subr.mxu0 %v3614_v56  ;;  %3689 = vmatprep.subr.mxu1 %v5571_v59  ;;  %v5611_v56 = vld [vmem:[%s9331_s5 + $0x258] sm:$0xff]  ;;  %v5635_v59 = vld [vmem:[%s9331_s5 + $0x308] sm:$0xff] }
 0x8c8   :  { %3775 = vmatpush1.msra.mxu0 %v3613_v58  ;;  %3690 = vmatpush1.msra.mxu1 %v5570_v61  ;;  %v5610_v58 = vld [vmem:[%s9331_s5 + $0x250] sm:$0xff]  ;;  %v5634_v61 = vld [vmem:[%s9331_s5 + $0x300] sm:$0xff] }
 0x8c9   :  { %3776 = vmatprep.subr.mxu0 %v3612_v60  ;;  %3691 = vmatprep.subr.mxu1 %v5569_v63  ;;  %v5609_v60 = vld [vmem:[%s9331_s5 + $0x248] sm:$0xff]  ;;  %v5633_v63 = vld [vmem:[%s9331_s5 + $0x2f8] sm:$0xff] }
 0x8ca   :  { %3777 = vmatpush1.msra.mxu0 %v3611_v62  ;;  %3692 = vmatpush1.msra.mxu1 %v5568_v3  ;;  %v5608_v62 = vld [vmem:[%s9331_s5 + $0x240] sm:$0xff]  ;;  %v5632_v3 = vld [vmem:[%s9331_s5 + $0x2f0] sm:$0xff] }
 0x8cb   :  { %3778 = vmatprep.subr.mxu0 %v3610_v4  ;;  %3693 = vmatprep.subr.mxu1 %v5567_v5  ;;  %v5607_v4 = vld [vmem:[%s9331_s5 + $0x238] sm:$0xff]  ;;  %v5631_v5 = vld [vmem:[%s9331_s5 + $0x2e8] sm:$0xff] }
 0x8cc   :  { %3779 = vmatpush1.msra.mxu0 %v3609_v2  ;;  %3694 = vmatpush1.msra.mxu1 %v5566_v7  ;;  %v5606_v2 = vld [vmem:[%s9331_s5 + $0x230] sm:$0xff]  ;;  %v5630_v7 = vld [vmem:[%s9331_s5 + $0x2e0] sm:$0xff] }
 0x8cd   :  { %3780 = vmatprep.subr.mxu0 %v3608_v6  ;;  %3695 = vmatprep.subr.mxu1 %v5565_v0  ;;  %v5605_v6 = vld [vmem:[%s9331_s5 + $0x228] sm:$0xff]  ;;  %v5629_v0 = vld [vmem:[%s9331_s5 + $0x2d8] sm:$0xff] }
 0x8ce   :  { %3781 = vmatpush1.msra.mxu0 %v3607_v1  ;;  %3696 = vmatpush1.msra.mxu1 %v5564_v10  ;;  %v5604_v1 = vld [vmem:[%s9331_s5 + $0x220] sm:$0xff]  ;;  %v5628_v10 = vld [vmem:[%s9331_s5 + $0x2d0] sm:$0xff] }
 0x8cf   :  { %3782 = vmatprep.subr.mxu0 %v3606_v12  ;;  %3697 = vmatprep.subr.mxu1 %v5563_v8  ;;  %v5603_v12 = vld [vmem:[%s9331_s5 + $0x218] sm:$0xff]  ;;  %v5627_v8 = vld [vmem:[%s9331_s5 + $0x2c8] sm:$0xff] }
 0x8d0   :  { %3783 = vmatpush1.msra.mxu0 %v3605_v9  ;;  %3698 = vmatpush1.msra.mxu1 %v5562_v13  ;;  %v5602_v9 = vld [vmem:[%s9331_s5 + $0x210] sm:$0xff]  ;;  %v5626_v13 = vld [vmem:[%s9331_s5 + $0x2c0] sm:$0xff] }
 0x8d1   :  { %3986 = vmatprep.subr.mxu0 %v5649_v11  ;;  %3699 = vmatprep.subr.mxu1 %v5561_v14  ;;  %v5601_v11 = vld [vmem:[%s9331_s5 + $0x208] sm:$0xff]  ;;  %v5600_v14 = vld [vmem:[%s9331_s5 + $0x200] sm:$0xff] }
 0x8d2   :  { %3700 = vmatpush1.msra.mxu1 %v5560_v15  ;;  %v5625_v15 = vld [vmem:[%s9331_s5 + $0x2b8] sm:$0xff] }
 0x8d3   :  { %3869 = vmatprep.subr.mxu1 %v5619_v16  ;;  %v5599_v16 = vld [vmem:[%s9331_s5 + $0x1f8] sm:$0xff] }
 0x973   :  { %v3475_v17 = vpop.f32.mrf.mxu1  ;;  %v3578_v25 = vpop.f32.mrf.mxu0 }
 0x974   :  { %v3587_v24 = vmax.f32 %v3475_v17, %v3578_v25  ;;  %v5624_v17 = vld [vmem:[%s9331_s5 + $0x2b0] sm:$0xff] }
 0x975   :  { %v3477_v21 = vpop.f32.mrf.mxu1  ;;  %v3580_v19 = vpop.f32.mrf.mxu0  ;;  %v5598_v25 = vld [vmem:[%s9331_s5 + $0x1f0] sm:$0xff] }
 0x976   :  { %v3596_v20 = vadd.f32 %v5559_v23, %v3587_v24  ;;  %v5597_v24 = vld [vmem:[%s9331_s5 + $0x1e8] sm:$0xff]  ;;  %v5622_v21 = vld [vmem:[%s9331_s5 + $0x2a0] sm:$0xff] }
 0x977   :  { %v3480_v22 = vpop.f32.mrf.mxu1  ;;  %v3583_v26 = vpop.f32.mrf.mxu0  ;;  %v5596_v19 = vld [vmem:[%s9331_s5 + $0x1e0] sm:$0xff] }
 0x978   :  { %v3598_v27 = vmax.f32 %v3596_v20, 0.0  ;;  %v3588_v28 = vmax.f32 %v3480_v22, %v3583_v26  ;;  %v5595_v20 = vld [vmem:[%s9331_s5 + $0x1d8] sm:$0xff]  ;;  %v5594_v22 = vld [vmem:[%s9331_s5 + $0x1d0] sm:$0xff] }
 0x979   :  { %v3482_v29 = vpop.f32.mrf.mxu1  ;;  %v3585_v30 = vpop.f32.mrf.mxu0 }
 0x97a   :  { %3601 = vst.msk [vmem:[#allocation2 + $0x10] sm:$0xff] %vm1055_vm4, %v3598_v27  ;;  %v3597_v31 = vadd.f32 %v5559_v23, %v3588_v28  ;;  %v5623_v23 = vld [vmem:[%s9331_s5 + $0x2a8] sm:$0xff]  ;;  %v5592_v28 = vld [vmem:[%s9331_s5 + $0x1c0] sm:$0xff]  ;;  %v5679_v29 = vld [vmem:[%s9331_s5 + $0x458] sm:$0xff] }
 0x97b   :  { %v5593_v27 = vld [vmem:[%s9331_s5 + $0x1c8] sm:$0xff] }
 0x97c   :  { %v3599_v32 = vmax.f32 %v3597_v31, 0.0 }
 0x97e   :  { %3602 = vst.msk [vmem:[#allocation2 + $0x18] sm:$0x3f] %vm1057_vm5, %v3599_v32  ;;  %v5678_v32 = vld [vmem:[%s9331_s5 + $0x450] sm:$0xff] }
 0x981   :  { %v3603_v34 = vld [vmem:[#allocation2 + $0x10] sm:$0xff] }
 0x982   :  { %5590 = vmatmul.mubr.msk.f32.vlgmr.msra.gmra.mxu0 %vm1055_vm4, %v3603_v34  ;;  %v5676_v34 = vld [vmem:[%s9331_s5 + $0x440] sm:$0xff] }
 0x983   :  { %3987 = vmatpush1.msra.mxu0 %v5648_v33  ;;  %3822 = vmatprep.mubr.f32.mxu0 %v6332_v18  ;;  %v5677_v33 = vld [vmem:[%s9331_s5 + $0x448] sm:$0xff] }
 0x984   :  { %3988 = vmatprep.subr.mxu0 %v5647_v35  ;;  %v5675_v35 = vld [vmem:[%s9331_s5 + $0x438] sm:$0xff] }
 0x985   :  { %3989 = vmatpush1.msra.mxu0 %v5646_v36  ;;  %v3633_v40 = vld [vmem:[#allocation2 + $0x11] sm:$0xff]  ;;  %v3634_v51 = vld [vmem:[#allocation2 + $0x19] sm:$0x3]  ;;  %v3947_v31 = vld [vmem:[#allocation2 + $0x1b] sm:$0x3] }
 0x986   :  { %v3604_v41 = vld [vmem:[#allocation2 + $0x18] sm:$0x3]  ;;  %3990 = vmatprep.subr.mxu0 %v5645_v37  ;;  %5588 = vmatmul.mubr.msk.f32.vlgmr.msra.gmra.mxu1 %vm1055_vm4, %v3633_v40  ;;  %v5674_v36 = vld [vmem:[%s9331_s5 + $0x430] sm:$0xff]  ;;  %v3830_v37 = vld [vmem:[#allocation2 + $0x1a] sm:$0x3] }
 0x987   :  { %5591 = vmatmul.mubr.msk.f32.gmra.mxu0 %vm1055_vm4, %v3604_v41  ;;  %3870 = vmatpush1.msra.mxu1 %v5618_v38  ;;  %v3946_v26 = vld [vmem:[#allocation2 + $0x13] sm:$0xff]  ;;  %v5673_v38 = vld [vmem:[%s9331_s5 + $0x428] sm:$0xff] }
 0x988   :  { %3991 = vmatpush1.msra.mxu0 %v5644_v39  ;;  %3871 = vmatprep.subr.mxu1 %v5617_v42  ;;  %v3829_v30 = vld [vmem:[#allocation2 + $0x12] sm:$0xff]  ;;  %v5672_v39 = vld [vmem:[%s9331_s5 + $0x420] sm:$0xff]  ;;  %v5669_v42 = vld [vmem:[%s9331_s5 + $0x408] sm:$0xff] }
 0x989   :  { %3992 = vmatprep.subr.mxu0 %v5643_v43  ;;  %3872 = vmatpush1.msra.mxu1 %v5616_v44  ;;  %v5671_v40 = vld [vmem:[%s9331_s5 + $0x418] sm:$0xff]  ;;  %v5670_v41 = vld [vmem:[%s9331_s5 + $0x410] sm:$0xff]  ;;  %v5668_v43 = vld [vmem:[%s9331_s5 + $0x400] sm:$0xff] }
 0x98a   :  { %3993 = vmatpush1.msra.mxu0 %v5642_v45  ;;  %3739 = vmatprep.mubr.f32.mxu1 %v6332_v18  ;;  %v5667_v44 = vld [vmem:[%s9331_s5 + $0x3f8] sm:$0xff]  ;;  %v5666_v45 = vld [vmem:[%s9331_s5 + $0x3f0] sm:$0xff] }
 0x98b   :  { %3873 = vmatprep.subr.mxu1 %v5615_v46  ;;  %3994 = vmatprep.subr.mxu0 %v5641_v47  ;;  %v5665_v46 = vld [vmem:[%s9331_s5 + $0x3e8] sm:$0xff]  ;;  %v5664_v47 = vld [vmem:[%s9331_s5 + $0x3e0] sm:$0xff] }
 0x98c   :  { %5589 = vmatmul.mubr.msk.f32.gmra.mxu1 %vm1055_vm4, %v3634_v51  ;;  %3995 = vmatpush1.msra.mxu0 %v5640_v48  ;;  %v5663_v48 = vld [vmem:[%s9331_s5 + $0x3d8] sm:$0xff]  ;;  %v5660_v51 = vld [vmem:[%s9331_s5 + $0x3c0] sm:$0xff] }
 0x98d   :  { %3874 = vmatpush1.msra.mxu1 %v5614_v49  ;;  %3996 = vmatprep.subr.mxu0 %v5639_v50  ;;  %v5662_v49 = vld [vmem:[%s9331_s5 + $0x3d0] sm:$0xff]  ;;  %v5661_v50 = vld [vmem:[%s9331_s5 + $0x3c8] sm:$0xff] }
 0x98e   :  { %3875 = vmatprep.subr.mxu1 %v5613_v52  ;;  %3997 = vmatpush1.msra.mxu0 %v5638_v53  ;;  %v5659_v52 = vld [vmem:[%s9331_s5 + $0x3b8] sm:$0xff]  ;;  %v5658_v53 = vld [vmem:[%s9331_s5 + $0x3b0] sm:$0xff] }
 0x98f   :  { %3876 = vmatpush1.msra.mxu1 %v5612_v54  ;;  %3998 = vmatprep.subr.mxu0 %v5637_v55  ;;  %v5657_v54 = vld [vmem:[%s9331_s5 + $0x3a8] sm:$0xff]  ;;  %v5656_v55 = vld [vmem:[%s9331_s5 + $0x3a0] sm:$0xff] }
 0x990   :  { %3877 = vmatprep.subr.mxu1 %v5611_v56  ;;  %3999 = vmatpush1.msra.mxu0 %v5636_v57  ;;  %v5655_v56 = vld [vmem:[%s9331_s5 + $0x398] sm:$0xff]  ;;  %v5654_v57 = vld [vmem:[%s9331_s5 + $0x390] sm:$0xff] }
 0x991   :  { %3878 = vmatpush1.msra.mxu1 %v5610_v58  ;;  %4000 = vmatprep.subr.mxu0 %v5635_v59  ;;  %v5653_v58 = vld [vmem:[%s9331_s5 + $0x388] sm:$0xff]  ;;  %v5652_v59 = vld [vmem:[%s9331_s5 + $0x380] sm:$0xff] }
 0x992   :  { %3879 = vmatprep.subr.mxu1 %v5609_v60  ;;  %4001 = vmatpush1.msra.mxu0 %v5634_v61  ;;  %v4063_v60 = vld [vmem:[#allocation2 + $0x14] sm:$0xff]  ;;  %v4064_v61 = vld [vmem:[#allocation2 + $0x1c] sm:$0x3] }
 0x993   :  { %3880 = vmatpush1.msra.mxu1 %v5608_v62  ;;  %4002 = vmatprep.subr.mxu0 %v5633_v63  ;;  %v5705_v62 = vld [vmem:[%s9334_s8 + $0x118] sm:$0xff]  ;;  %v5704_v63 = vld [vmem:[%s9334_s8 + $0x110] sm:$0xff] }
 0x994   :  { %3881 = vmatprep.subr.mxu1 %v5607_v4  ;;  %4003 = vmatpush1.msra.mxu0 %v5632_v3  ;;  %v5703_v4 = vld [vmem:[%s9334_s8 + $0x108] sm:$0xff]  ;;  %v5702_v3 = vld [vmem:[%s9334_s8 + $0x100] sm:$0xff] }
 0x995   :  { %3882 = vmatpush1.msra.mxu1 %v5606_v2  ;;  %4004 = vmatprep.subr.mxu0 %v5631_v5  ;;  %v5701_v2 = vld [vmem:[%s9334_s8 + $0xf8] sm:$0xff]  ;;  %v5700_v5 = vld [vmem:[%s9334_s8 + $0xf0] sm:$0xff] }
 0x996   :  { %3883 = vmatprep.subr.mxu1 %v5605_v6  ;;  %4005 = vmatpush1.msra.mxu0 %v5630_v7  ;;  %v5699_v6 = vld [vmem:[%s9334_s8 + $0xe8] sm:$0xff]  ;;  %v5698_v7 = vld [vmem:[%s9334_s8 + $0xe0] sm:$0xff] }
 0x997   :  { %3884 = vmatpush1.msra.mxu1 %v5604_v1  ;;  %4006 = vmatprep.subr.mxu0 %v5629_v0  ;;  %v5697_v1 = vld [vmem:[%s9334_s8 + $0xd8] sm:$0xff]  ;;  %v5696_v0 = vld [vmem:[%s9334_s8 + $0xd0] sm:$0xff] }
 0x998   :  { %3885 = vmatprep.subr.mxu1 %v5603_v12  ;;  %4007 = vmatpush1.msra.mxu0 %v5628_v10  ;;  %v5695_v12 = vld [vmem:[%s9334_s8 + $0xc8] sm:$0xff]  ;;  %v5694_v10 = vld [vmem:[%s9334_s8 + $0xc0] sm:$0xff] }
 0x999   :  { %3886 = vmatpush1.msra.mxu1 %v5602_v9  ;;  %4008 = vmatprep.subr.mxu0 %v5627_v8  ;;  %v5693_v9 = vld [vmem:[%s9334_s8 + $0xb8] sm:$0xff]  ;;  %v5692_v8 = vld [vmem:[%s9334_s8 + $0xb0] sm:$0xff] }
 0x99a   :  { %3887 = vmatprep.subr.mxu1 %v5601_v11  ;;  %4009 = vmatpush1.msra.mxu0 %v5626_v13  ;;  %v5691_v11 = vld [vmem:[%s9334_s8 + $0xa8] sm:$0xff] }
 0x99b   :  { %3888 = vmatpush1.msra.mxu1 %v5600_v14  ;;  %4010 = vmatprep.subr.mxu0 %v5625_v15 }
 0x99c   :  { %3889 = vmatprep.subr.mxu1 %v5599_v16  ;;  %4011 = vmatpush1.msra.mxu0 %v5624_v17 }
 0x99d   :  { %3890 = vmatpush1.msra.mxu1 %v5598_v25  ;;  %4012 = vmatprep.subr.mxu0 %v5623_v23 }
 0x99e   :  { %3891 = vmatprep.subr.mxu1 %v5597_v24  ;;  %4013 = vmatpush1.msra.mxu0 %v5622_v21 }
 0x99f   :  { %3892 = vmatpush1.msra.mxu1 %v5596_v19  ;;  %4046 = vmatprep.mubr.f32.mxu0 %v6332_v18 }
 0x9a0   :  { %3893 = vmatprep.subr.mxu1 %v5595_v20  ;;  %5650 = vmatmul.mubr.msk.f32.vlgmr.msra.gmra.mxu0 %vm1055_vm4, %v3946_v26 }
 0x9a1   :  { %3894 = vmatpush1.msra.mxu1 %v5594_v22  ;;  %3929 = vmatprep.mubr.f32.mxu1 %v6332_v18 }
 0x9a2   :  { %3895 = vmatprep.subr.mxu1 %v5593_v27  ;;  %4052 = vmatprep.mubr.f32.mxu0 %v6332_v18 }
 0x9a3   :  { %3896 = vmatpush1.msra.mxu1 %v5592_v28 }
 0x9a4   :  { %5620 = vmatmul.mubr.msk.f32.vlgmr.msra.gmra.mxu1 %vm1055_vm4, %v3829_v30  ;;  %5651 = vmatmul.mubr.msk.f32.gmra.mxu0 %vm1055_vm4, %v3947_v31 }
 0x9a5   :  { %4103 = vmatprep.subr.mxu1 %v5679_v29  ;;  %3935 = vmatprep.mubr.f32.mxu1 %v6332_v18 }
 0x9a6   :  { %4104 = vmatpush1.msra.mxu1 %v5678_v32  ;;  %4254 = vmatprep.mubr.f32.mxu0 %v6332_v18 }
 0x9a7   :  { %4105 = vmatprep.subr.mxu1 %v5677_v33 }
 0x9a8   :  { %4106 = vmatpush1.msra.mxu1 %v5676_v34 }
 0x9a9   :  { %5621 = vmatmul.mubr.msk.f32.gmra.mxu1 %vm1055_vm4, %v3830_v37  ;;  %4107 = vmatprep.subr.mxu1 %v5675_v35 }
 0x9aa   :  { %4108 = vmatpush1.msra.mxu1 %v5674_v36  ;;  %4163 = vmatprep.mubr.f32.mxu1 %v6332_v18 }
 0x9ab   :  { %4109 = vmatprep.subr.mxu1 %v5673_v38 }
 0x9ac   :  { %4110 = vmatpush1.msra.mxu1 %v5672_v39 }
 0x9ad   :  { %4111 = vmatprep.subr.mxu1 %v5671_v40 }
 0x9ae   :  { %4112 = vmatpush1.msra.mxu1 %v5670_v41 }
 0x9af   :  { %4113 = vmatprep.subr.mxu1 %v5669_v42 }
 0x9b0   :  { %4114 = vmatpush1.msra.mxu1 %v5668_v43 }
 0x9b1   :  { %4115 = vmatprep.subr.mxu1 %v5667_v44 }
 0x9b2   :  { %4116 = vmatpush1.msra.mxu1 %v5666_v45 }
 0x9b3   :  { %4117 = vmatprep.subr.mxu1 %v5665_v46 }
 0x9b4   :  { %4118 = vmatpush1.msra.mxu1 %v5664_v47 }
 0x9b5   :  { %4119 = vmatprep.subr.mxu1 %v5663_v48 }
 0x9b6   :  { %4120 = vmatpush1.msra.mxu1 %v5662_v49 }
 0x9b7   :  { %4121 = vmatprep.subr.mxu1 %v5661_v50  ;;  %v4180_v50 = vld [vmem:[%s9333_s7] sm:$0x1f] }
 0x9b8   :  { %4122 = vmatpush1.msra.mxu1 %v5660_v51  ;;  %v5685_v51 = vld [vmem:[%s9333_s7 + $0x8] sm:$0x1f] }
 0x9b9   :  { %4123 = vmatprep.subr.mxu1 %v5659_v52  ;;  %v4353_v52 = vld [vmem:[%s9334_s8 + $0x78] sm:$0xff] }
 0x9ba   :  { %4124 = vmatpush1.msra.mxu1 %v5658_v53  ;;  %v4352_v53 = vld [vmem:[%s9334_s8 + $0x70] sm:$0xff] }
 0x9bb   :  { %4125 = vmatprep.subr.mxu1 %v5657_v54  ;;  %v4351_v54 = vld [vmem:[%s9334_s8 + $0x68] sm:$0xff] }
 0x9bc   :  { %4126 = vmatpush1.msra.mxu1 %v5656_v55  ;;  %v4350_v55 = vld [vmem:[%s9334_s8 + $0x60] sm:$0xff] }
 0x9bd   :  { %4127 = vmatprep.subr.mxu1 %v5655_v56  ;;  %v4349_v56 = vld [vmem:[%s9334_s8 + $0x58] sm:$0xff] }
 0x9be   :  { %4128 = vmatpush1.msra.mxu1 %v5654_v57  ;;  %v4348_v57 = vld [vmem:[%s9334_s8 + $0x50] sm:$0xff] }
 0x9bf   :  { %4129 = vmatprep.subr.mxu1 %v5653_v58  ;;  %v4347_v58 = vld [vmem:[%s9334_s8 + $0x48] sm:$0xff] }
 0x9c0   :  { %4130 = vmatpush1.msra.mxu1 %v5652_v59  ;;  %v4346_v59 = vld [vmem:[%s9334_s8 + $0x40] sm:$0xff] }
 0x9c1   :  { %5680 = vmatmul.mubr.msk.f32.vlgmr.msra.gmra.mxu1 %vm1055_vm4, %v4063_v60  ;;  %4451 = vmatprep.subr.mxu1 %v6332_v18  ;;  %v4345_v60 = vld [vmem:[%s9334_s8 + $0x38] sm:$0xff] }
 0x9c2   :  { %4169 = vmatprep.mubr.f32.mxu1 %v6332_v18  ;;  %4452 = vmatpush1.msra.mxu1 %v5705_v62  ;;  %v4343_v62 = vld [vmem:[%s9334_s8 + $0x28] sm:$0xff] }
 0x9c3   :  { %4453 = vmatprep.subr.mxu1 %v6332_v18 }
 0x9c4   :  { %4454 = vmatpush1.msra.mxu1 %v5704_v63  ;;  %v4342_v63 = vld [vmem:[%s9334_s8 + $0x20] sm:$0xff] }
 0x9c5   :  { %5681 = vmatmul.mubr.msk.f32.gmra.mxu1 %vm1055_vm4, %v4064_v61  ;;  %4455 = vmatprep.subr.mxu1 %v6332_v18  ;;  %v4344_v61 = vld [vmem:[%s9334_s8 + $0x30] sm:$0xff] }
 0x9c6   :  { %4456 = vmatpush1.msra.mxu1 %v5703_v4  ;;  %v4341_v4 = vld [vmem:[%s9334_s8 + $0x18] sm:$0xff] }
 0x9c7   :  { %4457 = vmatprep.subr.mxu1 %v6332_v18 }
 0x9c8   :  { %4458 = vmatpush1.msra.mxu1 %v5702_v3  ;;  %v4340_v3 = vld [vmem:[%s9334_s8 + $0x10] sm:$0xff] }
 0x9c9   :  { %4459 = vmatprep.subr.mxu1 %v6332_v18 }
 0x9ca   :  { %4460 = vmatpush1.msra.mxu1 %v5701_v2  ;;  %v4339_v2 = vld [vmem:[%s9334_s8 + $0x8] sm:$0xff] }
 0x9cb   :  { %4461 = vmatprep.subr.mxu1 %v6332_v18 }
 0x9cc   :  { %4462 = vmatpush1.msra.mxu1 %v5700_v5  ;;  %v4338_v5 = vld [vmem:[%s9334_s8] sm:$0xff] }
 0x9cd   :  { %4463 = vmatprep.subr.mxu1 %v6332_v18 }
 0x9ce   :  { %4464 = vmatpush1.msra.mxu1 %v5699_v6  ;;  %v5690_v6 = vld [vmem:[%s9334_s8 + $0xa0] sm:$0xff] }
 0x9cf   :  { %4465 = vmatprep.subr.mxu1 %v6332_v18 }
 0x9d0   :  { %4466 = vmatpush1.msra.mxu1 %v5698_v7  ;;  %v4357_v7 = vld [vmem:[%s9334_s8 + $0x98] sm:$0xff] }
 0x9d1   :  { %4467 = vmatprep.subr.mxu1 %v6332_v18 }
 0x9d2   :  { %4468 = vmatpush1.msra.mxu1 %v5697_v1  ;;  %v5709_v1 = vld [vmem:[%s9334_s8 + $0x138] sm:$0xff] }
 0x9d3   :  { %4469 = vmatprep.subr.mxu1 %v6332_v18 }
 0x9d4   :  { %4470 = vmatpush1.msra.mxu1 %v5696_v0  ;;  %v4356_v0 = vld [vmem:[%s9334_s8 + $0x90] sm:$0xff] }
 0x9d5   :  { %4471 = vmatprep.subr.mxu1 %v6332_v18 }
 0x9d6   :  { %4472 = vmatpush1.msra.mxu1 %v5695_v12  ;;  %v5708_v12 = vld [vmem:[%s9334_s8 + $0x130] sm:$0xff] }
 0x9d7   :  { %4473 = vmatprep.subr.mxu1 %v6332_v18 }
 0x9d8   :  { %4474 = vmatpush1.msra.mxu1 %v5694_v10  ;;  %v4355_v10 = vld [vmem:[%s9334_s8 + $0x88] sm:$0xff] }
 0x9d9   :  { %4475 = vmatprep.subr.mxu1 %v6332_v18 }
 0x9da   :  { %4476 = vmatpush1.msra.mxu1 %v5693_v9  ;;  %v5707_v9 = vld [vmem:[%s9334_s8 + $0x128] sm:$0xff] }
 0x9db   :  { %4477 = vmatprep.subr.mxu1 %v6332_v18 }
 0x9dc   :  { %4478 = vmatpush1.msra.mxu1 %v5692_v8  ;;  %v4354_v8 = vld [vmem:[%s9334_s8 + $0x80] sm:$0xff] }
 0x9dd   :  { %4479 = vmatprep.subr.mxu1 %v6332_v18 }
 0x9de   :  { %4480 = vmatpush1.msra.mxu1 %v5691_v11  ;;  %v5706_v11 = vld [vmem:[%s9334_s8 + $0x120] sm:$0xff] }
 0x9df   :  { %4481 = vmatprep.subr.mxu1 %v6332_v18 }
 0x9e0   :  { %4482 = vmatpush1.msra.mxu1 %v5690_v6  ;;  %v5724_v6 = vld [vmem:[%s9335_s9 + $0xa0] sm:$0xff] }
 0x9e1   :  { %4507 = vmatprep.subr.mxu1 %v6332_v18 }
 0x9e2   :  { %4508 = vmatpush2.msra.mxu1 %v5709_v1 }
 0x9e3   :  { %4509 = vmatprep.subr.mxu1 %v6332_v18 }
 0x9e4   :  { %4510 = vmatpush2.msra.mxu1 %v5708_v12  ;;  %v5755_v12 = vld [vmem:[%s9335_s9 + $0x188] sm:$0xff] }
 0x9e5   :  { %4511 = vmatprep.subr.mxu1 %v6332_v18 }
 0x9e6   :  { %4512 = vmatpush2.msra.mxu1 %v5707_v9  ;;  %v5753_v9 = vld [vmem:[%s9335_s9 + $0x178] sm:$0xff] }
 0x9e7   :  { %4513 = vmatprep.subr.mxu1 %v6332_v18 }
 0x9e8   :  { %4514 = vmatpush2.msra.mxu1 %v5706_v11  ;;  %v5751_v11 = vld [vmem:[%s9335_s9 + $0x168] sm:$0xff] }
 0x9e9   :  { %6143 = vmatprep.subr.mxu1 %v6332_v18 }
 0xa42   :  { %v3818_v15 = vpop.f32.mrf.mxu0 }
 0xa44   :  { %v3820_v17 = vpop.f32.mrf.mxu0 }
 0xa46   :  { %v3735_v13 = vpop.f32.mrf.mxu1 }
 0xa47   :  { %v3824_v23 = vpop.f32.mrf.mxu0  ;;  %v3819_v34 = vadd.f32 %v3818_v15, %v3735_v13 }
 0xa48   :  { %v3737_v14 = vpop.f32.mrf.mxu1 }
 0xa49   :  { %v3826_v21 = vpop.f32.mrf.mxu0  ;;  %v3821_v32 = vadd.f32 %v3820_v17, %v3737_v14 }
 0xa4c   :  { %v3741_v16 = vpop.f32.mrf.mxu1 }
 0xa4d   :  { %v3825_v29 = vadd.f32 %v3824_v23, %v3741_v16  ;;  %v4544_v23 = vld [vmem:[%s9335_s9 + $0x48] sm:$0xff] }
 0xa4e   :  { %v3743_v25 = vpop.f32.mrf.mxu1 }
 0xa4f   :  { %v3827_v28 = vadd.f32 %v3826_v21, %v3743_v25  ;;  %v4543_v21 = vld [vmem:[%s9335_s9 + $0x40] sm:$0xff] }
 0xa60   :  { %v4048_v20 = vpop.f32.mrf.mxu0 }
 0xa62   :  { %v4050_v26 = vpop.f32.mrf.mxu0 }
 0xa64   :  { %v3931_v24 = vpop.f32.mrf.mxu1  ;;  %v4054_v30 = vpop.f32.mrf.mxu0 }
 0xa65   :  { %v3942_v38 = vadd.f32 %v3931_v24, %v3819_v34  ;;  %v5722_v24 = vld [vmem:[%s9335_s9 + $0x98] sm:$0xff]  ;;  %v4537_v34 = vld [vmem:[%s9335_s9 + $0x10] sm:$0xff] }
 0xa66   :  { %v3933_v19 = vpop.f32.mrf.mxu1  ;;  %v4056_v39 = vpop.f32.mrf.mxu0 }
 0xa67   :  { %v3943_v37 = vadd.f32 %v3933_v19, %v3821_v32  ;;  %v4059_v46 = vadd.f32 %v4048_v20, %v3942_v38  ;;  %v5721_v19 = vld [vmem:[%s9335_s9 + $0x90] sm:$0xff]  ;;  %v4542_v20 = vld [vmem:[%s9335_s9 + $0x38] sm:$0xff]  ;;  %v4535_v38 = vld [vmem:[%s9335_s9] sm:$0xff] }
 0xa68   :  { %v4538_v32 = vld [vmem:[%s9335_s9 + $0x18] sm:$0xff] }
 0xa69   :  { %v3937_v22 = vpop.f32.mrf.mxu1  ;;  %v4060_v44 = vadd.f32 %v4050_v26, %v3943_v37  ;;  %v4541_v26 = vld [vmem:[%s9335_s9 + $0x30] sm:$0xff]  ;;  %v5714_v37 = vld [vmem:[%s9335_s9 + $0x58] sm:$0xff] }
 0xa6a   :  { %v3944_v35 = vadd.f32 %v3937_v22, %v3825_v29  ;;  %v5720_v22 = vld [vmem:[%s9335_s9 + $0x88] sm:$0xff]  ;;  %v5718_v29 = vld [vmem:[%s9335_s9 + $0x78] sm:$0xff] }
 0xa6b   :  { %v3939_v27 = vpop.f32.mrf.mxu1 }
 0xa6c   :  { %v3945_v33 = vadd.f32 %v3939_v27, %v3827_v28  ;;  %v4061_v42 = vadd.f32 %v4054_v30, %v3944_v35  ;;  %v5719_v27 = vld [vmem:[%s9335_s9 + $0x80] sm:$0xff]  ;;  %v4540_v28 = vld [vmem:[%s9335_s9 + $0x28] sm:$0xff] }
 0xa6d   :  { %v4539_v30 = vld [vmem:[%s9335_s9 + $0x20] sm:$0xff] }
 0xa6e   :  { %v4062_v41 = vadd.f32 %v4056_v39, %v3945_v33  ;;  %v5716_v33 = vld [vmem:[%s9335_s9 + $0x68] sm:$0xff]  ;;  %v5715_v35 = vld [vmem:[%s9335_s9 + $0x60] sm:$0xff]  ;;  %v5713_v39 = vld [vmem:[%s9335_s9 + $0x50] sm:$0xff] }
 0xa81   :  { %v4165_v31 = vpop.f32.mrf.mxu1 }
 0xa82   :  { %v4176_v49 = vadd.f32 %v4165_v31, %v4059_v46  ;;  %v5717_v31 = vld [vmem:[%s9335_s9 + $0x70] sm:$0xff] }
 0xa83   :  { %v4167_v36 = vpop.f32.mrf.mxu1 }
 0xa84   :  { %v4177_v48 = vadd.f32 %v4167_v36, %v4060_v44  ;;  %v4536_v36 = vld [vmem:[%s9335_s9 + $0x8] sm:$0xff] }
 0xa85   :  { %v4171_v40 = vpop.f32.mrf.mxu1 }
 0xa86   :  { %v4178_v47 = vadd.f32 %v4171_v40, %v4061_v42  ;;  %v5711_v42 = vld [vmem:[%s9332_s6] ss:$0 sm:$0xff] }
 0xa87   :  { %v4173_v43 = vpop.f32.mrf.mxu1 }
 0xa88   :  { %v4179_v45 = vadd.f32 %v4173_v43, %v4062_v41 }
 0xa8a   :  { %5682 = vmatprep.subr.msk.mxu0 %vm1645_vm6, %v4179_v45 }
 0xa8b   :  { %5683 = vmatpush1.msk.msra.mxu0 %vm1645_vm6, %v4178_v47 }
 0xa8c   :  { %4220 = vmatprep.subr.mxu0 %v4177_v48 }
 0xa8d   :  { %4221 = vmatpush1.msra.mxu0 %v4176_v49 }
 0xa8e   :  { %5684 = vmatmul.mubr.msk.f32.vlgmr.msra.gmra.mxu0 %vm1641_vm7, %v4180_v50  ;;  %5686 = vmatprep.subr.msk.mxu0 %vm1645_vm6, %v4179_v45 }
 0xa8f   :  { %5687 = vmatpush1.msk.msra.mxu0 %vm1645_vm6, %v4178_v47  ;;  %4329 = vmatprep.mubr.f32.mxu0 %v6332_v18 }
 0xa90   :  { %4295 = vmatprep.subr.mxu0 %v4177_v48  ;;  %v5733_v48 = vld [vmem:[%s9335_s9 + $0xe8] sm:$0xff] }
 0xa91   :  { %4296 = vmatpush1.msra.mxu0 %v4176_v49  ;;  %v5744_v49 = vld [vmem:[%s9335_s9 + $0x138] sm:$0xff] }
 0xa92   :  { %5688 = vmatmul.mubr.msk.f32.vlgmr.msra.gmra.mxu0 %vm1641_vm7, %v5685_v51  ;;  %4361 = vmatprep.subr.mxu0 %v6332_v18 }
 0xa93   :  { %4362 = vmatpush1.msra.mxu0 %v4353_v52  ;;  %v5732_v52 = vld [vmem:[%s9335_s9 + $0xe0] sm:$0xff] }
 0xa94   :  { %4363 = vmatprep.subr.mxu0 %v6332_v18 }
 0xa95   :  { %4364 = vmatpush1.msra.mxu0 %v4352_v53  ;;  %v5743_v53 = vld [vmem:[%s9335_s9 + $0x130] sm:$0xff] }
 0xa96   :  { %4365 = vmatprep.subr.mxu0 %v6332_v18 }
 0xa97   :  { %4366 = vmatpush1.msra.mxu0 %v4351_v54  ;;  %v5731_v54 = vld [vmem:[%s9335_s9 + $0xd8] sm:$0xff] }
 0xa98   :  { %4367 = vmatprep.subr.mxu0 %v6332_v18 }
 0xa99   :  { %4368 = vmatpush1.msra.mxu0 %v4350_v55  ;;  %v5742_v55 = vld [vmem:[%s9335_s9 + $0x128] sm:$0xff] }
 0xa9a   :  { %4369 = vmatprep.subr.mxu0 %v6332_v18 }
 0xa9b   :  { %4370 = vmatpush1.msra.mxu0 %v4349_v56  ;;  %v5730_v56 = vld [vmem:[%s9335_s9 + $0xd0] sm:$0xff] }
 0xa9c   :  { %4371 = vmatprep.subr.mxu0 %v6332_v18 }
 0xa9d   :  { %4372 = vmatpush1.msra.mxu0 %v4348_v57  ;;  %v5741_v57 = vld [vmem:[%s9335_s9 + $0x120] sm:$0xff] }
 0xa9e   :  { %4373 = vmatprep.subr.mxu0 %v6332_v18 }
 0xa9f   :  { %4374 = vmatpush1.msra.mxu0 %v4347_v58  ;;  %v5729_v58 = vld [vmem:[%s9335_s9 + $0xc8] sm:$0xff] }
 0xaa0   :  { %4375 = vmatprep.subr.mxu0 %v6332_v18 }
 0xaa1   :  { %4376 = vmatpush1.msra.mxu0 %v4346_v59  ;;  %v5740_v59 = vld [vmem:[%s9335_s9 + $0x118] sm:$0xff] }
 0xaa2   :  { %4377 = vmatprep.subr.mxu0 %v6332_v18 }
 0xaa3   :  { %4378 = vmatpush1.msra.mxu0 %v4345_v60  ;;  %v5728_v60 = vld [vmem:[%s9335_s9 + $0xc0] sm:$0xff] }
 0xaa4   :  { %4379 = vmatprep.subr.mxu0 %v6332_v18 }
 0xaa5   :  { %4380 = vmatpush1.msra.mxu0 %v4344_v61  ;;  %v5739_v61 = vld [vmem:[%s9335_s9 + $0x110] sm:$0xff] }
 0xaa6   :  { %4381 = vmatprep.subr.mxu0 %v6332_v18 }
 0xaa7   :  { %4382 = vmatpush1.msra.mxu0 %v4343_v62  ;;  %v5727_v62 = vld [vmem:[%s9335_s9 + $0xb8] sm:$0xff] }
 0xaa8   :  { %4383 = vmatprep.subr.mxu0 %v6332_v18 }
 0xaa9   :  { %4384 = vmatpush1.msra.mxu0 %v4342_v63  ;;  %v5738_v63 = vld [vmem:[%s9335_s9 + $0x108] sm:$0xff] }
 0xaaa   :  { %4385 = vmatprep.subr.mxu0 %v6332_v18 }
 0xaab   :  { %4386 = vmatpush1.msra.mxu0 %v4341_v4  ;;  %v5726_v4 = vld [vmem:[%s9335_s9 + $0xb0] sm:$0xff] }
 0xaac   :  { %4387 = vmatprep.subr.mxu0 %v6332_v18 }
 0xaad   :  { %4388 = vmatpush1.msra.mxu0 %v4340_v3  ;;  %v5737_v3 = vld [vmem:[%s9335_s9 + $0x100] sm:$0xff] }
 0xaae   :  { %4389 = vmatprep.subr.mxu0 %v6332_v18 }
 0xaaf   :  { %4390 = vmatpush1.msra.mxu0 %v4339_v2  ;;  %v5725_v2 = vld [vmem:[%s9335_s9 + $0xa8] sm:$0xff] }
 0xab0   :  { %4391 = vmatprep.subr.mxu0 %v6332_v18 }
 0xab1   :  { %4392 = vmatpush1.msra.mxu0 %v4338_v5  ;;  %v5736_v5 = vld [vmem:[%s9335_s9 + $0xf8] sm:$0xff] }
 0xab2   :  { %4417 = vmatprep.subr.mxu0 %v6332_v18 }
 0xab3   :  { %4418 = vmatpush2.msra.mxu0 %v4357_v7  ;;  %v5735_v7 = vld [vmem:[%s9335_s9 + $0xf0] sm:$0xff] }
 0xab4   :  { %4419 = vmatprep.subr.mxu0 %v6332_v18 }
 0xab5   :  { %4420 = vmatpush2.msra.mxu0 %v4356_v0 }
 0xab6   :  { %4421 = vmatprep.subr.mxu0 %v6332_v18 }
 0xab7   :  { %4422 = vmatpush2.msra.mxu0 %v4355_v10  ;;  %v5754_v10 = vld [vmem:[%s9335_s9 + $0x180] sm:$0xff] }
 0xab8   :  { %4423 = vmatprep.subr.mxu0 %v6332_v18 }
 0xab9   :  { %4424 = vmatpush2.msra.mxu0 %v4354_v8  ;;  %v5752_v8 = vld [vmem:[%s9335_s9 + $0x170] sm:$0xff] }
 0xaba   :  { %6120 = vmatprep.subr.mxu0 %v6332_v18 }
 0xb4e   :  { %v4256_v13 = vpop.f32.mrf.mxu0 }
 0xb50   :  { %v4258_v14 = vpop.f32.mrf.mxu0 }
 0xb52   :  { %v4331_v15 = vpop.f32.mrf.mxu0 }
 0xb53   :  { %v4336_v25 = vmax.f32 %v4256_v13, %v4331_v15  ;;  %v5750_v13 = vld [vmem:[%s9335_s9 + $0x160] sm:$0xff]  ;;  %v5748_v15 = vld [vmem:[%s9335_s9 + $0x150] sm:$0xff] }
 0xb54   :  { %v4333_v16 = vpop.f32.mrf.mxu0 }
 0xb55   :  { %v4337_v17 = vmax.f32 %v4258_v14, %v4333_v16  ;;  %v5749_v14 = vld [vmem:[%s9335_s9 + $0x158] sm:$0xff]  ;;  %v5747_v16 = vld [vmem:[%s9335_s9 + $0x148] sm:$0xff] }
 0xb57   :  { %5689 = vmatprep.mubr.msk.f32.mxu0 %vm76_vm0, %v4337_v17  ;;  %5710 = vmatprep.mubr.msk.f32.mxu1 %vm76_vm0, %v4337_v17  ;;  %v5746_v17 = vld [vmem:[%s9335_s9 + $0x140] sm:$0xff] }
 0xb58   :  { %4426 = vmatmul.mubr.f32.vlgmr.msra.gmra.mxu0 %v4336_v25  ;;  %4516 = vmatmul.mubr.f32.vlgmr.msra.gmra.mxu1 %v4336_v25 }
 0xb59   :  { %6121 = vmatpush3.msra.mxu0 %v4544_v23  ;;  %6144 = vmatpush3.msra.mxu1 %v5722_v24  ;;  %v4975_v23 = vld [vmem:[%s9337_s11 + $0x78] sm:$0xff]  ;;  %v4974_v24 = vld [vmem:[%s9337_s11 + $0x70] sm:$0xff] }
 0xb5a   :  { %6122 = vmatprep.subr.mxu0 %v6332_v18  ;;  %6145 = vmatprep.subr.mxu1 %v6332_v18 }
 0xb5b   :  { %6123 = vmatpush3.msra.mxu0 %v4543_v21  ;;  %6146 = vmatpush3.msra.mxu1 %v5721_v19  ;;  %v4973_v21 = vld [vmem:[%s9337_s11 + $0x68] sm:$0xff]  ;;  %v4972_v19 = vld [vmem:[%s9337_s11 + $0x60] sm:$0xff] }
 0xb5c   :  { %6124 = vmatprep.subr.mxu0 %v6332_v18  ;;  %6147 = vmatprep.subr.mxu1 %v6332_v18 }
 0xb5d   :  { %6125 = vmatpush3.msra.mxu0 %v4542_v20  ;;  %6148 = vmatpush3.msra.mxu1 %v5720_v22  ;;  %v4971_v20 = vld [vmem:[%s9337_s11 + $0x58] sm:$0xff]  ;;  %v4970_v22 = vld [vmem:[%s9337_s11 + $0x50] sm:$0xff] }
 0xb5e   :  { %6126 = vmatprep.subr.mxu0 %v6332_v18  ;;  %6149 = vmatprep.subr.mxu1 %v6332_v18 }
 0xb5f   :  { %6140 = vmatprep.mubr.msk.f32.mxu0 %vm6333_vm8, %v6332_v18  ;;  %6163 = vmatprep.mubr.msk.f32.mxu1 %vm6333_vm8, %v6332_v18 }
 0xb60   :  { %6127 = vmatpush3.msra.mxu0 %v4541_v26  ;;  %6150 = vmatpush3.msra.mxu1 %v5719_v27  ;;  %v4969_v26 = vld [vmem:[%s9337_s11 + $0x48] sm:$0xff]  ;;  %v4968_v27 = vld [vmem:[%s9337_s11 + $0x40] sm:$0xff] }
 0xb61   :  { %6128 = vmatprep.subr.mxu0 %v6332_v18  ;;  %6151 = vmatprep.subr.mxu1 %v6332_v18 }
 0xb62   :  { %6129 = vmatpush3.msra.mxu0 %v4540_v28  ;;  %6152 = vmatpush3.msra.mxu1 %v5718_v29  ;;  %v4967_v28 = vld [vmem:[%s9337_s11 + $0x38] sm:$0xff]  ;;  %v4966_v29 = vld [vmem:[%s9337_s11 + $0x30] sm:$0xff] }
 0xb63   :  { %6130 = vmatprep.subr.mxu0 %v6332_v18  ;;  %6153 = vmatprep.subr.mxu1 %v6332_v18 }
 0xb64   :  { %6131 = vmatpush3.msra.mxu0 %v4539_v30  ;;  %6154 = vmatpush3.msra.mxu1 %v5717_v31  ;;  %v4965_v30 = vld [vmem:[%s9337_s11 + $0x28] sm:$0xff]  ;;  %v4964_v31 = vld [vmem:[%s9337_s11 + $0x20] sm:$0xff] }
 0xb65   :  { %6132 = vmatprep.subr.mxu0 %v6332_v18  ;;  %6155 = vmatprep.subr.mxu1 %v6332_v18 }
 0xb66   :  { %6133 = vmatpush3.msra.mxu0 %v4538_v32  ;;  %6156 = vmatpush3.msra.mxu1 %v5716_v33  ;;  %v4963_v32 = vld [vmem:[%s9337_s11 + $0x18] sm:$0xff]  ;;  %v4962_v33 = vld [vmem:[%s9337_s11 + $0x10] sm:$0xff] }
 0xb67   :  { %6134 = vmatprep.subr.mxu0 %v6332_v18  ;;  %6157 = vmatprep.subr.mxu1 %v6332_v18 }
 0xb68   :  { %6135 = vmatpush3.msra.mxu0 %v4537_v34  ;;  %6158 = vmatpush3.msra.mxu1 %v5715_v35  ;;  %v4961_v34 = vld [vmem:[%s9337_s11 + $0x8] sm:$0xff]  ;;  %v4960_v35 = vld [vmem:[%s9337_s11] sm:$0xff] }
 0xb69   :  { %6136 = vmatprep.subr.mxu0 %v6332_v18  ;;  %6159 = vmatprep.subr.mxu1 %v6332_v18 }
 0xb6a   :  { %6137 = vmatpush3.msra.mxu0 %v4536_v36  ;;  %6160 = vmatpush3.msra.mxu1 %v5714_v37  ;;  %v5063_v36 = vld [vmem:[%s9339_s13 + $0x78] sm:$0xff]  ;;  %v5062_v37 = vld [vmem:[%s9339_s13 + $0x70] sm:$0xff] }
 0xb6b   :  { %6138 = vmatprep.subr.mxu0 %v6332_v18  ;;  %6161 = vmatprep.subr.mxu1 %v6332_v18 }
 0xb6c   :  { %6139 = vmatpush3.msra.mxu0 %v4535_v38  ;;  %6162 = vmatpush3.msra.mxu1 %v5713_v39  ;;  %v5061_v38 = vld [vmem:[%s9339_s13 + $0x68] sm:$0xff]  ;;  %v5060_v39 = vld [vmem:[%s9339_s13 + $0x60] sm:$0xff] }
 0xb6d   :  { %6166 = vmatprep.subr.mxu0 %v6332_v18  ;;  %6189 = vmatprep.subr.mxu1 %v6332_v18 }
 0xc18   :  { %v4427_v40 = vpop.f32.mrf.mxu0  ;;  %v4517_v41 = vpop.f32.mrf.mxu1 }
 0xc19   :  { %v4521_v43 = vmax.f32 %v4427_v40, %v4517_v41  ;;  %v5059_v40 = vld [vmem:[%s9339_s13 + $0x58] sm:$0xff]  ;;  %v5058_v41 = vld [vmem:[%s9339_s13 + $0x50] sm:$0xff] }
 0xc1a   :  { %v4429_v44 = vpop.f32.mrf.mxu0  ;;  %v4519_v45 = vpop.f32.mrf.mxu1 }
 0xc1b   :  { %v4529_v46 = vadd.f32 %v5711_v42, %v4521_v43  ;;  %v5057_v42 = vld [vmem:[%s9339_s13 + $0x48] sm:$0xff]  ;;  %v5056_v43 = vld [vmem:[%s9339_s13 + $0x40] sm:$0xff]  ;;  %v5055_v44 = vld [vmem:[%s9339_s13 + $0x38] sm:$0xff] }
 0xc1c   :  { %v5054_v45 = vld [vmem:[%s9339_s13 + $0x30] sm:$0xff] }
 0xc1d   :  { %v4530_v47 = vmax.f32 %v4529_v46, 0.0  ;;  %v5053_v46 = vld [vmem:[%s9339_s13 + $0x28] sm:$0xff] }
 0xc1f   :  { %4532 = vst.msk [vmem:[#allocation3 + $0x8] sm:$0x1f] %vm1995_vm9, %v4530_v47  ;;  %v5052_v47 = vld [vmem:[%s9339_s13 + $0x20] sm:$0xff] }
 0xc26   :  { %v4534_v50 = vld [vmem:[#allocation3 + $0x8] sm:$0x1]  ;;  %v4619_v51 = vld [vmem:[#allocation3 + $0x9] sm:$0x1]  ;;  %v4704_v1 = vld [vmem:[#allocation3 + $0xa] sm:$0x1] }
 0xc27   :  { %6141 = vmatmul.mubr.msk.f32.vlgmr.msra.gmra.mxu0 %vm2009_vm10, %v4534_v50  ;;  %6164 = vmatmul.mubr.msk.f32.vlgmr.msra.gmra.mxu1 %vm2009_vm10, %v4619_v51  ;;  %v4789_v0 = vld [vmem:[#allocation3 + $0xb] sm:$0x1]  ;;  %v4874_v25 = vld [vmem:[#allocation3 + $0xc] sm:$0x1] }
 0xc28   :  { %6167 = vmatpush3.msra.mxu0 %v5733_v48  ;;  %6190 = vmatpush3.msra.mxu1 %v5744_v49  ;;  %v5051_v48 = vld [vmem:[%s9339_s13 + $0x18] sm:$0xff] }
 0xc29   :  { %6168 = vmatprep.subr.mxu0 %v6332_v18  ;;  %6191 = vmatprep.subr.mxu1 %v6332_v18 }
 0xc2a   :  { %6169 = vmatpush3.msra.mxu0 %v5732_v52  ;;  %6192 = vmatpush3.msra.mxu1 %v5743_v53 }
 0xc2b   :  { %6170 = vmatprep.subr.mxu0 %v6332_v18  ;;  %6193 = vmatprep.subr.mxu1 %v6332_v18 }
 0xc2c   :  { %6171 = vmatpush3.msra.mxu0 %v5731_v54  ;;  %6194 = vmatpush3.msra.mxu1 %v5742_v55 }
 0xc2d   :  { %6172 = vmatprep.subr.mxu0 %v6332_v18  ;;  %6195 = vmatprep.subr.mxu1 %v6332_v18 }
 0xc2e   :  { %6173 = vmatpush3.msra.mxu0 %v5730_v56  ;;  %6196 = vmatpush3.msra.mxu1 %v5741_v57  ;;  %v4533_v57 = vld [vmem:[%s9336_s10] sm:$0x1] }
 0xc2f   :  { %6174 = vmatprep.subr.mxu0 %v6332_v18  ;;  %6197 = vmatprep.subr.mxu1 %v6332_v18 }
 0xc30   :  { %6175 = vmatpush3.msra.mxu0 %v5729_v58  ;;  %6198 = vmatpush3.msra.mxu1 %v5740_v59 }
 0xc31   :  { %6176 = vmatprep.subr.mxu0 %v6332_v18  ;;  %6199 = vmatprep.subr.mxu1 %v6332_v18 }
 0xc32   :  { %6177 = vmatpush3.msra.mxu0 %v5728_v60  ;;  %6200 = vmatpush3.msra.mxu1 %v5739_v61 }
 0xc33   :  { %6178 = vmatprep.subr.mxu0 %v6332_v18  ;;  %6201 = vmatprep.subr.mxu1 %v6332_v18 }
 0xc34   :  { %6179 = vmatpush3.msra.mxu0 %v5727_v62  ;;  %6202 = vmatpush3.msra.mxu1 %v5738_v63 }
 0xc35   :  { %6180 = vmatprep.subr.mxu0 %v6332_v18  ;;  %6203 = vmatprep.subr.mxu1 %v6332_v18 }
 0xc36   :  { %6181 = vmatpush3.msra.mxu0 %v5726_v4  ;;  %6204 = vmatpush3.msra.mxu1 %v5737_v3 }
 0xc37   :  { %6182 = vmatprep.subr.mxu0 %v6332_v18  ;;  %6205 = vmatprep.subr.mxu1 %v6332_v18 }
 0xc38   :  { %6183 = vmatpush3.msra.mxu0 %v5725_v2  ;;  %6206 = vmatpush3.msra.mxu1 %v5736_v5  ;;  %v5050_v2 = vld [vmem:[%s9339_s13 + $0x10] sm:$0xff]  ;;  %v5049_v5 = vld [vmem:[%s9339_s13 + $0x8] sm:$0xff] }
 0xc39   :  { %6184 = vmatprep.subr.mxu0 %v6332_v18  ;;  %6207 = vmatprep.subr.mxu1 %v6332_v18 }
 0xc3a   :  { %6185 = vmatpush3.msra.mxu0 %v5724_v6  ;;  %6186 = vmatprep.mubr.msk.f32.mxu0 %vm6333_vm8, %v6332_v18  ;;  %v5048_v6 = vld [vmem:[%s9339_s13] sm:$0xff]  ;;  %s6310_s13 = scalar_lea.vmem %s5143_s3, 32 }
 0xc3b   :  { %6208 = vmatpush3.msra.mxu1 %v5735_v7  ;;  %6209 = vmatprep.mubr.msk.f32.mxu1 %vm6333_vm8, %v6332_v18  ;;  %v4976_v7 = vld [vmem:[%s9338_s12] sm:$0x1]  ;;  %p6311_p0 = scmp.ne.s32.totalorder %s5143_s3, %s6310_s13  ;;  %p6316_p2 = scmp.lt.s32.totalorder %s6310_s13, %s6310_s13 }
 0xc3c   :  { %6187 = vmatmul.mubr.msk.f32.vlgmr.msra.gmra.mxu0 %vm2009_vm10, %v4704_v1  ;;  %6210 = vmatmul.mubr.msk.f32.vlgmr.msra.gmra.mxu1 %vm2009_vm10, %v4789_v0 }
 0xc3d   :  { %6212 = vmatprep.subr.mxu0 %v6332_v18  ;;  %6232 = vmatprep.mubr.msk.f32.mxu0 %vm6333_vm8, %v6332_v18  ;;  %p6317_p3 = por %p6316_p2, %p6315_p1 }
 0xc3e   :  { %6213 = vmatpush3.msra.mxu0 %v5755_v12  ;;  %6235 = vmatprep.subr.mxu1 %v6332_v18 }
 0xc3f   :  { %6214 = vmatprep.subr.mxu0 %v6332_v18  ;;  %6267 = vmatprep.mubr.msk.f32.mxu1 %vm6333_vm8, %v6332_v18  ;;  %p6318_p4 = pnand %p6317_p3, %p6311_p0 }
 0xc40   :  { %6215 = vmatpush3.msra.mxu0 %v5754_v10  ;;  %6236 = vmatpush3.msra.mxu1 %v4975_v23 }
 0xc41   :  { %6216 = vmatprep.subr.mxu0 %v6332_v18  ;;  %6237 = vmatprep.subr.mxu1 %v6332_v18 }
 0xc42   :  { %6217 = vmatpush3.msra.mxu0 %v5753_v9  ;;  %6238 = vmatpush3.msra.mxu1 %v4974_v24 }
 0xc43   :  { %6218 = vmatprep.subr.mxu0 %v6332_v18  ;;  %6239 = vmatprep.subr.mxu1 %v6332_v18 }
 0xc44   :  { %6219 = vmatpush3.msra.mxu0 %v5752_v8  ;;  %6240 = vmatpush3.msra.mxu1 %v4973_v21 }
 0xc45   :  { %6220 = vmatprep.subr.mxu0 %v6332_v18  ;;  %6241 = vmatprep.subr.mxu1 %v6332_v18 }
 0xc46   :  { %6221 = vmatpush3.msra.mxu0 %v5751_v11  ;;  %6242 = vmatpush3.msra.mxu1 %v4972_v19 }
 0xc47   :  { %6222 = vmatprep.subr.mxu0 %v6332_v18  ;;  %6243 = vmatprep.subr.mxu1 %v6332_v18 }
 0xc48   :  { %6223 = vmatpush3.msra.mxu0 %v5750_v13  ;;  %6244 = vmatpush3.msra.mxu1 %v4971_v20 }
 0xc49   :  { %6224 = vmatprep.subr.mxu0 %v6332_v18  ;;  %6245 = vmatprep.subr.mxu1 %v6332_v18 }
 0xc4a   :  { %6225 = vmatpush3.msra.mxu0 %v5749_v14  ;;  %6246 = vmatpush3.msra.mxu1 %v4970_v22 }
 0xc4b   :  { %6226 = vmatprep.subr.mxu0 %v6332_v18  ;;  %6247 = vmatprep.subr.mxu1 %v6332_v18 }
 0xc4c   :  { %6227 = vmatpush3.msra.mxu0 %v5748_v15  ;;  %6248 = vmatpush3.msra.mxu1 %v4969_v26 }
 0xc4d   :  { %6228 = vmatprep.subr.mxu0 %v6332_v18  ;;  %6249 = vmatprep.subr.mxu1 %v6332_v18 }
 0xc4e   :  { %6229 = vmatpush3.msra.mxu0 %v5747_v16  ;;  %6250 = vmatpush3.msra.mxu1 %v4968_v27 }
 0xc4f   :  { %6230 = vmatprep.subr.mxu0 %v6332_v18  ;;  %6251 = vmatprep.subr.mxu1 %v6332_v18 }
 0xc50   :  { %6231 = vmatpush3.msra.mxu0 %v5746_v17  ;;  %6252 = vmatpush3.msra.mxu1 %v4967_v28 }
 0xc51   :  { %6233 = vmatmul.mubr.msk.f32.vlgmr.msra.gmra.mxu0 %vm2009_vm10, %v4874_v25  ;;  %6270 = vmatprep.subr.mxu0 %v6332_v18 }
 0xc52   :  { %6302 = vmatprep.mubr.msk.f32.mxu0 %vm6333_vm8, %v6332_v18  ;;  %6253 = vmatprep.subr.mxu1 %v6332_v18 }
 0xc53   :  { %6254 = vmatpush3.msra.mxu1 %v4966_v29  ;;  %6271 = vmatpush3.msra.mxu0 %v5063_v36 }
 0xc54   :  { %6255 = vmatprep.subr.mxu1 %v6332_v18  ;;  %6272 = vmatprep.subr.mxu0 %v6332_v18 }
 0xc55   :  { %6256 = vmatpush3.msra.mxu1 %v4965_v30  ;;  %6273 = vmatpush3.msra.mxu0 %v5062_v37 }
 0xc56   :  { %6257 = vmatprep.subr.mxu1 %v6332_v18  ;;  %6274 = vmatprep.subr.mxu0 %v6332_v18 }
 0xc57   :  { %6258 = vmatpush3.msra.mxu1 %v4964_v31  ;;  %6275 = vmatpush3.msra.mxu0 %v5061_v38 }
 0xc58   :  { %6259 = vmatprep.subr.mxu1 %v6332_v18  ;;  %6276 = vmatprep.subr.mxu0 %v6332_v18 }
 0xc59   :  { %6260 = vmatpush3.msra.mxu1 %v4963_v32  ;;  %6277 = vmatpush3.msra.mxu0 %v5060_v39 }
 0xc5a   :  { %6261 = vmatprep.subr.mxu1 %v6332_v18  ;;  %6278 = vmatprep.subr.mxu0 %v6332_v18 }
 0xc5b   :  { %6262 = vmatpush3.msra.mxu1 %v4962_v33  ;;  %6279 = vmatpush3.msra.mxu0 %v5059_v40 }
 0xc5c   :  { %6263 = vmatprep.subr.mxu1 %v6332_v18  ;;  %6280 = vmatprep.subr.mxu0 %v6332_v18 }
 0xc5d   :  { %6264 = vmatpush3.msra.mxu1 %v4961_v34  ;;  %6281 = vmatpush3.msra.mxu0 %v5058_v41 }
 0xc5e   :  { %6265 = vmatprep.subr.mxu1 %v6332_v18  ;;  %6282 = vmatprep.subr.mxu0 %v6332_v18 }
 0xc5f   :  { %6266 = vmatpush3.msra.mxu1 %v4960_v35  ;;  %6283 = vmatpush3.msra.mxu0 %v5057_v42 }
 0xc60   :  { %6284 = vmatprep.subr.mxu0 %v6332_v18 }
 0xc61   :  { %6285 = vmatpush3.msra.mxu0 %v5056_v43 }
 0xc62   :  { %6286 = vmatprep.subr.mxu0 %v6332_v18 }
 0xc63   :  { %6287 = vmatpush3.msra.mxu0 %v5055_v44 }
 0xc64   :  { %6288 = vmatprep.subr.mxu0 %v6332_v18 }
 0xc65   :  { %6289 = vmatpush3.msra.mxu0 %v5054_v45 }
 0xc66   :  { %6290 = vmatprep.subr.mxu0 %v6332_v18 }
 0xc67   :  { %6291 = vmatpush3.msra.mxu0 %v5053_v46 }
 0xc68   :  { %6292 = vmatprep.subr.mxu0 %v6332_v18 }
 0xc69   :  { %6293 = vmatpush3.msra.mxu0 %v5052_v47 }
 0xc6a   :  { %6294 = vmatprep.subr.mxu0 %v6332_v18 }
 0xc6b   :  { %6295 = vmatpush3.msra.mxu0 %v5051_v48 }
 0xc6c   :  { %6296 = vmatprep.subr.mxu0 %v6332_v18 }
 0xc6d   :  { %6297 = vmatpush3.msra.mxu0 %v5050_v2 }
 0xc6e   :  { %6298 = vmatprep.subr.mxu0 %v6332_v18 }
 0xc6f   :  { %6299 = vmatpush3.msra.mxu0 %v5049_v5 }
 0xc70   :  { %6300 = vmatprep.subr.mxu0 %v6332_v18  ;;  %v5064_v18 = vld [vmem:[%s9340_s14] sm:$0x1] }
 0xc71   :  { %6301 = vmatpush3.msra.mxu0 %v5048_v6 }
 0xce7   :  { %v4614_v49 = vpop.f32.mrf.mxu0  ;;  %v4699_v50 = vpop.f32.mrf.mxu1 }
 0xce8   :  { %v4618_v58 = vadd.f32 %v4614_v49, %v4533_v57 }
 0xce9   :  { %v6142_v51 = vpop.f32.mrf.mxu0  ;;  %v6165_v52 = vpop.f32.mrf.mxu1 }
 0xcea   :  { %v4703_v59 = vadd.f32 %v4699_v50, %v4618_v58 }
 0xcfc   :  { %v4784_v53 = vpop.f32.mrf.mxu0  ;;  %v4869_v54 = vpop.f32.mrf.mxu1 }
 0xcfd   :  { %v4788_v60 = vadd.f32 %v4784_v53, %v4703_v59 }
 0xcfe   :  { %v6188_v55 = vpop.f32.mrf.mxu0  ;;  %v6211_v56 = vpop.f32.mrf.mxu1 }
 0xcff   :  { %v4873_v61 = vadd.f32 %v4869_v54, %v4788_v60 }
 0xd11   :  { %v4954_v62 = vpop.f32.mrf.mxu0 }
 0xd12   :  { %v4958_v63 = vadd.f32 %v4954_v62, %v4873_v61 }
 0xd13   :  { %v6234_v4 = vpop.f32.mrf.mxu0 }
 0xd14   :  { %v4959_v3 = vmax.f32 %v4958_v63, 0.0 }
 0xd16   :  { %6268 = vmatmul.mubr.f32.vlgmr.msra.gmra.mxu1 %v4959_v3 }
 0xdd6   :  { %v5043_v1 = vpop.f32.mrf.mxu1 }
 0xdd7   :  { %v5044_v0 = vadd.f32 %v5043_v1, %v4976_v7 }
 0xdd8   :  { %v6269_v12 = vpop.f32.mrf.mxu1 }
 0xdd9   :  { %v5047_v10 = vmax.f32 %v5044_v0, 0.0 }
 0xddb   :  { %6303 = vmatmul.mubr.f32.vlgmr.msra.gmra.mxu0 %v5047_v10 }
 0xe9b   :  { %v5131_v9 = vpop.f32.mrf.mxu0 }
 0xe9c   :  { %v5132_v8 = vadd.f32 %v5131_v9, %v5064_v18 }
 0xe9d   :  { %v6304_v11 = vpop.f32.mrf.mxu0 }
 0xe9e   :  { %5136 = vst [vmem:[#allocation4 + $0x1] sm:$0x1] %v5132_v8 }
 0xe9f   :  { %6321 = shalt.err (!%p6318_p4)
}
 0xea0   :  { %s6335_s12 = smov 16   ;;  %s6336_s2 = smov 1  }
 0xea1   :  { %5148 = dma.vmem_to_hbm [thread:$0]  %s5143_s3, 32, %s9341_s15, [#allocation5], %s6335_s12, %s6335_s12, %s6336_s2  }
 0xea2   :  { %6330 = dma.done.wait [#allocation5], 32  }
 0xea3   :  { %6331 = vsyncadd [#allocation5], 4294967264 }
 0xea4   :  { %5152 = vsyncpa [#allocation5], 1 }

</bundles_post_ra>
